<compile_context>
chip_gen: v7x
topology: tpu7x:2x2x1
jax: 0.10.0
libtpu: 0.0.40
codegen_flags: <defaults>
</compile_context>

<pallas_src>
import functools

import jax
import jax.numpy as jnp
from jax.experimental import pallas as pl
from jax.experimental.pallas import tpu as pltpu

LEAK = 0.2
BN_EPS = 1e-5
# Explicit scoped-VMEM budget: safe on v5e/v6e (128 MiB phys) and v7x (64 MiB).
_VMEM_LIMIT = 32 * 1024 * 1024


# ----------------------------- Pallas kernels ------------------------------

def _conv_lrelu_kernel(w_ref, p_ref, o_ref):
    # [Cout, K] @ [K, tm] -> [Cout, tm] (f32 accumulate), LeakyReLU(0.2),
    # bf16 (or f32) store.
    # TODO(synk): at Cout=8 / K=48 the MXU is ~6% utilized; a VPU broadcast-FMA
    # path would avoid MXU latency, but this layer is DMA-bound anyway.
    y = jnp.dot(w_ref[...], p_ref[...], preferred_element_type=jnp.float32)
    o_ref[...] = jnp.where(y > 0, y, LEAK * y).astype(o_ref.dtype)


def _conv_bn_lrelu_kernel(w_ref, p_ref, g_ref, b_ref, o_ref, sum_ref, ssq_ref,
                          *, m_total):
    # Two-pass tiled conv + train-mode BatchNorm + LeakyReLU.
    #   grid = (2, M // tm): pass 0 accumulates per-channel sum / sumsq over all
    #   M tiles into f32 VMEM scratch; pass 1 recomputes the conv tile,
    #   normalizes with the completed statistics and stores (epilogue in f32).
    ph = pl.program_id(0)            # 0 = statistics pass, 1 = normalize pass
    mi = pl.program_id(1)            # M-tile index
    y = jnp.dot(w_ref[...], p_ref[...], preferred_element_type=jnp.float32)  # [Cout, tm]

    @pl.when(jnp.logical_and(ph == 0, mi == 0))
    def _():
        sum_ref[...] = jnp.zeros_like(sum_ref)
        ssq_ref[...] = jnp.zeros_like(ssq_ref)

    @pl.when(ph == 0)
    def _():
        sum_ref[...] += jnp.sum(y, axis=1, keepdims=True)
        ssq_ref[...] += jnp.sum(y * y, axis=1, keepdims=True)

    @pl.when(ph == 1)
    def _():
        inv_m = 1.0 / m_total
        mean = sum_ref[...] * inv_m
        var = jnp.maximum(ssq_ref[...] * inv_m - mean * mean, 0.0)   # biased var
        scale = jax.lax.rsqrt(var + BN_EPS) * g_ref[...]
        z = (y - mean) * scale + b_ref[...]
        o_ref[...] = jnp.where(z > 0, z, LEAK * z).astype(o_ref.dtype)


def _head_kernel(w3_ref, p_ref, g_ref, b_ref, w4_ref, o_ref, *, n, s):
    # Layer-3 conv + BN + LeakyReLU fused with the folded final 4x4/stride-1
    # conv (= full contraction over (C3, spatial)) + sigmoid.
    # Patch columns are (spatial, sample)-ordered: column = sp * n + sample, so
    # the final conv is `s` static broadcast-FMAs + one sublane reduction --
    # no O(N^2) selection matmul, no N-times-tiled w4.
    y = jnp.dot(w3_ref[...], p_ref[...], preferred_element_type=jnp.float32)  # [C3, s*n]
    m = jnp.mean(y, axis=1, keepdims=True)
    d = y - m
    v = jnp.mean(d * d, axis=1, keepdims=True)                                # biased var
    z = d * jax.lax.rsqrt(v + BN_EPS) * g_ref[...] + b_ref[...]
    z = jnp.where(z > 0, z, LEAK * z)                                         # [C3, s*n]
    acc = z[:, 0:n] * w4_ref[:, 0:1]
    for sp in range(1, s):
        acc = acc + z[:, sp * n:(sp + 1) * n] * w4_ref[:, sp:sp + 1]
    out = jnp.sum(acc, axis=0, keepdims=True)                                 # [1, n]
    # TODO(synk): at production batch, grid the head over samples and keep the
    # output lane-dense instead of this single [1, N] masked store.
    o_ref[...] = jax.nn.sigmoid(out)


# ------------------------------- JAX glue ----------------------------------

def _im2col_cnhw(xc, k, stride, pad, *, spatial_major=False):
    """xc: [C, N, H, W] -> patches [C*k*k, N*Ho*Wo] (rows ordered (c, kh, kw)).

    Columns are (n, ho, wo)-ordered by default; (ho, wo, n)-ordered when
    spatial_major=True (used by the fused head)."""
    C, N, H, W = xc.shape
    xp = jnp.pad(xc, ((0, 0), (0, 0), (pad, pad), (pad, pad)))
    Ho = (H + 2 * pad - k) // stride + 1
    Wo = (W + 2 * pad - k) // stride + 1
    cols = [xp[:, :, i:i + stride * Ho:stride, j:j + stride * Wo:stride]
            for i in range(k) for j in range(k)]
    cols = jnp.stack(cols, axis=1)                     # [C, k*k, N, Ho, Wo]
    if spatial_major:
        cols = cols.transpose(0, 1, 3, 4, 2)           # [C, k*k, Ho, Wo, N]
    return cols.reshape(C * k * k, N * Ho * Wo), Ho, Wo


def _conv_lrelu_layer(xc, w, *, act_dtype, tm=512):
    """Layer 0: conv(4x4, s2, p1) + LeakyReLU on an M-tiled 'parallel' grid.
    tm should grow to 1024-2048 at production M (per-step overhead amortizes;
    'parallel' itself is a no-op on single-TC v5e/v6e)."""
    Cout, Cin, k, _ = w.shape
    N = xc.shape[1]
    patches, Ho, Wo = _im2col_cnhw(xc, k, 2, 1)
    K, M = patches.shape
    n_mt = pl.cdiv(M, tm)
    m_pad = n_mt * tm
    if m_pad != M:                     # zero-pad tail tile (no BN: padding is inert)
        patches = jnp.pad(patches, ((0, 0), (0, m_pad - M)))
    w2 = w.reshape(Cout, K).astype(act_dtype)
    y = pl.pallas_call(
        _conv_lrelu_kernel,
        out_shape=jax.ShapeDtypeStruct((Cout, m_pad), act_dtype),
        grid_spec=pltpu.PrefetchScalarGridSpec(
            num_scalar_prefetch=0,
            grid=(n_mt,),
            in_specs=[pl.BlockSpec((Cout, K), lambda i: (0, 0)),   # weight resident
                      pl.BlockSpec((K, tm), lambda i: (0, i))],
            out_specs=pl.BlockSpec((Cout, tm), lambda i: (0, i)),
        ),
        compiler_params=pltpu.CompilerParams(
            dimension_semantics=("parallel",),
            vmem_limit_bytes=_VMEM_LIMIT),
    )(w2, patches)
    return y[:, :M].reshape(Cout, N, Ho, Wo)


def _bn_tile(m, target):
    """Largest lane-aligned tile <= target that divides m exactly (BN stats
    must cover exactly m columns; zero padding would bias them)."""
    if m <= target:
        return m
    t = (target // 128) * 128
    while t >= 128:
        if m % t == 0:
            return t
        t -= 128
    return m   # TODO(synk): masked partial-tile statistics for awkward M


def _conv_bn_lrelu_layer(xc, w, gamma, beta, *, act_dtype, tm_target=256):
    """Layers 1-2: conv(4x4, s2, p1) + BatchNorm(train) + LeakyReLU(0.2).
    tm_target is small here so the demo exercises the cross-tile sum/sumsq
    reduction; raise to 1024-2048 (v5e/v6e) / ~1024 (v7x) at production M."""
    Cout, Cin, k, _ = w.shape
    N = xc.shape[1]
    patches, Ho, Wo = _im2col_cnhw(xc, k, 2, 1)
    K, M = patches.shape
    tm = _bn_tile(M, tm_target)
    n_mt = M // tm
    w2 = w.reshape(Cout, K).astype(act_dtype)
    g = gamma.reshape(Cout, 1).astype(jnp.float32)
    b = beta.reshape(Cout, 1).astype(jnp.float32)
    kernel = functools.partial(_conv_bn_lrelu_kernel, m_total=float(M))
    y = pl.pallas_call(
        kernel,
        out_shape=jax.ShapeDtypeStruct((Cout, M), act_dtype),
        grid_spec=pltpu.PrefetchScalarGridSpec(
            num_scalar_prefetch=0,
            grid=(2, n_mt),                               # (pass, M tile)
            in_specs=[pl.BlockSpec((Cout, K), lambda p, i: (0, 0)),   # resident
                      pl.BlockSpec((K, tm), lambda p, i: (0, i)),
                      pl.BlockSpec((Cout, 1), lambda p, i: (0, 0)),
                      pl.BlockSpec((Cout, 1), lambda p, i: (0, 0))],
            # i * p: all pass-0 steps map to block 0 (never written in-kernel),
            # so only pass-1 results are ever written back to HBM.
            out_specs=pl.BlockSpec((Cout, tm), lambda p, i: (0, i * p)),
            scratch_shapes=[pltpu.VMEM((Cout, 1), jnp.float32),
                            pltpu.VMEM((Cout, 1), jnp.float32)]),
        compiler_params=pltpu.CompilerParams(
            dimension_semantics=("arbitrary", "arbitrary"),
            vmem_limit_bytes=_VMEM_LIMIT),
    )(w2, patches, g, b)
    return y.reshape(Cout, N, Ho, Wo)


def _head_layer(xc, w3, g3, b3, w4, *, act_dtype):
    """Layer 3 (conv+BN+LeakyReLU) fused with the final conv + sigmoid.
    xc: [C2, N, 8, 8] -> [N, 1, 1, 1]."""
    C3, C2, k, _ = w3.shape
    N = xc.shape[1]
    patches, Ho, Wo = _im2col_cnhw(xc, k, 2, 1, spatial_major=True)   # Ho = Wo = 4
    S = Ho * Wo
    w3r = w3.reshape(C3, C2 * k * k).astype(act_dtype)
    args = (w3r, patches,
            g3.reshape(C3, 1).astype(jnp.float32),
            b3.reshape(C3, 1).astype(jnp.float32),
            w4.reshape(C3, S).astype(jnp.float32))
    out = pl.pallas_call(
        functools.partial(_head_kernel, n=N, s=S),
        out_shape=jax.ShapeDtypeStruct((1, N), jnp.float32),
        in_specs=[pl.BlockSpec(memory_space=pltpu.MemorySpace.VMEM)] * len(args),
        out_specs=pl.BlockSpec(memory_space=pltpu.MemorySpace.VMEM),
        compiler_params=pltpu.CompilerParams(vmem_limit_bytes=_VMEM_LIMIT),
    )(*args)
    return out.reshape(N, 1, 1, 1)


def discriminator_forward(x, params, *, use_bf16=True):
    # x: NCHW.  One-time transpose to channel-major [C, N, H, W]; activations
    # stay channel-major (lane-dense [Cout, N*Ho*Wo]) and, on the bf16 path,
    # are stored / ferried between layers in bf16 (halved glue HBM traffic).
    act_dtype = jnp.bfloat16 if use_bf16 else jnp.float32
    xc = x.transpose(1, 0, 2, 3).astype(act_dtype)
    xc = _conv_lrelu_layer(xc, params["w0"], act_dtype=act_dtype)
    xc = _conv_bn_lrelu_layer(xc, params["w1"], params["g1"], params["b1"],
                              act_dtype=act_dtype)
    xc = _conv_bn_lrelu_layer(xc, params["w2"], params["g2"], params["b2"],
                              act_dtype=act_dtype)
    return _head_layer(xc, params["w3"], params["g3"], params["b3"],
                       params["w4"], act_dtype=act_dtype)


def init_params(key, channels_img, features_d):
    ks = jax.random.split(key, 12)
    fd = features_d

    def wconv(k, cout, cin):
        return 0.05 * jax.random.normal(k, (cout, cin, 4, 4), jnp.float32)

    return {
        "w0": wconv(ks[0], fd, channels_img),
        "w1": wconv(ks[1], fd * 2, fd),
        "g1": 1.0 + 0.1 * jax.random.normal(ks[2], (fd * 2,), jnp.float32),
        "b1": 0.1 * jax.random.normal(ks[3], (fd * 2,), jnp.float32),
        "w2": wconv(ks[4], fd * 4, fd * 2),
        "g2": 1.0 + 0.1 * jax.random.normal(ks[5], (fd * 4,), jnp.float32),
        "b2": 0.1 * jax.random.normal(ks[6], (fd * 4,), jnp.float32),
        "w3": wconv(ks[7], fd * 8, fd * 4),
        "g3": 1.0 + 0.1 * jax.random.normal(ks[8], (fd * 8,), jnp.float32),
        "b3": 0.1 * jax.random.normal(ks[9], (fd * 8,), jnp.float32),
        "w4": wconv(ks[10], 1, fd * 8),
    }


# --------------------------- pure-JAX reference -----------------------------

def reference_forward(x, params):
    hp = jax.lax.Precision.HIGHEST

    def conv(x, w, stride, pad):
        return jax.lax.conv_general_dilated(
            x, w, (stride, stride), [(pad, pad), (pad, pad)],
            dimension_numbers=("NCHW", "OIHW", "NCHW"), precision=hp)

    def lrelu(x):
        return jnp.where(x > 0, x, LEAK * x)

    def bn(x, g, b):
        m = jnp.mean(x, axis=(0, 2, 3), keepdims=True)
        v = jnp.var(x, axis=(0, 2, 3), keepdims=True)  # biased, train-mode BN
        return (x - m) * jax.lax.rsqrt(v + BN_EPS) * g.reshape(1, -1, 1, 1) + b.reshape(1, -1, 1, 1)

    x = lrelu(conv(x, params["w0"], 2, 1))
    x = lrelu(bn(conv(x, params["w1"], 2, 1), params["g1"], params["b1"]))
    x = lrelu(bn(conv(x, params["w2"], 2, 1), params["g2"], params["b2"]))
    x = lrelu(bn(conv(x, params["w3"], 2, 1), params["g3"], params["b3"]))
    x = jax.nn.sigmoid(conv(x, params["w4"], 1, 0))
    return x


# ----------------------------------- main -----------------------------------

if __name__ == "__main__":
    # DC-GAN discriminator requires 64x64 spatial input (64->32->16->8->4->1).
    batch, channels_img, features_d, img = 2, 3, 8, 64

    key = jax.random.PRNGKey(0)
    kx, kp = jax.random.split(key)
    x = jax.random.normal(kx, (batch, channels_img, img, img), jnp.float32)
    params = init_params(kp, channels_img, features_d)

    fwd = jax.jit(discriminator_forward, static_argnames=("use_bf16",))

    # bf16 activations + bf16 MXU operands, f32 accumulate/epilogue (default).
    out = jax.block_until_ready(fwd(x, params))
    assert out.shape == (batch, 1, 1, 1), out.shape

    ref = jax.block_until_ready(reference_forward(x, params))

    # f32 verification path: tight check against HIGHEST-precision XLA conv
    # (exercises the same kernels / layouts / BN reduction, only wider dtype).
    out_f32 = jax.block_until_ready(fwd(x, params, use_bf16=False))
    if not jnp.allclose(out_f32, ref, atol=2e-2, rtol=2e-2):
        raise AssertionError(f"f32 mismatch: kernel={out_f32.ravel()} ref={ref.ravel()}")

    # bf16 path: activations are stored bf16 between layers, so tolerance is
    # precision-only slack (layout bugs would be caught by the f32 check).
    if not jnp.allclose(out, ref, atol=1e-1, rtol=1e-1):
        raise AssertionError(f"bf16 mismatch: kernel={out.ravel()} ref={ref.ravel()}")

    print("KERNEL_OK")
</pallas_src>

<mosaic_0001>
module attributes {stable_mosaic.version = 11 : i64} {
  func.func @_conv_lrelu_kernel(%arg0: i32, %arg1: memref<8x48xbf16, #tpu.memory_space<vmem>>, %arg2: memref<48x512xbf16, #tpu.memory_space<vmem>>, %arg3: memref<8x512xbf16, #tpu.memory_space<vmem>>) attributes {dimension_semantics = [#tpu.dimension_semantics<parallel>], iteration_bounds = array<i64: 4>, scalar_prefetch = 0 : i64, scratch_operands = 0 : i64, tpu.core_type = #tpu.core_type<tc>, window_params = [{pipeline_mode = #tpu.pipeline_mode<synchronous>, transform_indices = @transform_0, window_bounds = array<i64: 8, 48>}, {transform_indices = @transform_1, window_bounds = array<i64: 48, 512>}, {transform_indices = @transform_2, window_bounds = array<i64: 8, 512>}]} {
    %c0 = arith.constant 0 : index
    %c0_0 = arith.constant 0 : index
    %0 = vector.load %arg1[%c0, %c0_0] : memref<8x48xbf16, #tpu.memory_space<vmem>>, vector<8x48xbf16>
    %c0_1 = arith.constant 0 : index
    %c0_2 = arith.constant 0 : index
    %1 = vector.load %arg2[%c0_1, %c0_2] : memref<48x512xbf16, #tpu.memory_space<vmem>>, vector<48x512xbf16>
    %cst = arith.constant dense<0.000000e+00> : vector<8x512xf32>
    %2 = tpu.matmul %0, %1, %cst {dimension_numbers = #tpu.dot_dimension_numbers<[1], [0], [0], [1], [0, 0, 1, 1], [], []>} : vector<8x48xbf16>, vector<48x512xbf16>, vector<8x512xf32> -> vector<8x512xf32>
    %cst_3 = arith.constant 0.000000e+00 : f32
    %3 = vector.broadcast %cst_3 : f32 to vector<8x512xf32>
    %4 = arith.cmpf ogt, %2, %3 : vector<8x512xf32>
    %cst_4 = arith.constant 2.000000e-01 : f32
    %5 = vector.broadcast %cst_4 : f32 to vector<8x512xf32>
    %6 = arith.mulf %5, %2 : vector<8x512xf32>
    %7 = arith.select %4, %2, %6 : vector<8x512xi1>, vector<8x512xf32>
    %8 = arith.truncf %7 : vector<8x512xf32> to vector<8x512xbf16>
    %c0_5 = arith.constant 0 : index
    %c0_6 = arith.constant 0 : index
    %9 = vector.load %arg3[%c0_5, %c0_6] : memref<8x512xbf16, #tpu.memory_space<vmem>>, vector<8x512xbf16>
    tpu.vector_store %arg3[%c0_5, %c0_6], %8 {strides = array<i32>} : memref<8x512xbf16, #tpu.memory_space<vmem>>, vector<8x512xbf16>,
    return
  }
  func.func @transform_0(%arg0: i32) -> (i32, i32) {
    %c0_i32 = arith.constant 0 : i32
    %c0_i32_0 = arith.constant 0 : i32
    %c0_i32_1 = arith.constant 0 : i32
    return %c0_i32, %c0_i32_0 : i32, i32
  }
  func.func @transform_1(%arg0: i32) -> (i32, i32) {
    %c0_i32 = arith.constant 0 : i32
    %c0_i32_0 = arith.constant 0 : i32
    return %c0_i32, %arg0 : i32, i32
  }
  func.func @transform_2(%arg0: i32) -> (i32, i32) {
    %c0_i32 = arith.constant 0 : i32
    %c0_i32_0 = arith.constant 0 : i32
    return %c0_i32, %arg0 : i32, i32
  }
}

module attributes {stable_mosaic.version = 11 : i64} {
  func.func @_conv_bn_lrelu_kernel(%arg0: i32, %arg1: i32, %arg2: memref<16x128xbf16, #tpu.memory_space<vmem>>, %arg3: memref<128x256xbf16, #tpu.memory_space<vmem>>, %arg4: memref<16x1xf32, #tpu.memory_space<vmem>>, %arg5: memref<16x1xf32, #tpu.memory_space<vmem>>, %arg6: memref<16x256xbf16, #tpu.memory_space<vmem>>, %arg7: memref<16x1xf32, #tpu.memory_space<vmem>>, %arg8: memref<16x1xf32, #tpu.memory_space<vmem>>) attributes {dimension_semantics = [#tpu.dimension_semantics<arbitrary>, #tpu.dimension_semantics<arbitrary>], iteration_bounds = array<i64: 2, 2>, scalar_prefetch = 0 : i64, scratch_operands = 2 : i64, tpu.core_type = #tpu.core_type<tc>, window_params = [{pipeline_mode = #tpu.pipeline_mode<synchronous>, transform_indices = @transform_0, window_bounds = array<i64: 16, 128>}, {transform_indices = @transform_1, window_bounds = array<i64: 128, 256>}, {pipeline_mode = #tpu.pipeline_mode<synchronous>, transform_indices = @transform_2, window_bounds = array<i64: 16, 1>}, {pipeline_mode = #tpu.pipeline_mode<synchronous>, transform_indices = @transform_3, window_bounds = array<i64: 16, 1>}, {transform_indices = @transform_4, window_bounds = array<i64: 16, 256>}]} {
    %c0 = arith.constant 0 : index
    %c0_0 = arith.constant 0 : index
    %0 = vector.load %arg2[%c0, %c0_0] : memref<16x128xbf16, #tpu.memory_space<vmem>>, vector<16x128xbf16>
    %c0_1 = arith.constant 0 : index
    %c0_2 = arith.constant 0 : index
    %1 = vector.load %arg3[%c0_1, %c0_2] : memref<128x256xbf16, #tpu.memory_space<vmem>>, vector<128x256xbf16>
    %cst = arith.constant dense<0.000000e+00> : vector<16x256xf32>
    %2 = tpu.matmul %0, %1, %cst {dimension_numbers = #tpu.dot_dimension_numbers<[1], [0], [0], [1], [0, 0, 1, 1], [], []>} : vector<16x128xbf16>, vector<128x256xbf16>, vector<16x256xf32> -> vector<16x256xf32>
    %c0_i32 = arith.constant 0 : i32
    %3 = arith.cmpi eq, %arg0, %c0_i32 : i32
    %c0_i32_3 = arith.constant 0 : i32
    %4 = arith.cmpi eq, %arg1, %c0_i32_3 : i32
    %5 = arith.andi %3, %4 : i1
    %6 = arith.extui %5 : i1 to i32
    %c0_i32_4 = arith.constant 0 : i32
    %7 = arith.cmpi ne, %6, %c0_i32_4 : i32
    scf.if %7 {
      %cst_8 = arith.constant 0.000000e+00 : f32
      %14 = vector.broadcast %cst_8 : f32 to vector<16x1xf32>
      %c0_9 = arith.constant 0 : index
      %c0_10 = arith.constant 0 : index
      %15 = vector.load %arg7[%c0_9, %c0_10] : memref<16x1xf32, #tpu.memory_space<vmem>>, vector<16x1xf32>
      tpu.vector_store %arg7[%c0_9, %c0_10], %14 {strides = array<i32>} : memref<16x1xf32, #tpu.memory_space<vmem>>, vector<16x1xf32>,
      %cst_11 = arith.constant 0.000000e+00 : f32
      %16 = vector.broadcast %cst_11 : f32 to vector<16x1xf32>
      %c0_12 = arith.constant 0 : index
      %c0_13 = arith.constant 0 : index
      %17 = vector.load %arg8[%c0_12, %c0_13] : memref<16x1xf32, #tpu.memory_space<vmem>>, vector<16x1xf32>
      tpu.vector_store %arg8[%c0_12, %c0_13], %16 {strides = array<i32>} : memref<16x1xf32, #tpu.memory_space<vmem>>, vector<16x1xf32>,
    } else {
    }
    %c0_i32_5 = arith.constant 0 : i32
    %8 = arith.cmpi eq, %arg0, %c0_i32_5 : i32
    %9 = arith.extui %8 : i1 to i32
    %c0_i32_6 = arith.constant 0 : i32
    %10 = arith.cmpi ne, %9, %c0_i32_6 : i32
    scf.if %10 {
      %c0_8 = arith.constant 0 : index
      %c0_9 = arith.constant 0 : index
      %14 = vector.load %arg7[%c0_8, %c0_9] : memref<16x1xf32, #tpu.memory_space<vmem>>, vector<16x1xf32>
      %cst_10 = arith.constant dense<0.000000e+00> : vector<16xf32>
      %15 = vector.multi_reduction <add>, %2, %cst_10 [1] : vector<16x256xf32> to vector<16xf32>
      %16 = vector.shape_cast %15 : vector<16xf32> to vector<16x1xf32>
      %17 = arith.addf %14, %16 : vector<16x1xf32>
      %c0_11 = arith.constant 0 : index
      %c0_12 = arith.constant 0 : index
      %18 = vector.load %arg7[%c0_11, %c0_12] : memref<16x1xf32, #tpu.memory_space<vmem>>, vector<16x1xf32>
      tpu.vector_store %arg7[%c0_11, %c0_12], %17 {strides = array<i32>} : memref<16x1xf32, #tpu.memory_space<vmem>>, vector<16x1xf32>,
      %c0_13 = arith.constant 0 : index
      %c0_14 = arith.constant 0 : index
      %19 = vector.load %arg8[%c0_13, %c0_14] : memref<16x1xf32, #tpu.memory_space<vmem>>, vector<16x1xf32>
      %20 = arith.mulf %2, %2 : vector<16x256xf32>
      %cst_15 = arith.constant dense<0.000000e+00> : vector<16xf32>
      %21 = vector.multi_reduction <add>, %20, %cst_15 [1] : vector<16x256xf32> to vector<16xf32>
      %22 = vector.shape_cast %21 : vector<16xf32> to vector<16x1xf32>
      %23 = arith.addf %19, %22 : vector<16x1xf32>
      %c0_16 = arith.constant 0 : index
      %c0_17 = arith.constant 0 : index
      %24 = vector.load %arg8[%c0_16, %c0_17] : memref<16x1xf32, #tpu.memory_space<vmem>>, vector<16x1xf32>
      tpu.vector_store %arg8[%c0_16, %c0_17], %23 {strides = array<i32>} : memref<16x1xf32, #tpu.memory_space<vmem>>, vector<16x1xf32>,
    } else {
    }
    %c1_i32 = arith.constant 1 : i32
    %11 = arith.cmpi eq, %arg0, %c1_i32 : i32
    %12 = arith.extui %11 : i1 to i32
    %c0_i32_7 = arith.constant 0 : i32
    %13 = arith.cmpi ne, %12, %c0_i32_7 : i32
    scf.if %13 {
      %c0_8 = arith.constant 0 : index
      %c0_9 = arith.constant 0 : index
      %14 = vector.load %arg7[%c0_8, %c0_9] : memref<16x1xf32, #tpu.memory_space<vmem>>, vector<16x1xf32>
      %cst_10 = arith.constant 0.001953125 : f32
      %15 = vector.broadcast %cst_10 : f32 to vector<16x1xf32>
      %16 = arith.mulf %14, %15 : vector<16x1xf32>
      %c0_11 = arith.constant 0 : index
      %c0_12 = arith.constant 0 : index
      %17 = vector.load %arg8[%c0_11, %c0_12] : memref<16x1xf32, #tpu.memory_space<vmem>>, vector<16x1xf32>
      %cst_13 = arith.constant 0.001953125 : f32
      %18 = vector.broadcast %cst_13 : f32 to vector<16x1xf32>
      %19 = arith.mulf %17, %18 : vector<16x1xf32>
      %20 = arith.mulf %16, %16 : vector<16x1xf32>
      %21 = arith.subf %19, %20 : vector<16x1xf32>
      %cst_14 = arith.constant 0.000000e+00 : f32
      %22 = vector.broadcast %cst_14 : f32 to vector<16x1xf32>
      %23 = arith.maximumf %21, %22 : vector<16x1xf32>
      %cst_15 = arith.constant 9.99999974E-6 : f32
      %24 = vector.broadcast %cst_15 : f32 to vector<16x1xf32>
      %25 = arith.addf %23, %24 : vector<16x1xf32>
      %26 = math.rsqrt %25 : vector<16x1xf32>
      %c0_16 = arith.constant 0 : index
      %c0_17 = arith.constant 0 : index
      %27 = vector.load %arg4[%c0_16, %c0_17] : memref<16x1xf32, #tpu.memory_space<vmem>>, vector<16x1xf32>
      %28 = arith.mulf %26, %27 : vector<16x1xf32>
      %29 = vector.broadcast %16 : vector<16x1xf32> to vector<16x256xf32>
      %30 = arith.subf %2, %29 : vector<16x256xf32>
      %31 = vector.broadcast %28 : vector<16x1xf32> to vector<16x256xf32>
      %32 = arith.mulf %30, %31 : vector<16x256xf32>
      %c0_18 = arith.constant 0 : index
      %c0_19 = arith.constant 0 : index
      %33 = vector.load %arg5[%c0_18, %c0_19] : memref<16x1xf32, #tpu.memory_space<vmem>>, vector<16x1xf32>
      %34 = vector.broadcast %33 : vector<16x1xf32> to vector<16x256xf32>
      %35 = arith.addf %32, %34 : vector<16x256xf32>
      %cst_20 = arith.constant 0.000000e+00 : f32
      %36 = vector.broadcast %cst_20 : f32 to vector<16x256xf32>
      %37 = arith.cmpf ogt, %35, %36 : vector<16x256xf32>
      %cst_21 = arith.constant 2.000000e-01 : f32
      %38 = vector.broadcast %cst_21 : f32 to vector<16x256xf32>
      %39 = arith.mulf %38, %35 : vector<16x256xf32>
      %40 = arith.select %37, %35, %39 : vector<16x256xi1>, vector<16x256xf32>
      %41 = arith.truncf %40 : vector<16x256xf32> to vector<16x256xbf16>
      %c0_22 = arith.constant 0 : index
      %c0_23 = arith.constant 0 : index
      %42 = vector.load %arg6[%c0_22, %c0_23] : memref<16x256xbf16, #tpu.memory_space<vmem>>, vector<16x256xbf16>
      tpu.vector_store %arg6[%c0_22, %c0_23], %41 {strides = array<i32>} : memref<16x256xbf16, #tpu.memory_space<vmem>>, vector<16x256xbf16>,
    } else {
    }
    return
  }
  func.func @transform_0(%arg0: i32, %arg1: i32) -> (i32, i32) {
    %c0_i32 = arith.constant 0 : i32
    %c0_i32_0 = arith.constant 0 : i32
    %c0_i32_1 = arith.constant 0 : i32
    return %c0_i32, %c0_i32_0 : i32, i32
  }
  func.func @transform_1(%arg0: i32, %arg1: i32) -> (i32, i32) {
    %c0_i32 = arith.constant 0 : i32
    %c0_i32_0 = arith.constant 0 : i32
    return %c0_i32, %arg1 : i32, i32
  }
  func.func @transform_2(%arg0: i32, %arg1: i32) -> (i32, i32) {
    %c0_i32 = arith.constant 0 : i32
    %c0_i32_0 = arith.constant 0 : i32
    %c0_i32_1 = arith.constant 0 : i32
    return %c0_i32, %c0_i32_0 : i32, i32
  }
  func.func @transform_3(%arg0: i32, %arg1: i32) -> (i32, i32) {
    %c0_i32 = arith.constant 0 : i32
    %c0_i32_0 = arith.constant 0 : i32
    %c0_i32_1 = arith.constant 0 : i32
    return %c0_i32, %c0_i32_0 : i32, i32
  }
  func.func @transform_4(%arg0: i32, %arg1: i32) -> (i32, i32) {
    %0 = arith.muli %arg1, %arg0 : i32
    %c0_i32 = arith.constant 0 : i32
    %c0_i32_0 = arith.constant 0 : i32
    return %c0_i32, %0 : i32, i32
  }
}

module attributes {stable_mosaic.version = 11 : i64} {
  func.func @_conv_bn_lrelu_kernel(%arg0: i32, %arg1: i32, %arg2: memref<32x256xbf16, #tpu.memory_space<vmem>>, %arg3: memref<256x128xbf16, #tpu.memory_space<vmem>>, %arg4: memref<32x1xf32, #tpu.memory_space<vmem>>, %arg5: memref<32x1xf32, #tpu.memory_space<vmem>>, %arg6: memref<32x128xbf16, #tpu.memory_space<vmem>>, %arg7: memref<32x1xf32, #tpu.memory_space<vmem>>, %arg8: memref<32x1xf32, #tpu.memory_space<vmem>>) attributes {dimension_semantics = [#tpu.dimension_semantics<arbitrary>, #tpu.dimension_semantics<arbitrary>], iteration_bounds = array<i64: 2, 1>, scalar_prefetch = 0 : i64, scratch_operands = 2 : i64, tpu.core_type = #tpu.core_type<tc>, window_params = [{pipeline_mode = #tpu.pipeline_mode<synchronous>, transform_indices = @transform_0, window_bounds = array<i64: 32, 256>}, {transform_indices = @transform_1, window_bounds = array<i64: 256, 128>}, {pipeline_mode = #tpu.pipeline_mode<synchronous>, transform_indices = @transform_2, window_bounds = array<i64: 32, 1>}, {pipeline_mode = #tpu.pipeline_mode<synchronous>, transform_indices = @transform_3, window_bounds = array<i64: 32, 1>}, {transform_indices = @transform_4, window_bounds = array<i64: 32, 128>}]} {
    %c0 = arith.constant 0 : index
    %c0_0 = arith.constant 0 : index
    %0 = vector.load %arg2[%c0, %c0_0] : memref<32x256xbf16, #tpu.memory_space<vmem>>, vector<32x256xbf16>
    %c0_1 = arith.constant 0 : index
    %c0_2 = arith.constant 0 : index
    %1 = vector.load %arg3[%c0_1, %c0_2] : memref<256x128xbf16, #tpu.memory_space<vmem>>, vector<256x128xbf16>
    %cst = arith.constant dense<0.000000e+00> : vector<32x128xf32>
    %2 = tpu.matmul %0, %1, %cst {dimension_numbers = #tpu.dot_dimension_numbers<[1], [0], [0], [1], [0, 0, 1, 1], [], []>} : vector<32x256xbf16>, vector<256x128xbf16>, vector<32x128xf32> -> vector<32x128xf32>
    %c0_i32 = arith.constant 0 : i32
    %3 = arith.cmpi eq, %arg0, %c0_i32 : i32
    %c0_i32_3 = arith.constant 0 : i32
    %4 = arith.cmpi eq, %arg1, %c0_i32_3 : i32
    %5 = arith.andi %3, %4 : i1
    %6 = arith.extui %5 : i1 to i32
    %c0_i32_4 = arith.constant 0 : i32
    %7 = arith.cmpi ne, %6, %c0_i32_4 : i32
    scf.if %7 {
      %cst_8 = arith.constant 0.000000e+00 : f32
      %14 = vector.broadcast %cst_8 : f32 to vector<32x1xf32>
      %c0_9 = arith.constant 0 : index
      %c0_10 = arith.constant 0 : index
      %15 = vector.load %arg7[%c0_9, %c0_10] : memref<32x1xf32, #tpu.memory_space<vmem>>, vector<32x1xf32>
      tpu.vector_store %arg7[%c0_9, %c0_10], %14 {strides = array<i32>} : memref<32x1xf32, #tpu.memory_space<vmem>>, vector<32x1xf32>,
      %cst_11 = arith.constant 0.000000e+00 : f32
      %16 = vector.broadcast %cst_11 : f32 to vector<32x1xf32>
      %c0_12 = arith.constant 0 : index
      %c0_13 = arith.constant 0 : index
      %17 = vector.load %arg8[%c0_12, %c0_13] : memref<32x1xf32, #tpu.memory_space<vmem>>, vector<32x1xf32>
      tpu.vector_store %arg8[%c0_12, %c0_13], %16 {strides = array<i32>} : memref<32x1xf32, #tpu.memory_space<vmem>>, vector<32x1xf32>,
    } else {
    }
    %c0_i32_5 = arith.constant 0 : i32
    %8 = arith.cmpi eq, %arg0, %c0_i32_5 : i32
    %9 = arith.extui %8 : i1 to i32
    %c0_i32_6 = arith.constant 0 : i32
    %10 = arith.cmpi ne, %9, %c0_i32_6 : i32
    scf.if %10 {
      %c0_8 = arith.constant 0 : index
      %c0_9 = arith.constant 0 : index
      %14 = vector.load %arg7[%c0_8, %c0_9] : memref<32x1xf32, #tpu.memory_space<vmem>>, vector<32x1xf32>
      %cst_10 = arith.constant dense<0.000000e+00> : vector<32xf32>
      %15 = vector.multi_reduction <add>, %2, %cst_10 [1] : vector<32x128xf32> to vector<32xf32>
      %16 = vector.shape_cast %15 : vector<32xf32> to vector<32x1xf32>
      %17 = arith.addf %14, %16 : vector<32x1xf32>
      %c0_11 = arith.constant 0 : index
      %c0_12 = arith.constant 0 : index
      %18 = vector.load %arg7[%c0_11, %c0_12] : memref<32x1xf32, #tpu.memory_space<vmem>>, vector<32x1xf32>
      tpu.vector_store %arg7[%c0_11, %c0_12], %17 {strides = array<i32>} : memref<32x1xf32, #tpu.memory_space<vmem>>, vector<32x1xf32>,
      %c0_13 = arith.constant 0 : index
      %c0_14 = arith.constant 0 : index
      %19 = vector.load %arg8[%c0_13, %c0_14] : memref<32x1xf32, #tpu.memory_space<vmem>>, vector<32x1xf32>
      %20 = arith.mulf %2, %2 : vector<32x128xf32>
      %cst_15 = arith.constant dense<0.000000e+00> : vector<32xf32>
      %21 = vector.multi_reduction <add>, %20, %cst_15 [1] : vector<32x128xf32> to vector<32xf32>
      %22 = vector.shape_cast %21 : vector<32xf32> to vector<32x1xf32>
      %23 = arith.addf %19, %22 : vector<32x1xf32>
      %c0_16 = arith.constant 0 : index
      %c0_17 = arith.constant 0 : index
      %24 = vector.load %arg8[%c0_16, %c0_17] : memref<32x1xf32, #tpu.memory_space<vmem>>, vector<32x1xf32>
      tpu.vector_store %arg8[%c0_16, %c0_17], %23 {strides = array<i32>} : memref<32x1xf32, #tpu.memory_space<vmem>>, vector<32x1xf32>,
    } else {
    }
    %c1_i32 = arith.constant 1 : i32
    %11 = arith.cmpi eq, %arg0, %c1_i32 : i32
    %12 = arith.extui %11 : i1 to i32
    %c0_i32_7 = arith.constant 0 : i32
    %13 = arith.cmpi ne, %12, %c0_i32_7 : i32
    scf.if %13 {
      %c0_8 = arith.constant 0 : index
      %c0_9 = arith.constant 0 : index
      %14 = vector.load %arg7[%c0_8, %c0_9] : memref<32x1xf32, #tpu.memory_space<vmem>>, vector<32x1xf32>
      %cst_10 = arith.constant 7.812500e-03 : f32
      %15 = vector.broadcast %cst_10 : f32 to vector<32x1xf32>
      %16 = arith.mulf %14, %15 : vector<32x1xf32>
      %c0_11 = arith.constant 0 : index
      %c0_12 = arith.constant 0 : index
      %17 = vector.load %arg8[%c0_11, %c0_12] : memref<32x1xf32, #tpu.memory_space<vmem>>, vector<32x1xf32>
      %cst_13 = arith.constant 7.812500e-03 : f32
      %18 = vector.broadcast %cst_13 : f32 to vector<32x1xf32>
      %19 = arith.mulf %17, %18 : vector<32x1xf32>
      %20 = arith.mulf %16, %16 : vector<32x1xf32>
      %21 = arith.subf %19, %20 : vector<32x1xf32>
      %cst_14 = arith.constant 0.000000e+00 : f32
      %22 = vector.broadcast %cst_14 : f32 to vector<32x1xf32>
      %23 = arith.maximumf %21, %22 : vector<32x1xf32>
      %cst_15 = arith.constant 9.99999974E-6 : f32
      %24 = vector.broadcast %cst_15 : f32 to vector<32x1xf32>
      %25 = arith.addf %23, %24 : vector<32x1xf32>
      %26 = math.rsqrt %25 : vector<32x1xf32>
      %c0_16 = arith.constant 0 : index
      %c0_17 = arith.constant 0 : index
      %27 = vector.load %arg4[%c0_16, %c0_17] : memref<32x1xf32, #tpu.memory_space<vmem>>, vector<32x1xf32>
      %28 = arith.mulf %26, %27 : vector<32x1xf32>
      %29 = vector.broadcast %16 : vector<32x1xf32> to vector<32x128xf32>
      %30 = arith.subf %2, %29 : vector<32x128xf32>
      %31 = vector.broadcast %28 : vector<32x1xf32> to vector<32x128xf32>
      %32 = arith.mulf %30, %31 : vector<32x128xf32>
      %c0_18 = arith.constant 0 : index
      %c0_19 = arith.constant 0 : index
      %33 = vector.load %arg5[%c0_18, %c0_19] : memref<32x1xf32, #tpu.memory_space<vmem>>, vector<32x1xf32>
      %34 = vector.broadcast %33 : vector<32x1xf32> to vector<32x128xf32>
      %35 = arith.addf %32, %34 : vector<32x128xf32>
      %cst_20 = arith.constant 0.000000e+00 : f32
      %36 = vector.broadcast %cst_20 : f32 to vector<32x128xf32>
      %37 = arith.cmpf ogt, %35, %36 : vector<32x128xf32>
      %cst_21 = arith.constant 2.000000e-01 : f32
      %38 = vector.broadcast %cst_21 : f32 to vector<32x128xf32>
      %39 = arith.mulf %38, %35 : vector<32x128xf32>
      %40 = arith.select %37, %35, %39 : vector<32x128xi1>, vector<32x128xf32>
      %41 = arith.truncf %40 : vector<32x128xf32> to vector<32x128xbf16>
      %c0_22 = arith.constant 0 : index
      %c0_23 = arith.constant 0 : index
      %42 = vector.load %arg6[%c0_22, %c0_23] : memref<32x128xbf16, #tpu.memory_space<vmem>>, vector<32x128xbf16>
      tpu.vector_store %arg6[%c0_22, %c0_23], %41 {strides = array<i32>} : memref<32x128xbf16, #tpu.memory_space<vmem>>, vector<32x128xbf16>,
    } else {
    }
    return
  }
  func.func @transform_0(%arg0: i32, %arg1: i32) -> (i32, i32) {
    %c0_i32 = arith.constant 0 : i32
    %c0_i32_0 = arith.constant 0 : i32
    %c0_i32_1 = arith.constant 0 : i32
    return %c0_i32, %c0_i32_0 : i32, i32
  }
  func.func @transform_1(%arg0: i32, %arg1: i32) -> (i32, i32) {
    %c0_i32 = arith.constant 0 : i32
    %c0_i32_0 = arith.constant 0 : i32
    return %c0_i32, %arg1 : i32, i32
  }
  func.func @transform_2(%arg0: i32, %arg1: i32) -> (i32, i32) {
    %c0_i32 = arith.constant 0 : i32
    %c0_i32_0 = arith.constant 0 : i32
    %c0_i32_1 = arith.constant 0 : i32
    return %c0_i32, %c0_i32_0 : i32, i32
  }
  func.func @transform_3(%arg0: i32, %arg1: i32) -> (i32, i32) {
    %c0_i32 = arith.constant 0 : i32
    %c0_i32_0 = arith.constant 0 : i32
    %c0_i32_1 = arith.constant 0 : i32
    return %c0_i32, %c0_i32_0 : i32, i32
  }
  func.func @transform_4(%arg0: i32, %arg1: i32) -> (i32, i32) {
    %0 = arith.muli %arg1, %arg0 : i32
    %c0_i32 = arith.constant 0 : i32
    %c0_i32_0 = arith.constant 0 : i32
    return %c0_i32, %0 : i32, i32
  }
}

module attributes {stable_mosaic.version = 11 : i64} {
  func.func @_head_kernel(%arg0: memref<64x512xbf16, #tpu.memory_space<vmem>>, %arg1: memref<512x32xbf16, #tpu.memory_space<vmem>>, %arg2: memref<64x1xf32, #tpu.memory_space<vmem>>, %arg3: memref<64x1xf32, #tpu.memory_space<vmem>>, %arg4: memref<64x16xf32, #tpu.memory_space<vmem>>, %arg5: memref<1x2xf32, #tpu.memory_space<vmem>>) attributes {dimension_semantics = [], scalar_prefetch = 0 : i64, scratch_operands = 0 : i64, tpu.core_type = #tpu.core_type<tc>} {
    %c0 = arith.constant 0 : index
    %c0_0 = arith.constant 0 : index
    %0 = vector.load %arg0[%c0, %c0_0] : memref<64x512xbf16, #tpu.memory_space<vmem>>, vector<64x512xbf16>
    %c0_1 = arith.constant 0 : index
    %c0_2 = arith.constant 0 : index
    %1 = vector.load %arg1[%c0_1, %c0_2] : memref<512x32xbf16, #tpu.memory_space<vmem>>, vector<512x32xbf16>
    %cst = arith.constant dense<0.000000e+00> : vector<64x32xf32>
    %2 = tpu.matmul %0, %1, %cst {dimension_numbers = #tpu.dot_dimension_numbers<[1], [0], [0], [1], [0, 0, 1, 1], [], []>} : vector<64x512xbf16>, vector<512x32xbf16>, vector<64x32xf32> -> vector<64x32xf32>
    %cst_3 = arith.constant dense<0.000000e+00> : vector<64xf32>
    %3 = vector.multi_reduction <add>, %2, %cst_3 [1] : vector<64x32xf32> to vector<64xf32>
    %4 = vector.shape_cast %3 : vector<64xf32> to vector<64x1xf32>
    %cst_4 = arith.constant 3.200000e+01 : f32
    %5 = vector.broadcast %cst_4 : f32 to vector<64x1xf32>
    %6 = arith.divf %4, %5 : vector<64x1xf32>
    %7 = vector.broadcast %6 : vector<64x1xf32> to vector<64x32xf32>
    %8 = arith.subf %2, %7 : vector<64x32xf32>
    %9 = arith.mulf %8, %8 : vector<64x32xf32>
    %cst_5 = arith.constant dense<0.000000e+00> : vector<64xf32>
    %10 = vector.multi_reduction <add>, %9, %cst_5 [1] : vector<64x32xf32> to vector<64xf32>
    %11 = vector.shape_cast %10 : vector<64xf32> to vector<64x1xf32>
    %cst_6 = arith.constant 3.200000e+01 : f32
    %12 = vector.broadcast %cst_6 : f32 to vector<64x1xf32>
    %13 = arith.divf %11, %12 : vector<64x1xf32>
    %cst_7 = arith.constant 9.99999974E-6 : f32
    %14 = vector.broadcast %cst_7 : f32 to vector<64x1xf32>
    %15 = arith.addf %13, %14 : vector<64x1xf32>
    %16 = math.rsqrt %15 : vector<64x1xf32>
    %17 = vector.broadcast %16 : vector<64x1xf32> to vector<64x32xf32>
    %18 = arith.mulf %8, %17 : vector<64x32xf32>
    %c0_8 = arith.constant 0 : index
    %c0_9 = arith.constant 0 : index
    %19 = vector.load %arg2[%c0_8, %c0_9] : memref<64x1xf32, #tpu.memory_space<vmem>>, vector<64x1xf32>
    %20 = vector.broadcast %19 : vector<64x1xf32> to vector<64x32xf32>
    %21 = arith.mulf %18, %20 : vector<64x32xf32>
    %c0_10 = arith.constant 0 : index
    %c0_11 = arith.constant 0 : index
    %22 = vector.load %arg3[%c0_10, %c0_11] : memref<64x1xf32, #tpu.memory_space<vmem>>, vector<64x1xf32>
    %23 = vector.broadcast %22 : vector<64x1xf32> to vector<64x32xf32>
    %24 = arith.addf %21, %23 : vector<64x32xf32>
    %cst_12 = arith.constant 0.000000e+00 : f32
    %25 = vector.broadcast %cst_12 : f32 to vector<64x32xf32>
    %26 = arith.cmpf ogt, %24, %25 : vector<64x32xf32>
    %cst_13 = arith.constant 2.000000e-01 : f32
    %27 = vector.broadcast %cst_13 : f32 to vector<64x32xf32>
    %28 = arith.mulf %27, %24 : vector<64x32xf32>
    %29 = arith.select %26, %24, %28 : vector<64x32xi1>, vector<64x32xf32>
    %30 = vector.extract_strided_slice %29 {offsets = [0, 0], sizes = [64, 2], strides = [1, 1]} : vector<64x32xf32> to vector<64x2xf32>
    %c0_14 = arith.constant 0 : index
    %c0_15 = arith.constant 0 : index
    %31 = vector.load %arg4[%c0_14, %c0_15] : memref<64x16xf32, #tpu.memory_space<vmem>>, vector<64x1xf32>
    %32 = vector.broadcast %31 : vector<64x1xf32> to vector<64x2xf32>
    %33 = arith.mulf %30, %32 : vector<64x2xf32>
    %34 = vector.extract_strided_slice %29 {offsets = [0, 2], sizes = [64, 2], strides = [1, 1]} : vector<64x32xf32> to vector<64x2xf32>
    %c0_16 = arith.constant 0 : index
    %c1 = arith.constant 1 : index
    %35 = vector.load %arg4[%c0_16, %c1] : memref<64x16xf32, #tpu.memory_space<vmem>>, vector<64x1xf32>
    %36 = vector.broadcast %35 : vector<64x1xf32> to vector<64x2xf32>
    %37 = arith.mulf %34, %36 : vector<64x2xf32>
    %38 = arith.addf %33, %37 : vector<64x2xf32>
    %39 = vector.extract_strided_slice %29 {offsets = [0, 4], sizes = [64, 2], strides = [1, 1]} : vector<64x32xf32> to vector<64x2xf32>
    %c0_17 = arith.constant 0 : index
    %c2 = arith.constant 2 : index
    %40 = vector.load %arg4[%c0_17, %c2] : memref<64x16xf32, #tpu.memory_space<vmem>>, vector<64x1xf32>
    %41 = vector.broadcast %40 : vector<64x1xf32> to vector<64x2xf32>
    %42 = arith.mulf %39, %41 : vector<64x2xf32>
    %43 = arith.addf %38, %42 : vector<64x2xf32>
    %44 = vector.extract_strided_slice %29 {offsets = [0, 6], sizes = [64, 2], strides = [1, 1]} : vector<64x32xf32> to vector<64x2xf32>
    %c0_18 = arith.constant 0 : index
    %c3 = arith.constant 3 : index
    %45 = vector.load %arg4[%c0_18, %c3] : memref<64x16xf32, #tpu.memory_space<vmem>>, vector<64x1xf32>
    %46 = vector.broadcast %45 : vector<64x1xf32> to vector<64x2xf32>
    %47 = arith.mulf %44, %46 : vector<64x2xf32>
    %48 = arith.addf %43, %47 : vector<64x2xf32>
    %49 = vector.extract_strided_slice %29 {offsets = [0, 8], sizes = [64, 2], strides = [1, 1]} : vector<64x32xf32> to vector<64x2xf32>
    %c0_19 = arith.constant 0 : index
    %c4 = arith.constant 4 : index
    %50 = vector.load %arg4[%c0_19, %c4] : memref<64x16xf32, #tpu.memory_space<vmem>>, vector<64x1xf32>
    %51 = vector.broadcast %50 : vector<64x1xf32> to vector<64x2xf32>
    %52 = arith.mulf %49, %51 : vector<64x2xf32>
    %53 = arith.addf %48, %52 : vector<64x2xf32>
    %54 = vector.extract_strided_slice %29 {offsets = [0, 10], sizes = [64, 2], strides = [1, 1]} : vector<64x32xf32> to vector<64x2xf32>
    %c0_20 = arith.constant 0 : index
    %c5 = arith.constant 5 : index
    %55 = vector.load %arg4[%c0_20, %c5] : memref<64x16xf32, #tpu.memory_space<vmem>>, vector<64x1xf32>
    %56 = vector.broadcast %55 : vector<64x1xf32> to vector<64x2xf32>
    %57 = arith.mulf %54, %56 : vector<64x2xf32>
    %58 = arith.addf %53, %57 : vector<64x2xf32>
    %59 = vector.extract_strided_slice %29 {offsets = [0, 12], sizes = [64, 2], strides = [1, 1]} : vector<64x32xf32> to vector<64x2xf32>
    %c0_21 = arith.constant 0 : index
    %c6 = arith.constant 6 : index
    %60 = vector.load %arg4[%c0_21, %c6] : memref<64x16xf32, #tpu.memory_space<vmem>>, vector<64x1xf32>
    %61 = vector.broadcast %60 : vector<64x1xf32> to vector<64x2xf32>
    %62 = arith.mulf %59, %61 : vector<64x2xf32>
    %63 = arith.addf %58, %62 : vector<64x2xf32>
    %64 = vector.extract_strided_slice %29 {offsets = [0, 14], sizes = [64, 2], strides = [1, 1]} : vector<64x32xf32> to vector<64x2xf32>
    %c0_22 = arith.constant 0 : index
    %c7 = arith.constant 7 : index
    %65 = vector.load %arg4[%c0_22, %c7] : memref<64x16xf32, #tpu.memory_space<vmem>>, vector<64x1xf32>
    %66 = vector.broadcast %65 : vector<64x1xf32> to vector<64x2xf32>
    %67 = arith.mulf %64, %66 : vector<64x2xf32>
    %68 = arith.addf %63, %67 : vector<64x2xf32>
    %69 = vector.extract_strided_slice %29 {offsets = [0, 16], sizes = [64, 2], strides = [1, 1]} : vector<64x32xf32> to vector<64x2xf32>
    %c0_23 = arith.constant 0 : index
    %c8 = arith.constant 8 : index
    %70 = vector.load %arg4[%c0_23, %c8] : memref<64x16xf32, #tpu.memory_space<vmem>>, vector<64x1xf32>
    %71 = vector.broadcast %70 : vector<64x1xf32> to vector<64x2xf32>
    %72 = arith.mulf %69, %71 : vector<64x2xf32>
    %73 = arith.addf %68, %72 : vector<64x2xf32>
    %74 = vector.extract_strided_slice %29 {offsets = [0, 18], sizes = [64, 2], strides = [1, 1]} : vector<64x32xf32> to vector<64x2xf32>
    %c0_24 = arith.constant 0 : index
    %c9 = arith.constant 9 : index
    %75 = vector.load %arg4[%c0_24, %c9] : memref<64x16xf32, #tpu.memory_space<vmem>>, vector<64x1xf32>
    %76 = vector.broadcast %75 : vector<64x1xf32> to vector<64x2xf32>
    %77 = arith.mulf %74, %76 : vector<64x2xf32>
    %78 = arith.addf %73, %77 : vector<64x2xf32>
    %79 = vector.extract_strided_slice %29 {offsets = [0, 20], sizes = [64, 2], strides = [1, 1]} : vector<64x32xf32> to vector<64x2xf32>
    %c0_25 = arith.constant 0 : index
    %c10 = arith.constant 10 : index
    %80 = vector.load %arg4[%c0_25, %c10] : memref<64x16xf32, #tpu.memory_space<vmem>>, vector<64x1xf32>
    %81 = vector.broadcast %80 : vector<64x1xf32> to vector<64x2xf32>
    %82 = arith.mulf %79, %81 : vector<64x2xf32>
    %83 = arith.addf %78, %82 : vector<64x2xf32>
    %84 = vector.extract_strided_slice %29 {offsets = [0, 22], sizes = [64, 2], strides = [1, 1]} : vector<64x32xf32> to vector<64x2xf32>
    %c0_26 = arith.constant 0 : index
    %c11 = arith.constant 11 : index
    %85 = vector.load %arg4[%c0_26, %c11] : memref<64x16xf32, #tpu.memory_space<vmem>>, vector<64x1xf32>
    %86 = vector.broadcast %85 : vector<64x1xf32> to vector<64x2xf32>
    %87 = arith.mulf %84, %86 : vector<64x2xf32>
    %88 = arith.addf %83, %87 : vector<64x2xf32>
    %89 = vector.extract_strided_slice %29 {offsets = [0, 24], sizes = [64, 2], strides = [1, 1]} : vector<64x32xf32> to vector<64x2xf32>
    %c0_27 = arith.constant 0 : index
    %c12 = arith.constant 12 : index
    %90 = vector.load %arg4[%c0_27, %c12] : memref<64x16xf32, #tpu.memory_space<vmem>>, vector<64x1xf32>
    %91 = vector.broadcast %90 : vector<64x1xf32> to vector<64x2xf32>
    %92 = arith.mulf %89, %91 : vector<64x2xf32>
    %93 = arith.addf %88, %92 : vector<64x2xf32>
    %94 = vector.extract_strided_slice %29 {offsets = [0, 26], sizes = [64, 2], strides = [1, 1]} : vector<64x32xf32> to vector<64x2xf32>
    %c0_28 = arith.constant 0 : index
    %c13 = arith.constant 13 : index
    %95 = vector.load %arg4[%c0_28, %c13] : memref<64x16xf32, #tpu.memory_space<vmem>>, vector<64x1xf32>
    %96 = vector.broadcast %95 : vector<64x1xf32> to vector<64x2xf32>
    %97 = arith.mulf %94, %96 : vector<64x2xf32>
    %98 = arith.addf %93, %97 : vector<64x2xf32>
    %99 = vector.extract_strided_slice %29 {offsets = [0, 28], sizes = [64, 2], strides = [1, 1]} : vector<64x32xf32> to vector<64x2xf32>
    %c0_29 = arith.constant 0 : index
    %c14 = arith.constant 14 : index
    %100 = vector.load %arg4[%c0_29, %c14] : memref<64x16xf32, #tpu.memory_space<vmem>>, vector<64x1xf32>
    %101 = vector.broadcast %100 : vector<64x1xf32> to vector<64x2xf32>
    %102 = arith.mulf %99, %101 : vector<64x2xf32>
    %103 = arith.addf %98, %102 : vector<64x2xf32>
    %104 = vector.extract_strided_slice %29 {offsets = [0, 30], sizes = [64, 2], strides = [1, 1]} : vector<64x32xf32> to vector<64x2xf32>
    %c0_30 = arith.constant 0 : index
    %c15 = arith.constant 15 : index
    %105 = vector.load %arg4[%c0_30, %c15] : memref<64x16xf32, #tpu.memory_space<vmem>>, vector<64x1xf32>
    %106 = vector.broadcast %105 : vector<64x1xf32> to vector<64x2xf32>
    %107 = arith.mulf %104, %106 : vector<64x2xf32>
    %108 = arith.addf %103, %107 : vector<64x2xf32>
    %cst_31 = arith.constant dense<0.000000e+00> : vector<2xf32>
    %109 = vector.multi_reduction <add>, %108, %cst_31 [0] : vector<64x2xf32> to vector<2xf32>
    %110 = vector.shape_cast %109 : vector<2xf32> to vector<1x2xf32>
    %111 = arith.negf %110 : vector<1x2xf32>
    %112 = math.exp %111 : vector<1x2xf32>
    %cst_32 = arith.constant 1.000000e+00 : f32
    %113 = vector.broadcast %cst_32 : f32 to vector<1x2xf32>
    %114 = arith.addf %113, %112 : vector<1x2xf32>
    %115 = arith.divf %113, %114 : vector<1x2xf32>
    %c0_33 = arith.constant 0 : index
    %c0_34 = arith.constant 0 : index
    %116 = vector.load %arg5[%c0_33, %c0_34] : memref<1x2xf32, #tpu.memory_space<vmem>>, vector<1x2xf32>
    tpu.vector_store %arg5[%c0_33, %c0_34], %115 {strides = array<i32>} : memref<1x2xf32, #tpu.memory_space<vmem>>, vector<1x2xf32>,
    return
  }
}

</mosaic_0001>

<bundles_post_ra>
// kernel: discriminator_forward.4
= control target key start
LH: loop header
LB: loop body
LE: loop exit
PB: predicated region body
PF: predicated region fallthrough
CT: control target
= control target key end

     0   :  { %s555_s9 = smov 0   ;;  %s557_s10 = smov 0   ;;  %s610_s0 = inlined_call_operand.vmem [shape: bf16[8,48], index: 0, kind: input, shape index: {}]   ;;  %s611_s1 = inlined_call_operand.vmem [shape: bf16[48,2048], index: 1, kind: input, shape index: {}]   ;;  %s612_s2 = inlined_call_operand.vmem [shape: bf16[8,2048], index: 2, kind: output, shape index: {}]  }
   0x1   :  { %s559_s11 = smov 0  }
   0x2 LB: > { %s440_s12 = sadd.s32 4294967295, %s537_s11   ;;  %s572_s13 = sadd.s32 1, %s537_s11   ;;  %s537_s11 = sphi %s559_s11, %s615_s11   ;;  %s533_s10 = sphi %s557_s10, %s614_s10   ;;  %s529_s9 = sphi %s555_s9, %s613_s9  }
   0x3   : > { %s37_s14 = ssub.s32 %s537_s11, %s572_s13  ;;  %s40_s15 = sadd.s32 1, %s533_s10 }
   0x4   : > { %p38_p0 = scmp.eq.s32.totalorder %s37_s14, 0  ;;  %p47_p1 = scmp.ne.s32.totalorder %s533_s10, %s529_s9 }
   0x5   : > { %p48_p2 = scmp.eq.s32.totalorder %s537_s11, 0  ;;  %p443_p4 = scmp.ge.s32.totalorder %s537_s11, 4 }
   0x6   : > { %s581_s16 = scalar_select %p38_p0, %s533_s10, %s40_s15  }
   0x7   : > { %p49_p3 = por %p48_p2, %p47_p1  ;;  %102 = sbr.rel (%p443_p4) target bundleno = 24 (0x18), region = 20 }
   0xe   : > { %105 = sbr.rel (!%p49_p3) target bundleno = 24 (0x18), region = 24  ;;  %s107_s17 = sand.u32 (%p49_p3), 1, %s533_s10  }
   0xf   : > { %s467_s18 = sshll.u32 (%p49_p3), %s537_s11, 4  ;;  %s470_s19 = smul.u32 (%p49_p3), 96, %s107_s17 }
  0x10   : > { %s112_s22 = scalar_lea.vmem (%p49_p3), %s611_s1, %s467_s18 }
  0x11   : > { %v125_v0 = vld [vmem:[%s112_s22] sm:$0xff] (%p49_p3)  ;;  %v127_v1 = vld [vmem:[%s112_s22 + $0x8] sm:$0xff] (%p49_p3)  ;;  %s109_s23 = scalar_lea.vmem (%p49_p3), [#allocation2], %s470_s19 }
  0x12   : > { %v129_v2 = vld [vmem:[%s112_s22 + $0x40] sm:$0xff] (%p49_p3)  ;;  %v131_v3 = vld [vmem:[%s112_s22 + $0x48] sm:$0xff] (%p49_p3)  ;;  %126 = vst [vmem:[%s109_s23] sm:$0xff] (%p49_p3), %v125_v0  ;;  %128 = vst [vmem:[%s109_s23 + $0x8] sm:$0xff] (%p49_p3), %v127_v1 }
  0x13   : > { %v133_v4 = vld [vmem:[%s112_s22 + $0x80] sm:$0xff] (%p49_p3)  ;;  %v135_v5 = vld [vmem:[%s112_s22 + $0x88] sm:$0xff] (%p49_p3)  ;;  %130 = vst [vmem:[%s109_s23 + $0x10] sm:$0xff] (%p49_p3), %v129_v2  ;;  %132 = vst [vmem:[%s109_s23 + $0x18] sm:$0xff] (%p49_p3), %v131_v3 }
  0x14   : > { %134 = vst [vmem:[%s109_s23 + $0x20] sm:$0xff] (%p49_p3), %v133_v4  ;;  %136 = vst [vmem:[%s109_s23 + $0x28] sm:$0xff] (%p49_p3), %v135_v5  ;;  %v137_v6 = vld [vmem:[%s112_s22 + $0xc0] sm:$0xff] (%p49_p3)  ;;  %v139_v7 = vld [vmem:[%s112_s22 + $0xc8] sm:$0xff] (%p49_p3) }
  0x15   : > { %v141_v8 = vld [vmem:[%s112_s22 + $0x100] sm:$0xff]  ;;  %138 = vst [vmem:[%s109_s23 + $0x30] sm:$0xff] %v137_v6  ;;  %140 = vst [vmem:[%s109_s23 + $0x38] sm:$0xff] %v139_v7  ;;  %v143_v9 = vld [vmem:[%s112_s22 + $0x108] sm:$0xff] }
  0x16   : > { %142 = vst [vmem:[%s109_s23 + $0x40] sm:$0xff] %v141_v8  ;;  %v145_v10 = vld [vmem:[%s112_s22 + $0x140] sm:$0xff]  ;;  %v147_v11 = vld [vmem:[%s112_s22 + $0x148] sm:$0xff]  ;;  %144 = vst [vmem:[%s109_s23 + $0x48] sm:$0xff] %v143_v9 }
  0x17   : > { %146 = vst [vmem:[%s109_s23 + $0x50] sm:$0xff] %v145_v10  ;;  %148 = vst [vmem:[%s109_s23 + $0x58] sm:$0xff] %v147_v11 }
  0x18 PF: > { %p446_p5 = scmp.ge.s32.totalorder %s537_s11, 1  ;;  %p153_p6 = scmp.lt.s32.totalorder %s537_s11, 5 }
  0x1a   : > { %p154_p7 = pnand %p446_p5, %p153_p6 }
  0x1b   : > { %s160_s24 = sand.u32 (!%p154_p7), 1, %s529_s9   ;;  %v539_v12 = vmov (!%p154_p7), 0   ;;  %v189_v25 = vld [vmem:[%s610_s0] sm:$0xf] (!%p154_p7)  ;;  %vm262_vm0 = vcmask (!%p154_p7), 392192   ;;  %s447_s29 = sshll.u32 (!%p154_p7), %s440_s12, 2 }
  0x1c   : > { %157 = sbr.rel (%p154_p7) target bundleno = 266 (0x10a), region = 47  ;;  %298 = vmatprep.mubr.bf16.mxu0 (!%p154_p7), %v539_v12  ;;  %339 = vmatprep.mubr.bf16.mxu1 (!%p154_p7), %v539_v12  ;;  %p183_p8 = scmp.lt.s32.totalorder (!%p154_p7), %s447_s29, 15 }
  0x1d   : > { %s471_s25 = smul.u32 (!%p154_p7), 96, %s160_s24 }
  0x1f   : > { %s162_s26 = scalar_lea.vmem (!%p154_p7), [#allocation2], %s471_s25 }
  0x20   : > { %v497_v13 = vld [vmem:[%s162_s26 + $0x4] ss:$16 sps:$4 sm:$0xff] (!%p154_p7)   ;;  %v499_v14 = vld [vmem:[%s162_s26 + $0xc] ss:$16 sps:$4 sm:$0xff] (!%p154_p7)   ;;  %v501_v15 = vld [vmem:[%s162_s26] ss:$16 sps:$4 sm:$0xff] (!%p154_p7)  }
  0x21   : > { %266 = vmatprep.subr.bf16.mxu0 (!%p154_p7), %v497_v13  ;;  %v502_v16 = vld [vmem:[%s162_s26 + $0x8] ss:$16 sps:$4 sm:$0xff] (!%p154_p7)   ;;  %307 = vmatprep.subr.bf16.mxu1 (!%p154_p7), %v499_v14  ;;  %v503_v17 = vld [vmem:[%s162_s26 + $0x24] ss:$16 sps:$4 sm:$0xff] (!%p154_p7)   ;;  %v505_v18 = vld [vmem:[%s162_s26 + $0x2c] ss:$16 sps:$4 sm:$0xff] (!%p154_p7)  }
  0x22   : > { %267 = vmatpush1.bf16.msra.mxu0 (!%p154_p7), %v501_v15  ;;  %308 = vmatpush1.bf16.msra.mxu1 (!%p154_p7), %v502_v16  ;;  %v507_v19 = vld [vmem:[%s162_s26 + $0x20] ss:$16 sps:$4 sm:$0xff] (!%p154_p7)   ;;  %v508_v20 = vld [vmem:[%s162_s26 + $0x28] ss:$16 sps:$4 sm:$0xff] (!%p154_p7)   ;;  %v509_v21 = vld [vmem:[%s162_s26 + $0x44] ss:$16 sps:$4 sm:$0xff] (!%p154_p7)  }
  0x23   : > { %268 = vmatprep.subr.bf16.mxu0 %v503_v17  ;;  %309 = vmatprep.subr.bf16.mxu1 %v505_v18  ;;  %v511_v22 = vld [vmem:[%s162_s26 + $0x4c] ss:$16 sps:$4 sm:$0xff]   ;;  %v513_v23 = vld [vmem:[%s162_s26 + $0x40] ss:$16 sps:$4 sm:$0xff]   ;;  %v514_v24 = vld [vmem:[%s162_s26 + $0x48] ss:$16 sps:$4 sm:$0xff]  }
  0x24   : > { %s617_s29 = smov (!%p183_p8, %s447_s29), 15 }
  0x25   : > { %s448_s30 = sshll.u32 %s617_s29, 2 }
  0x26   : > { %269 = vmatpush1.bf16.msra.mxu0 %v507_v19  ;;  %310 = vmatpush1.bf16.msra.mxu1 %v508_v20  ;;  %s186_s5 = scalar_lea.vmem %s612_s2, %s448_s30 }
  0x27   : > { %270 = vmatprep.subr.bf16.mxu0 %v509_v21  ;;  %311 = vmatprep.subr.bf16.mxu1 %v511_v22 }
  0x2a   : > { %271 = vmatpush1.bf16.msra.mxu0 %v513_v23  ;;  %312 = vmatpush1.bf16.msra.mxu1 %v514_v24 }
  0x2d   : > { %461 = vmatmul.mubr.msk.bf16.vlgmr.msra.gmra.mrb[0].mxu0 %vm262_vm0, %v189_v25  ;;  %462 = vmatmul.mubr.msk.bf16.vlgmr.msra.gmra.mrb[0].mxu1 %vm262_vm0, %v189_v25 }
 0x100   : > { %v300_v26 = vpop.f32.mrb[0].mxu0  ;;  %v341_v27 = vpop.f32.mrb[0].mxu1 }
 0x101   : > { %vm348_vm1 = vcmp.gt.f32.partialorder %v300_v26, 0.0  ;;  %v352_v28 = vmul.f32 0.2, %v300_v26  ;;  %vm350_vm2 = vcmp.gt.f32.partialorder %v341_v27, 0.0  ;;  %v354_v29 = vmul.f32 0.2, %v341_v27 }
 0x102   : > { %v302_v30 = vpop.f32.mrb[1].mxu0  ;;  %v343_v31 = vpop.f32.mrb[1].mxu1 }
 0x103   : > { %v356_v32 = vsel %vm348_vm1, %v300_v26, %v352_v28  ;;  %vm349_vm3 = vcmp.gt.f32.partialorder %v302_v30, 0.0  ;;  %v353_v33 = vmul.f32 0.2, %v302_v30  ;;  %v304_v34 = vpop.f32.mrb[2].mxu0  ;;  %v345_v35 = vpop.f32.mrb[2].mxu1  ;;  %v358_v36 = vsel %vm350_vm2, %v341_v27, %v354_v29 }
 0x104   : > { %vm351_vm4 = vcmp.gt.f32.partialorder %v343_v31, 0.0  ;;  %v355_v37 = vmul.f32 0.2, %v343_v31  ;;  %v305_v38 = vpop.f32.mrb[3].mxu0  ;;  %v346_v39 = vpop.f32.mrb[3].mxu1 }
 0x105   : > { %v357_v40 = vsel %vm349_vm3, %v302_v30, %v353_v33 }
 0x106   : > { %v468_v41 = vpack.c.bf16 %v357_v40, %v356_v32  ;;  %v359_v42 = vsel %vm351_vm4, %v343_v31, %v355_v37 }
 0x107   : > { %v469_v43 = vpack.c.bf16 %v359_v42, %v358_v36 }
 0x108   : > { %376 = vst [vmem:[%s186_s5] sm:$0xff] %v468_v41 }
 0x109   : > { %377 = vst [vmem:[%s186_s5 + $0x8] sm:$0xff] %v469_v43 }
 0x10a PF: > { %p9_p9 = scmp.ge.s32.totalorder %s572_s13, 6   ;;  %s613_s9 = smov %s533_s10 }
 0x10b   : > { %s614_s10 = smov %s581_s16  ;;  %s615_s11 = smov %s572_s13 }
 0x10c   :  { %11 = sbr.rel (!%p9_p9) target bundleno = 2 (0x2), region = 86 }

// kernel: discriminator_forward.5
= control target key start
LH: loop header
LB: loop body
LE: loop exit
PB: predicated region body
PF: predicated region fallthrough
CT: control target
= control target key end

     0   :  { %s952_s15 = smov 0   ;;  %s954_s16 = smov 0   ;;  %s1148_s0 = inlined_call_operand.vmem [shape: bf16[16,128], index: 0, kind: input, shape index: {}]   ;;  %s1149_s1 = inlined_call_operand.vmem [shape: bf16[128,512], index: 1, kind: input, shape index: {}]   ;;  %s1150_s2 = inlined_call_operand.vmem [shape: f32[16,1], index: 2, kind: input, shape index: {}]   ;;  %s1151_s3 = inlined_call_operand.vmem [shape: f32[16,1], index: 3, kind: input, shape index: {}]   ;;  %s1152_s4 = inlined_call_operand.vmem [shape: bf16[16,512], index: 4, kind: output, shape index: {}]  }
   0x1   :  { %s956_s17 = smov 0   ;;  %s958_s18 = smov 0  }
   0x2   :  { %s960_s19 = smov 0   ;;  %s962_s20 = smov 0  }
   0x3   :  { %s964_s21 = smov 0   ;;  %s966_s22 = smov 0  }
   0x4   :  { %s968_s23 = smov 0  }
   0x5 LB: > { %s706_s24 = sadd.s32 4294967295, %s922_s23   ;;  %s23_s25 = sadd.s32 1, %s914_s21  ;;  %s922_s23 = sphi %s968_s23, %s14_s23   ;;  %s918_s22 = sphi %s966_s22, %s1162_s22   ;;  %s914_s21 = sphi %s964_s21, %s1161_s21   ;;  %s910_s20 = sphi %s962_s20, %s1160_s20   ;;  %s906_s19 = sphi %s960_s19, %s1159_s19   ;;  %s902_s18 = sphi %s958_s18, %s1158_s18   ;;  %s898_s17 = sphi %s956_s17, %s1157_s17   ;;  %s894_s16 = sphi %s954_s16, %s1156_s16   ;;  %s890_s15 = sphi %s952_s15, %s1155_s15  }
   0x6   : > { %p24_p0 = scmp.ge.s32.totalorder %s23_s25, 2  ;;  %s26_s26 = sadd.s32 1, %s918_s22 }
   0x7   : > { %s54_s27 = sadd.s32 1, %s902_s18  ;;  %p61_p1 = scmp.ne.s32.totalorder %s902_s18, %s898_s17 }
   0x8   : > { %s1164_s25 = smov (%p24_p0, %s23_s25), 0  ;;  %s1166_s26 = smov (!%p24_p0, %s26_s26), %s918_s22 }
   0x9   : > { %s51_s28 = ssub.s32 %s914_s21, %s1164_s25  ;;  %p62_p2 = scmp.eq.s32.totalorder %s922_s23, 0 }
   0xa   : > { %p28_p3 = scmp.ge.s32.totalorder %s1166_s26, 2  ;;  %p52_p4 = scmp.eq.s32.totalorder %s51_s28, 0 }
   0xb   : > { %p1009_p5 = por %p62_p2, %p61_p1  ;;  %s119_s30 = smul.u32 %s914_s21, %s918_s22 }
   0xc   : > { %s1168_s26 = smov (%p28_p3, %s1166_s26), 0  ;;  %p134_p6 = scmp.ne.s32.totalorder %s894_s16, %s890_s15 }
   0xd   : > { %s1018_s5 = scalar_select %p52_p4, %s902_s18, %s54_s27  }
   0xe   : > { %s120_s6 = smul.u32 %s1168_s26, %s1164_s25  ;;  %p135_p7 = scmp.eq.s32.totalorder %s706_s24, 3 }
   0xf   : > { %s124_s8 = sadd.s32 1, %s894_s16  ;;  %p709_p10 = scmp.ge.s32.totalorder %s922_s23, 4 }
  0x10   : > { %s121_s7 = ssub.s32 %s119_s30, %s120_s6  ;;  %p1025_p9 = por %p135_p7, %p134_p6 }
  0x11   : > { %p122_p8 = scmp.eq.s32.totalorder %s121_s7, 0  ;;  %166 = sbr.rel (%p709_p10) target bundleno = 36 (0x24), region = 28 }
  0x13   : > { %s1030_s10 = scalar_select %p122_p8, %s894_s16, %s124_s8  }
  0x18   : > { %169 = sbr.rel (!%p1009_p5) target bundleno = 36 (0x24), region = 32  ;;  %s171_s11 = sand.u32 (%p1009_p5), 1, %s902_s18  }
  0x19   : > { %s742_s12 = sshll.u32 (%p1009_p5), %s914_s21, 3  ;;  %s710_s13 = sshll.u32 (%p1009_p5), %s171_s11, 7 }
  0x1a   : > { %s1040_s27 = scalar_lea.vmem (%p1009_p5), %s1149_s1, %s742_s12  ;;  %s173_s28 = scalar_lea.vmem (%p1009_p5), [#allocation4], %s710_s13 }
  0x1b   : > { %v234_v0 = vld [vmem:[%s1040_s27] sm:$0xff] (%p1009_p5)  ;;  %v236_v1 = vld [vmem:[%s1040_s27 + $0x10] sm:$0xff] (%p1009_p5) }
  0x1c   : > { %v238_v2 = vld [vmem:[%s1040_s27 + $0x20] sm:$0xff] (%p1009_p5)  ;;  %235 = vst [vmem:[%s173_s28] sm:$0xff] (%p1009_p5), %v234_v0  ;;  %237 = vst [vmem:[%s173_s28 + $0x8] sm:$0xff] (%p1009_p5), %v236_v1  ;;  %v240_v3 = vld [vmem:[%s1040_s27 + $0x30] sm:$0xff] (%p1009_p5) }
  0x1d   : > { %239 = vst [vmem:[%s173_s28 + $0x10] sm:$0xff] (%p1009_p5), %v238_v2  ;;  %v242_v4 = vld [vmem:[%s1040_s27 + $0x40] sm:$0xff] (%p1009_p5)  ;;  %v244_v5 = vld [vmem:[%s1040_s27 + $0x50] sm:$0xff] (%p1009_p5)  ;;  %241 = vst [vmem:[%s173_s28 + $0x18] sm:$0xff] (%p1009_p5), %v240_v3 }
  0x1e   : > { %243 = vst [vmem:[%s173_s28 + $0x20] sm:$0xff] (%p1009_p5), %v242_v4  ;;  %245 = vst [vmem:[%s173_s28 + $0x28] sm:$0xff] (%p1009_p5), %v244_v5  ;;  %v246_v6 = vld [vmem:[%s1040_s27 + $0x60] sm:$0xff] (%p1009_p5)  ;;  %v248_v7 = vld [vmem:[%s1040_s27 + $0x70] sm:$0xff] (%p1009_p5) }
  0x1f   : > { %v250_v8 = vld [vmem:[%s1040_s27 + $0x80] sm:$0xff]  ;;  %247 = vst [vmem:[%s173_s28 + $0x30] sm:$0xff] %v246_v6  ;;  %249 = vst [vmem:[%s173_s28 + $0x38] sm:$0xff] %v248_v7  ;;  %v252_v9 = vld [vmem:[%s1040_s27 + $0x90] sm:$0xff] }
  0x20   : > { %251 = vst [vmem:[%s173_s28 + $0x40] sm:$0xff] %v250_v8  ;;  %v254_v10 = vld [vmem:[%s1040_s27 + $0xa0] sm:$0xff]  ;;  %v256_v11 = vld [vmem:[%s1040_s27 + $0xb0] sm:$0xff]  ;;  %253 = vst [vmem:[%s173_s28 + $0x48] sm:$0xff] %v252_v9 }
  0x21   : > { %255 = vst [vmem:[%s173_s28 + $0x50] sm:$0xff] %v254_v10  ;;  %257 = vst [vmem:[%s173_s28 + $0x58] sm:$0xff] %v256_v11  ;;  %v258_v12 = vld [vmem:[%s1040_s27 + $0xc0] sm:$0xff]  ;;  %v260_v13 = vld [vmem:[%s1040_s27 + $0xd0] sm:$0xff] }
  0x22   : > { %v262_v14 = vld [vmem:[%s1040_s27 + $0xe0] sm:$0xff]  ;;  %259 = vst [vmem:[%s173_s28 + $0x60] sm:$0xff] %v258_v12  ;;  %261 = vst [vmem:[%s173_s28 + $0x68] sm:$0xff] %v260_v13  ;;  %v264_v15 = vld [vmem:[%s1040_s27 + $0xf0] sm:$0xff] }
  0x23   : > { %263 = vst [vmem:[%s173_s28 + $0x70] sm:$0xff] %v262_v14  ;;  %265 = vst [vmem:[%s173_s28 + $0x78] sm:$0xff] %v264_v15 }
  0x24 PF: > { %p713_p11 = scmp.ge.s32.totalorder %s922_s23, 1  ;;  %p270_p12 = scmp.lt.s32.totalorder %s922_s23, 5 }
  0x26   : > { %p271_p13 = pnand %p713_p11, %p270_p12 }
  0x27   : > { %s277_s29 = sand.u32 (!%p271_p13), 1, %s898_s17   ;;  %s298_s30 = sand.u32 (!%p271_p13), 1, %s890_s15   ;;  %v924_v16 = vmov (!%p271_p13), 0   ;;  %v845_v33 = vld [vmem:[%s1148_s0] sm:$0xff] (!%p271_p13)  }
  0x28   : > { %274 = sbr.rel (%p271_p13) target bundleno = 621 (0x26d), region = 70  ;;  %s714_s6 = sshll.u32 (!%p271_p13), %s277_s29, 7  ;;  %441 = vmatprep.mubr.bf16.mxu0 (!%p271_p13), %v924_v16 }
  0x29   : > { %s1062_s7 = sshll.u32 (!%p271_p13), %s298_s30, 4  ;;  %s279_s8 = scalar_lea.vmem (!%p271_p13), [#allocation4], %s714_s6 }
  0x2a   : > { %v821_v17 = vld [vmem:[%s279_s8 + $0x4] ss:$8 sps:$4 sm:$0xff] (!%p271_p13)   ;;  %v823_v18 = vld [vmem:[%s279_s8] ss:$8 sps:$4 sm:$0xff] (!%p271_p13)   ;;  %v824_v19 = vld [vmem:[%s279_s8 + $0x14] ss:$8 sps:$4 sm:$0xff] (!%p271_p13)  }
  0x2b   : > { %409 = vmatprep.subr.bf16.mxu0 (!%p271_p13), %v821_v17  ;;  %v826_v20 = vld [vmem:[%s279_s8 + $0x10] ss:$8 sps:$4 sm:$0xff] (!%p271_p13)   ;;  %v827_v21 = vld [vmem:[%s279_s8 + $0x24] ss:$8 sps:$4 sm:$0xff] (!%p271_p13)   ;;  %v829_v22 = vld [vmem:[%s279_s8 + $0x20] ss:$8 sps:$4 sm:$0xff] (!%p271_p13)  }
  0x2c   : > { %410 = vmatpush1.bf16.msra.mxu0 (!%p271_p13), %v823_v18  ;;  %v830_v23 = vld [vmem:[%s279_s8 + $0x34] ss:$8 sps:$4 sm:$0xff] (!%p271_p13)   ;;  %v832_v24 = vld [vmem:[%s279_s8 + $0x30] ss:$8 sps:$4 sm:$0xff] (!%p271_p13)   ;;  %v833_v25 = vld [vmem:[%s279_s8 + $0x44] ss:$8 sps:$4 sm:$0xff] (!%p271_p13)  }
  0x2d   : > { %411 = vmatprep.subr.bf16.mxu0 (!%p271_p13), %v824_v19  ;;  %v835_v26 = vld [vmem:[%s279_s8 + $0x40] ss:$8 sps:$4 sm:$0xff] (!%p271_p13)   ;;  %v836_v27 = vld [vmem:[%s279_s8 + $0x54] ss:$8 sps:$4 sm:$0xff] (!%p271_p13)   ;;  %v838_v28 = vld [vmem:[%s279_s8 + $0x50] ss:$8 sps:$4 sm:$0xff] (!%p271_p13)  }
  0x2e   : > { %v839_v29 = vld [vmem:[%s279_s8 + $0x64] ss:$8 sps:$4 sm:$0xff] (!%p271_p13)   ;;  %v841_v30 = vld [vmem:[%s279_s8 + $0x60] ss:$8 sps:$4 sm:$0xff] (!%p271_p13)   ;;  %v842_v31 = vld [vmem:[%s279_s8 + $0x74] ss:$8 sps:$4 sm:$0xff] (!%p271_p13)  }
  0x2f   : > { %v844_v32 = vld [vmem:[%s279_s8 + $0x70] ss:$8 sps:$4 sm:$0xff]   ;;  %p452_p0 = scmp.eq.s32.totalorder %s910_s20, 0  ;;  %p453_p1 = scmp.eq.s32.totalorder %s906_s19, 0 }
  0x30   : > { %412 = vmatpush1.bf16.msra.mxu0 %v826_v20  ;;  %s1078_s11 = scalar_lea.vmem [#allocation5], %s1062_s7 }
  0x31   : > { %413 = vmatprep.subr.bf16.mxu0 %v827_v21  ;;  %p454_p2 = pnand %p453_p1, %p452_p0 }
  0x32   : > { %vm458_vm0 = vcmask (!%p454_p2), 7168   ;;  %v925_v38 = vmov (!%p454_p2), 0.0  }
  0x33   : > { %459 = vst.msk [vmem:[#allocation2] sm:$0xff] (!%p454_p2), %vm458_vm0, %v925_v38  ;;  %460 = vst.msk [vmem:[#allocation2 + $0x8] sm:$0xff] (!%p454_p2), %vm458_vm0, %v925_v38 }
  0x34   : > { %414 = vmatpush1.bf16.msra.mxu0 %v829_v22  ;;  %461 = vst.msk [vmem:[#allocation3] sm:$0xff] (!%p454_p2), %vm458_vm0, %v925_v38  ;;  %462 = vst.msk [vmem:[#allocation3 + $0x8] sm:$0xff] (!%p454_p2), %vm458_vm0, %v925_v38 }
  0x35   : > { %415 = vmatprep.subr.bf16.mxu0 %v830_v23 }
  0x38   : > { %416 = vmatpush1.bf16.msra.mxu0 %v832_v24 }
  0x39   : > { %417 = vmatprep.subr.bf16.mxu0 %v833_v25 }
  0x3c   : > { %418 = vmatpush1.bf16.msra.mxu0 %v835_v26 }
  0x3d   : > { %419 = vmatprep.subr.bf16.mxu0 %v836_v27 }
  0x40   : > { %420 = vmatpush1.bf16.msra.mxu0 %v838_v28 }
  0x41   : > { %421 = vmatprep.subr.bf16.mxu0 %v839_v29 }
  0x44   : > { %422 = vmatpush1.bf16.msra.mxu0 %v841_v30 }
  0x45   : > { %423 = vmatprep.subr.bf16.mxu0 %v842_v31 }
  0x48   : > { %424 = vmatpush1.bf16.msra.mxu0 %v844_v32 }
  0x4b   : > { %442 = vmatmul.mubr.bf16.vlgmr.msra.gmra.mrb[0].mxu0 %v845_v33 }
 0x11b   : > { %457 = sbr.rel (%p454_p2) target bundleno = 290 (0x122), region = 78 }
 0x11e   : > { %v1069_v34 = vpop.f32.mrb[0].mxu0 }
 0x11f   : > { %v1071_v35 = vpop.f32.mrb[1].mxu0 }
 0x120   : > { %v1073_v36 = vpop.f32.mrb[2].mxu0 }
 0x121   : > { %v1075_v37 = vpop.f32.mrb[3].mxu0 }
 0x122 PF: > { %p733_p3 = scmp.ne.s32.totalorder %s910_s20, 0 }
 0x123   : > { %v481_v39 = vmul.f32 (!%p733_p3), %v1069_v34, %v1069_v34  ;;  %v482_v40 = vmul.f32 (!%p733_p3), %v1071_v35, %v1071_v35  ;;  %v468_v41 = vadd.f32 (!%p733_p3), %v1071_v35, %v1069_v34  ;;  %v483_v42 = vmul.f32 (!%p733_p3), %v1073_v36, %v1073_v36  ;;  %v466_v47 = vld [vmem:[#allocation2] sm:$0xff] (!%p733_p3)  ;;  %v479_v48 = vld [vmem:[#allocation3] sm:$0xff] (!%p733_p3)  ;;  %v467_v52 = vld [vmem:[#allocation2 + $0x8] sm:$0xff] (!%p733_p3) }
 0x124   : > { %465 = sbr.rel (%p733_p3) target bundleno = 444 (0x1bc), region = 82  ;;  %v484_v43 = vmul.f32 (!%p733_p3), %v1075_v37, %v1075_v37  ;;  %v471_v45 = vadd.f32 (!%p733_p3), %v1075_v37, %v1073_v36  ;;  %vm476_vm1 = vcmask (!%p733_p3), 7168   ;;  %v480_v54 = vld [vmem:[#allocation3 + $0x8] sm:$0xff] (!%p733_p3) }
 0x125   : > { %v485_v44 = vadd.f32 (!%p733_p3), %v482_v40, %v481_v39  ;;  %469 = vadd.xlane.f32.xlu0 (!%p733_p3), %v468_v41 }
 0x126   : > { %v488_v46 = vadd.f32 (!%p733_p3), %v484_v43, %v483_v42 }
 0x127   : > { %486 = vadd.xlane.f32.xlu1 (!%p733_p3), %v485_v44 }
 0x129   : > { %472 = vadd.xlane.f32.xlu0 (!%p733_p3), %v471_v45 }
 0x12b   : > { %489 = vadd.xlane.f32.xlu1 %v488_v46 }
 0x1b2   : > { %v470_v49 = vpop.xlane.xlu0 %469 }
 0x1b3   : > { %v474_v50 = vadd.f32 %v470_v49, %v466_v47 }
 0x1b4   : > { %v487_v51 = vpop.xlane.xlu1 %486 }
 0x1b5   : > { %v491_v53 = vadd.f32 %v487_v51, %v479_v48  ;;  %477 = vst.msk [vmem:[#allocation2] sm:$0xff] %vm476_vm1, %v474_v50 }
 0x1b6   : > { %v473_v55 = vpop.xlane.xlu0 %472 }
 0x1b7   : > { %493 = vst.msk [vmem:[#allocation3] sm:$0xff] %vm476_vm1, %v491_v53  ;;  %v475_v56 = vadd.f32 %v473_v55, %v467_v52 }
 0x1b8   : > { %v490_v57 = vpop.xlane.xlu1 %489 }
 0x1b9   : > { %v492_v58 = vadd.f32 %v490_v57, %v480_v54  ;;  %478 = vst.msk [vmem:[#allocation2 + $0x8] sm:$0xff] %vm476_vm1, %v475_v56 }
 0x1bb   : > { %494 = vst.msk [vmem:[#allocation3 + $0x8] sm:$0xff] %vm476_vm1, %v492_v58 }
 0x1bc PF: > { %p734_p4 = scmp.ne.s32.totalorder %s910_s20, 1 }
 0x1bd   : > { %v499_v59 = vld [vmem:[#allocation2] sm:$0xff] (!%p734_p4)  ;;  %v926_v62 = vmov (!%p734_p4), 0   ;;  %v518_v15 = vld [vmem:[%s1150_s2 + $0x8] sm:$0xff] (!%p734_p4) }
 0x1be   : > { %498 = sbr.rel (%p734_p4) target bundleno = 613 (0x265), region = 86  ;;  %v503_v60 = vld [vmem:[#allocation3] sm:$0xff] (!%p734_p4)  ;;  %846 = vset.pattern.permute.xlu0 (!%p734_p4), %v926_v62  ;;  %v501_v63 = vmul.f32 (!%p734_p4), 0.001953125, %v499_v59  ;;  %847 = vset.pattern.permute.xlu1 (!%p734_p4), %v926_v62  ;;  %v549_v10 = vld [vmem:[%s1151_s3] sm:$0xff] (!%p734_p4)  ;;  %v550_v19 = vld [vmem:[%s1151_s3 + $0x8] sm:$0xff] (!%p734_p4) }
 0x1bf   : > { %v505_v0 = vmul.f32 (!%p734_p4), 0.001953125, %v503_v60  ;;  %v517_v13 = vld [vmem:[%s1150_s2] sm:$0xff] (!%p734_p4) }
 0x1c0   : > { %v500_v61 = vld [vmem:[#allocation2 + $0x8] sm:$0xff] (!%p734_p4)  ;;  %523 = vperm.xlu0 (!%p734_p4), %846, %v501_v63   ;;  %v507_v4 = vmul.f32 (!%p734_p4), %v501_v63, %v501_v63 }
 0x1c1   : > { %v502_v1 = vmul.f32 (!%p734_p4), 0.001953125, %v500_v61 }
 0x1c2   : > { %v504_v2 = vld [vmem:[#allocation3 + $0x8] sm:$0xff] (!%p734_p4)  ;;  %v509_v6 = vsub.f32 (!%p734_p4), %v505_v0, %v507_v4 }
 0x1c3   : > { %v506_v3 = vmul.f32 (!%p734_p4), 0.001953125, %v504_v2  ;;  %v508_v5 = vmul.f32 (!%p734_p4), %v502_v1, %v502_v1 }
 0x1c4   : > { %v511_v8 = vmax.f32 (!%p734_p4), %v509_v6, 0.0  ;;  %528 = vperm.xlu0 (!%p734_p4), %846, %v502_v1  }
 0x1c5   : > { %v510_v7 = vsub.f32 %v506_v3, %v508_v5 }
 0x1c6   : > { %v513_v11 = vadd.f32 1e-05, %v511_v8 }
 0x1c7   : > { %v512_v9 = vmax.f32 %v510_v7, 0.0 }
 0x1c8   : > { %848 = vrsqrt.f32 %v513_v11  ;;  %553 = vperm.xlu0 %846, %v549_v10  }
 0x1c9   : > { %v514_v12 = vadd.f32 1e-05, %v512_v9 }
 0x1cb   : > { %850 = vrsqrt.f32 %v514_v12 }
 0x1d2   : > { %v849_v14 = vpop.eup %848 }
 0x1d3   : > { %v519_v17 = vmul.f32 %v849_v14, %v517_v13 }
 0x1d5   : > { %v851_v16 = vpop.eup %850  ;;  %537 = vperm.xlu1 %847, %v519_v17  }
 0x1d6   : > { %v520_v18 = vmul.f32 %v851_v16, %v518_v15 }
 0x1d9   : > { %542 = vperm.xlu1 %847, %v520_v18  }
 0x1dd   : > { %558 = vperm.xlu1 %847, %v550_v19  }
 0x23f   : > { %v524_v20 = vpop.permute.xlu0 %523 }
 0x240   : > { %v531_v22 = vsub.f32 %v1069_v34, %v524_v20  ;;  %v532_v23 = vsub.f32 %v1071_v35, %v524_v20 }
 0x243   : > { %v529_v21 = vpop.permute.xlu0 %528 }
 0x244   : > { %v533_v30 = vsub.f32 %v1073_v36, %v529_v21  ;;  %v534_v31 = vsub.f32 %v1075_v37, %v529_v21 }
 0x247   : > { %v554_v27 = vpop.permute.xlu0 %553 }
 0x254   : > { %v538_v24 = vpop.permute.xlu1 %537 }
 0x255   : > { %v545_v25 = vmul.f32 %v538_v24, %v531_v22  ;;  %v546_v26 = vmul.f32 %v538_v24, %v532_v23 }
 0x257   : > { %v561_v28 = vadd.f32 %v554_v27, %v545_v25  ;;  %v562_v29 = vadd.f32 %v554_v27, %v546_v26 }
 0x258   : > { %v543_v32 = vpop.permute.xlu1 %542 }
 0x259   : > { %vm565_vm2 = vcmp.gt.f32.partialorder %v561_v28, 0.0  ;;  %vm566_vm3 = vcmp.gt.f32.partialorder %v562_v29, 0.0  ;;  %v569_v33 = vmul.f32 0.2, %v561_v28  ;;  %v570_v38 = vmul.f32 0.2, %v562_v29 }
 0x25a   : > { %v547_v35 = vmul.f32 %v543_v32, %v533_v30  ;;  %v548_v40 = vmul.f32 %v543_v32, %v534_v31 }
 0x25b   : > { %v573_v39 = vsel %vm565_vm2, %v561_v28, %v569_v33  ;;  %v574_v34 = vsel %vm566_vm3, %v562_v29, %v570_v38 }
 0x25c   : > { %v743_v41 = vpack.c.bf16 %v574_v34, %v573_v39  ;;  %v559_v42 = vpop.permute.xlu1 %558 }
 0x25d   : > { %v563_v43 = vadd.f32 %v559_v42, %v547_v35  ;;  %v564_v44 = vadd.f32 %v559_v42, %v548_v40 }
 0x25e   : > { %589 = vst [vmem:[%s1078_s11] sm:$0xff] %v743_v41 }
 0x25f   : > { %vm567_vm4 = vcmp.gt.f32.partialorder %v563_v43, 0.0  ;;  %vm568_vm5 = vcmp.gt.f32.partialorder %v564_v44, 0.0  ;;  %v571_v36 = vmul.f32 0.2, %v563_v43  ;;  %v572_v45 = vmul.f32 0.2, %v564_v44 }
 0x261   : > { %v575_v37 = vsel %vm567_vm4, %v563_v43, %v571_v36  ;;  %v576_v46 = vsel %vm568_vm5, %v564_v44, %v572_v45 }
 0x262   : > { %v744_v47 = vpack.c.bf16 %v576_v46, %v575_v37 }
 0x264   : > { %590 = vst [vmem:[%s1078_s11 + $0x8] sm:$0xff] %v744_v47 }
 0x265 PF: > { %597 = sbr.rel (!%p1025_p9) target bundleno = 621 (0x26d), region = 90  ;;  %v631_v48 = vld [vmem:[%s1078_s11] sm:$0xff] (%p1025_p9) }
 0x266   : > { %s598_s6 = smul.u32 (%p1025_p9), %s906_s19, %s910_s20 }
 0x268   : > { %s745_s7 = sshll.u32 (%p1025_p9), %s598_s6, 3 }
 0x269   : > { %s601_s17 = scalar_lea.vmem (%p1025_p9), %s1152_s4, %s745_s7 }
 0x26a   : > { %632 = vst [vmem:[%s601_s17] sm:$0xff] (%p1025_p9), %v631_v48 }
 0x26b   : > { %v633_v49 = vld [vmem:[%s1078_s11 + $0x8] sm:$0xff] (%p1025_p9) }
 0x26c   : > { %634 = vst [vmem:[%s601_s17 + $0x10] sm:$0xff] %v633_v49 }
 0x26d PF: > { %s14_s23 = sadd.s32 1, %s922_s23   ;;  %s1155_s15 = smov %s894_s16 }
 0x26e   : > { %p11_p5 = scmp.ge.s32.totalorder %s14_s23, 6   ;;  %s1156_s16 = smov %s1030_s10 }
 0x26f   : > { %s1157_s17 = smov %s902_s18  ;;  %s1158_s18 = smov %s1018_s5 }
 0x270   : > { %s1159_s19 = smov %s914_s21  ;;  %s1160_s20 = smov %s918_s22 }
 0x271   : > { %s1161_s21 = smov %s1164_s25  ;;  %s1162_s22 = smov %s1168_s26 }
 0x272   :  { %13 = sbr.rel (!%p11_p5) target bundleno = 5 (0x5), region = 159 }

// kernel: discriminator_forward.6
= control target key start
LH: loop header
LB: loop body
LE: loop exit
PB: predicated region body
PF: predicated region fallthrough
CT: control target
= control target key end

     0   :  { %s904_s15 = smov 0   ;;  %s906_s16 = smov 0   ;;  %s1058_s0 = inlined_call_operand.vmem [shape: bf16[32,256], index: 0, kind: input, shape index: {}]   ;;  %s1059_s1 = inlined_call_operand.vmem [shape: bf16[256,128], index: 1, kind: input, shape index: {}]   ;;  %s1060_s2 = inlined_call_operand.vmem [shape: f32[32,1], index: 2, kind: input, shape index: {}]   ;;  %s1061_s3 = inlined_call_operand.vmem [shape: f32[32,1], index: 3, kind: input, shape index: {}]   ;;  %s1062_s4 = inlined_call_operand.vmem [shape: bf16[32,128], index: 4, kind: output, shape index: {}]  }
   0x1   :  { %s908_s17 = smov 0  }
   0x2 LB: > { %s26_s18 = sadd.s32 1, %s871_s16  ;;  %p703_p0 = scmp.ge.s32.totalorder %s875_s17, 1  ;;  %s875_s17 = sphi %s908_s17, %s14_s17   ;;  %s871_s16 = sphi %s906_s16, %s1064_s16   ;;  %s867_s15 = sphi %s904_s15, %s1063_s15  }
   0x3   : > { %p28_p1 = scmp.ge.s32.totalorder %s26_s18, 2  ;;  %p175_p2 = scmp.lt.s32.totalorder %s875_s17, 3 }
   0x5   : > { %s1066_s18 = smov (%p28_p1, %s26_s18), 0  ;;  %p176_p3 = pnand %p703_p0, %p175_p2 }
   0x6   : > { %v821_v0 = vld [vmem:[%s1059_s1 + $0x40] sm:$0xff] (!%p176_p3)   ;;  %v823_v2 = vld [vmem:[%s1059_s1 + $0x48] sm:$0xff] (!%p176_p3)   ;;  %v825_v4 = vld [vmem:[%s1059_s1 + $0x50] sm:$0xff] (!%p176_p3)   ;;  %p412_p4 = scmp.eq.s32.totalorder (!%p176_p3), %s867_s15, 0 }
   0x7   : > { %179 = sbr.rel (%p176_p3) target bundleno = 588 (0x24c), region = 36  ;;  %v822_v1 = vld [vmem:[%s1059_s1] sm:$0xff] (!%p176_p3)   ;;  %751 = vmatprep.subr.bf16.mxu0 (!%p176_p3), %v821_v0  ;;  %779 = vmatprep.subr.bf16.mxu1 (!%p176_p3), %v821_v0  ;;  %v824_v3 = vld [vmem:[%s1059_s1 + $0x8] sm:$0xff] (!%p176_p3)   ;;  %v826_v5 = vld [vmem:[%s1059_s1 + $0x10] sm:$0xff] (!%p176_p3)  }
   0x8   : > { %752 = vmatpush3.bf16.msra.mxu0 (!%p176_p3), %v822_v1  ;;  %787 = vmatpush3.bf16.msra.mxu1 (!%p176_p3), %v822_v1  ;;  %v827_v6 = vld [vmem:[%s1059_s1 + $0x58] sm:$0xff] (!%p176_p3)   ;;  %v829_v8 = vld [vmem:[%s1059_s1 + $0x60] sm:$0xff] (!%p176_p3)   ;;  %v831_v10 = vld [vmem:[%s1059_s1 + $0x68] sm:$0xff] (!%p176_p3)  }
   0x9   : > { %753 = vmatprep.subr.bf16.mxu0 (!%p176_p3), %v823_v2  ;;  %780 = vmatprep.subr.bf16.mxu1 (!%p176_p3), %v823_v2  ;;  %v828_v7 = vld [vmem:[%s1059_s1 + $0x18] sm:$0xff] (!%p176_p3)   ;;  %v830_v9 = vld [vmem:[%s1059_s1 + $0x20] sm:$0xff] (!%p176_p3)   ;;  %v832_v13 = vld [vmem:[%s1059_s1 + $0x28] sm:$0xff] (!%p176_p3)  }
   0xa   : > { %v839_v11 = vld [vmem:[%s1058_s0 + $0x4] ss:$8 sps:$4 sm:$0xff] (!%p176_p3)   ;;  %v842_v12 = vld [vmem:[%s1058_s0 + $0x14] ss:$8 sps:$4 sm:$0xff] (!%p176_p3)   ;;  %v837_v18 = vld [vmem:[%s1058_s0] ss:$8 sps:$4 sm:$0xff] (!%p176_p3)  }
   0xb   : > { %v833_v14 = vld [vmem:[%s1059_s1 + $0x70] sm:$0xff] (!%p176_p3)   ;;  %395 = vmatprep.mubr.bf16.mxu0 (!%p176_p3), %v839_v11  ;;  %403 = vmatprep.mubr.bf16.mxu1 (!%p176_p3), %v842_v12  ;;  %v835_v16 = vld [vmem:[%s1059_s1 + $0x78] sm:$0xff] (!%p176_p3)  }
   0xc   : > { %754 = vmatpush3.bf16.msra.mxu0 (!%p176_p3), %v824_v3  ;;  %788 = vmatpush3.bf16.msra.mxu1 (!%p176_p3), %v824_v3  ;;  %v834_v15 = vld [vmem:[%s1059_s1 + $0x30] sm:$0xff] (!%p176_p3)   ;;  %v836_v17 = vld [vmem:[%s1059_s1 + $0x38] sm:$0xff] (!%p176_p3)  }
   0xd   : > { %755 = vmatprep.subr.bf16.mxu0 (!%p176_p3), %v825_v4  ;;  %781 = vmatprep.subr.bf16.mxu1 (!%p176_p3), %v825_v4  ;;  %v840_v19 = vld [vmem:[%s1058_s0 + $0x10] ss:$8 sps:$4 sm:$0xff] (!%p176_p3)  }
   0xe   : > { %vm418_vm0 = vcmask (%p412_p4), 7168   ;;  %v877_v32 = vmov (%p412_p4), 0.0  }
   0xf   : > { %419 = vst.msk [vmem:[#allocation2] sm:$0xff] (%p412_p4), %vm418_vm0, %v877_v32  ;;  %420 = vst.msk [vmem:[#allocation2 + $0x8] sm:$0xff] (%p412_p4), %vm418_vm0, %v877_v32 }
  0x10   : > { %756 = vmatpush3.bf16.msra.mxu0 %v826_v5  ;;  %789 = vmatpush3.bf16.msra.mxu1 %v826_v5  ;;  %421 = vst.msk [vmem:[#allocation2 + $0x10] sm:$0xff] (%p412_p4), %vm418_vm0, %v877_v32  ;;  %422 = vst.msk [vmem:[#allocation2 + $0x18] sm:$0xff] (%p412_p4), %vm418_vm0, %v877_v32 }
  0x11   : > { %757 = vmatprep.subr.bf16.mxu0 %v827_v6  ;;  %782 = vmatprep.subr.bf16.mxu1 %v827_v6  ;;  %423 = vst.msk [vmem:[#allocation3] sm:$0xff] (%p412_p4), %vm418_vm0, %v877_v32  ;;  %424 = vst.msk [vmem:[#allocation3 + $0x8] sm:$0xff] (%p412_p4), %vm418_vm0, %v877_v32 }
  0x12   : > { %425 = vst.msk [vmem:[#allocation3 + $0x10] sm:$0xff] (%p412_p4), %vm418_vm0, %v877_v32  ;;  %426 = vst.msk [vmem:[#allocation3 + $0x18] sm:$0xff] (%p412_p4), %vm418_vm0, %v877_v32 }
  0x14   : > { %758 = vmatpush3.bf16.msra.mxu0 %v828_v7  ;;  %790 = vmatpush3.bf16.msra.mxu1 %v828_v7 }
  0x15   : > { %759 = vmatprep.subr.bf16.mxu0 %v829_v8  ;;  %783 = vmatprep.subr.bf16.mxu1 %v829_v8 }
  0x18   : > { %760 = vmatpush3.bf16.msra.mxu0 %v830_v9  ;;  %791 = vmatpush3.bf16.msra.mxu1 %v830_v9 }
  0x19   : > { %761 = vmatprep.subr.bf16.mxu0 %v831_v10  ;;  %784 = vmatprep.subr.bf16.mxu1 %v831_v10 }
  0x1c   : > { %762 = vmatpush3.bf16.msra.mxu0 %v832_v13  ;;  %792 = vmatpush3.bf16.msra.mxu1 %v832_v13 }
  0x1d   : > { %763 = vmatprep.subr.bf16.mxu0 %v833_v14  ;;  %785 = vmatprep.subr.bf16.mxu1 %v833_v14 }
  0x20   : > { %764 = vmatpush3.bf16.msra.mxu0 %v834_v15  ;;  %793 = vmatpush3.bf16.msra.mxu1 %v834_v15 }
  0x21   : > { %765 = vmatprep.subr.bf16.mxu0 %v835_v16  ;;  %786 = vmatprep.subr.bf16.mxu1 %v835_v16 }
  0x24   : > { %766 = vmatpush3.bf16.msra.mxu0 %v836_v17  ;;  %794 = vmatpush3.bf16.msra.mxu1 %v836_v17 }
  0x27   : > { %396 = vmatmul.mubr.bf16.vlgmr.msra.gmra.mrb[0].mxu0 %v837_v18  ;;  %404 = vmatmul.mubr.bf16.vlgmr.msra.gmra.mrb[0].mxu1 %v840_v19 }
  0xf8   : > { %417 = sbr.rel (!%p412_p4) target bundleno = 255 (0xff), region = 40 }
  0xfa   : > { %v767_v20 = vpop.f32.mrb[0].mxu0  ;;  %v773_v21 = vpop.f32.mrb[0].mxu1 }
  0xfb   : > { %v768_v22 = vpop.f32.mrb[1].mxu0  ;;  %v774_v23 = vpop.f32.mrb[1].mxu1 }
  0xfc   : > { %v985_v24 = vadd.f32 %v768_v22, %v767_v20  ;;  %v987_v25 = vadd.f32 %v774_v23, %v773_v21  ;;  %v770_v26 = vpop.f32.mrb[2].mxu0  ;;  %v776_v27 = vpop.f32.mrb[2].mxu1 }
  0xfd   : > { %v771_v28 = vpop.f32.mrb[3].mxu0  ;;  %v777_v29 = vpop.f32.mrb[3].mxu1 }
  0xfe   : > { %v989_v30 = vadd.f32 %v771_v28, %v770_v26  ;;  %v991_v31 = vadd.f32 %v777_v29, %v776_v27 }
  0xff PF: > { %p725_p5 = scmp.ne.s32.totalorder %s867_s15, 0 }
 0x100   : > { %438 = vadd.xlane.f32.xlu1 (!%p725_p5), %v987_v25  ;;  %434 = vadd.xlane.f32.xlu0 (!%p725_p5), %v985_v24  ;;  %v456_v33 = vmul.f32 (!%p725_p5), %v989_v30, %v989_v30  ;;  %v455_v34 = vmul.f32 (!%p725_p5), %v985_v24, %v985_v24  ;;  %v458_v35 = vmul.f32 (!%p725_p5), %v991_v31, %v991_v31  ;;  %v432_v37 = vld [vmem:[#allocation2 + $0x10] sm:$0xff] (!%p725_p5)  ;;  %v430_v38 = vld [vmem:[#allocation2] sm:$0xff] (!%p725_p5)  ;;  %vm446_vm1 = vcmask (!%p725_p5), 7168   ;;  %v433_v43 = vld [vmem:[#allocation2 + $0x18] sm:$0xff] (!%p725_p5) }
 0x101   : > { %429 = sbr.rel (%p725_p5) target bundleno = 413 (0x19d), region = 44  ;;  %v457_v36 = vmul.f32 (!%p725_p5), %v987_v25, %v987_v25  ;;  %v431_v44 = vld [vmem:[#allocation2 + $0x8] sm:$0xff] (!%p725_p5)  ;;  %v451_v50 = vld [vmem:[#allocation3] sm:$0xff] (!%p725_p5)  ;;  %v454_v55 = vld [vmem:[#allocation3 + $0x18] sm:$0xff] (!%p725_p5) }
 0x102   : > { %v452_v49 = vld [vmem:[#allocation3 + $0x8] sm:$0xff] (!%p725_p5)  ;;  %v453_v56 = vld [vmem:[#allocation3 + $0x10] sm:$0xff] (!%p725_p5) }
 0x104   : > { %440 = vadd.xlane.f32.xlu1 (!%p725_p5), %v991_v31  ;;  %436 = vadd.xlane.f32.xlu0 (!%p725_p5), %v989_v30 }
 0x108   : > { %461 = vadd.xlane.f32.xlu1 %v456_v33  ;;  %459 = vadd.xlane.f32.xlu0 %v455_v34 }
 0x10c   : > { %465 = vadd.xlane.f32.xlu1 %v458_v35  ;;  %463 = vadd.xlane.f32.xlu0 %v457_v36 }
 0x18d   : > { %v439_v39 = vpop.xlane.xlu1 %438  ;;  %v435_v40 = vpop.xlane.xlu0 %434 }
 0x18e   : > { %v444_v41 = vadd.f32 %v439_v39, %v432_v37  ;;  %v442_v42 = vadd.f32 %v435_v40, %v430_v38 }
 0x190   : > { %449 = vst.msk [vmem:[#allocation2 + $0x10] sm:$0xff] %vm446_vm1, %v444_v41  ;;  %447 = vst.msk [vmem:[#allocation2] sm:$0xff] %vm446_vm1, %v442_v42 }
 0x191   : > { %v441_v45 = vpop.xlane.xlu1 %440  ;;  %v437_v46 = vpop.xlane.xlu0 %436 }
 0x192   : > { %v445_v47 = vadd.f32 %v441_v45, %v433_v43  ;;  %v443_v48 = vadd.f32 %v437_v46, %v431_v44 }
 0x194   : > { %450 = vst.msk [vmem:[#allocation2 + $0x18] sm:$0xff] %vm446_vm1, %v445_v47  ;;  %448 = vst.msk [vmem:[#allocation2 + $0x8] sm:$0xff] %vm446_vm1, %v443_v48 }
 0x195   : > { %v462_v51 = vpop.xlane.xlu1 %461  ;;  %v460_v52 = vpop.xlane.xlu0 %459 }
 0x196   : > { %v468_v53 = vadd.f32 %v462_v51, %v452_v49  ;;  %v467_v54 = vadd.f32 %v460_v52, %v451_v50 }
 0x198   : > { %472 = vst.msk [vmem:[#allocation3 + $0x8] sm:$0xff] %vm446_vm1, %v468_v53  ;;  %471 = vst.msk [vmem:[#allocation3] sm:$0xff] %vm446_vm1, %v467_v54 }
 0x199   : > { %v466_v57 = vpop.xlane.xlu1 %465  ;;  %v464_v58 = vpop.xlane.xlu0 %463 }
 0x19a   : > { %v470_v59 = vadd.f32 %v466_v57, %v454_v55  ;;  %v469_v60 = vadd.f32 %v464_v58, %v453_v56 }
 0x19c   : > { %474 = vst.msk [vmem:[#allocation3 + $0x18] sm:$0xff] %vm446_vm1, %v470_v59  ;;  %473 = vst.msk [vmem:[#allocation3 + $0x10] sm:$0xff] %vm446_vm1, %v469_v60 }
 0x19d PF: > { %p726_p6 = scmp.ne.s32.totalorder %s867_s15, 1 }
 0x19e   : > { %v481_v61 = vld [vmem:[#allocation2 + $0x10] sm:$0xff] (!%p726_p6)  ;;  %v479_v63 = vld [vmem:[#allocation2] sm:$0xff] (!%p726_p6)  ;;  %v878_v0 = vmov (!%p726_p6), 0   ;;  %v482_v5 = vld [vmem:[#allocation2 + $0x18] sm:$0xff] (!%p726_p6) }
 0x19f   : > { %478 = sbr.rel (%p726_p6) target bundleno = 588 (0x24c), region = 48  ;;  %844 = vset.pattern.permute.xlu1 (!%p726_p6), %v878_v0  ;;  %843 = vset.pattern.permute.xlu0 (!%p726_p6), %v878_v0  ;;  %v485_v1 = vmul.f32 (!%p726_p6), 0.0078125, %v481_v61  ;;  %v483_v3 = vmul.f32 (!%p726_p6), 0.0078125, %v479_v63  ;;  %v487_v4 = vld [vmem:[#allocation3] sm:$0xff] (!%p726_p6)  ;;  %v486_v8 = vmul.f32 (!%p726_p6), 0.0078125, %v482_v5  ;;  %v480_v10 = vld [vmem:[#allocation2 + $0x8] sm:$0xff] (!%p726_p6) }
 0x1a0   : > { %v491_v7 = vmul.f32 (!%p726_p6), 0.0078125, %v487_v4  ;;  %v488_v11 = vld [vmem:[#allocation3 + $0x8] sm:$0xff] (!%p726_p6)  ;;  %v484_v14 = vmul.f32 (!%p726_p6), 0.0078125, %v480_v10  ;;  %v571_v28 = vld [vmem:[%s1061_s3] sm:$0xff] (!%p726_p6)  ;;  %v517_v40 = vld [vmem:[%s1060_s2 + $0x10] sm:$0xff] (!%p726_p6) }
 0x1a1   : > { %535 = vperm.xlu1 (!%p726_p6), %844, %v485_v1   ;;  %v497_v12 = vmul.f32 (!%p726_p6), %v485_v1, %v485_v1  ;;  %525 = vperm.xlu0 (!%p726_p6), %843, %v483_v3   ;;  %v495_v13 = vmul.f32 (!%p726_p6), %v483_v3, %v483_v3  ;;  %v492_v15 = vmul.f32 (!%p726_p6), 0.0078125, %v488_v11  ;;  %v498_v16 = vmul.f32 (!%p726_p6), %v486_v8, %v486_v8  ;;  %v572_v27 = vld [vmem:[%s1061_s3 + $0x8] sm:$0xff] (!%p726_p6)  ;;  %v515_v36 = vld [vmem:[%s1060_s2] sm:$0xff] (!%p726_p6)  ;;  %v518_v44 = vld [vmem:[%s1060_s2 + $0x18] sm:$0xff] (!%p726_p6) }
 0x1a2   : > { %v496_v19 = vmul.f32 (!%p726_p6), %v484_v14, %v484_v14  ;;  %v516_v39 = vld [vmem:[%s1060_s2 + $0x8] sm:$0xff] (!%p726_p6)  ;;  %v573_v48 = vld [vmem:[%s1061_s3 + $0x10] sm:$0xff] (!%p726_p6)  ;;  %v574_v49 = vld [vmem:[%s1061_s3 + $0x18] sm:$0xff] (!%p726_p6) }
 0x1a3   : > { %v489_v62 = vld [vmem:[#allocation3 + $0x10] sm:$0xff] (!%p726_p6)  ;;  %v490_v6 = vld [vmem:[#allocation3 + $0x18] sm:$0xff] (!%p726_p6)  ;;  %v499_v18 = vsub.f32 (!%p726_p6), %v491_v7, %v495_v13 }
 0x1a4   : > { %v493_v2 = vmul.f32 (!%p726_p6), 0.0078125, %v489_v62  ;;  %v494_v9 = vmul.f32 (!%p726_p6), 0.0078125, %v490_v6  ;;  %v500_v23 = vsub.f32 (!%p726_p6), %v492_v15, %v496_v19 }
 0x1a5   : > { %v503_v22 = vmax.f32 (!%p726_p6), %v499_v18, 0.0  ;;  %540 = vperm.xlu1 (!%p726_p6), %844, %v486_v8   ;;  %530 = vperm.xlu0 (!%p726_p6), %843, %v484_v14  }
 0x1a6   : > { %v501_v17 = vsub.f32 %v493_v2, %v497_v12  ;;  %v502_v20 = vsub.f32 %v494_v9, %v498_v16  ;;  %v504_v33 = vmax.f32 %v500_v23, 0.0 }
 0x1a7   : > { %v507_v32 = vadd.f32 1e-05, %v503_v22 }
 0x1a8   : > { %v505_v21 = vmax.f32 %v501_v17, 0.0  ;;  %v506_v26 = vmax.f32 %v502_v20, 0.0  ;;  %v508_v35 = vadd.f32 1e-05, %v504_v33 }
 0x1a9   : > { %582 = vperm.xlu1 %844, %v572_v27   ;;  %577 = vperm.xlu0 %843, %v571_v28  }
 0x1aa   : > { %v509_v29 = vadd.f32 1e-05, %v505_v21  ;;  %v510_v34 = vadd.f32 1e-05, %v506_v26 }
 0x1ac   : > { %845 = vrsqrt.f32 %v509_v29 }
 0x1ad   : > { %847 = vrsqrt.f32 %v507_v32 }
 0x1ae   : > { %849 = vrsqrt.f32 %v510_v34 }
 0x1af   : > { %851 = vrsqrt.f32 %v508_v35 }
 0x1b6   : > { %v846_v37 = vpop.eup %845 }
 0x1b7   : > { %v848_v38 = vpop.eup %847  ;;  %v521_v46 = vmul.f32 %v846_v37, %v517_v40 }
 0x1b8   : > { %v850_v41 = vpop.eup %849  ;;  %v519_v42 = vmul.f32 %v848_v38, %v515_v36 }
 0x1b9   : > { %v852_v43 = vpop.eup %851  ;;  %v522_v47 = vmul.f32 %v850_v41, %v518_v44 }
 0x1ba   : > { %v520_v45 = vmul.f32 %v852_v43, %v516_v39  ;;  %549 = vperm.xlu0 %843, %v519_v42  }
 0x1bc   : > { %554 = vperm.xlu1 %844, %v520_v45  }
 0x1be   : > { %559 = vperm.xlu0 %843, %v521_v46  }
 0x1c0   : > { %564 = vperm.xlu1 %844, %v522_v47  }
 0x1c2   : > { %587 = vperm.xlu0 %843, %v573_v48  }
 0x1c4   : > { %592 = vperm.xlu1 %844, %v574_v49  }
 0x220   : > { %v526_v50 = vpop.permute.xlu0 %525  ;;  %v536_v51 = vpop.permute.xlu1 %535 }
 0x221   : > { %v543_v56 = vsub.f32 %v985_v24, %v526_v50  ;;  %v545_v0 = vsub.f32 %v987_v25, %v536_v51 }
 0x224   : > { %v531_v52 = vpop.permute.xlu0 %530  ;;  %v541_v53 = vpop.permute.xlu1 %540 }
 0x225   : > { %v544_v58 = vsub.f32 %v989_v30, %v531_v52  ;;  %v546_v3 = vsub.f32 %v991_v31, %v541_v53 }
 0x228   : > { %v578_v54 = vpop.permute.xlu0 %577  ;;  %v583_v55 = vpop.permute.xlu1 %582 }
 0x239   : > { %v550_v57 = vpop.permute.xlu0 %549 }
 0x23a   : > { %v567_v59 = vmul.f32 %v550_v57, %v543_v56 }
 0x23b   : > { %v555_v60 = vpop.permute.xlu1 %554 }
 0x23c   : > { %v568_v61 = vmul.f32 %v555_v60, %v544_v58  ;;  %v595_v62 = vadd.f32 %v578_v54, %v567_v59 }
 0x23d   : > { %v560_v63 = vpop.permute.xlu0 %559 }
 0x23e   : > { %v596_v1 = vadd.f32 %v583_v55, %v568_v61  ;;  %vm599_vm2 = vcmp.gt.f32.partialorder %v595_v62, 0.0  ;;  %v603_v2 = vmul.f32 0.2, %v595_v62  ;;  %v569_v24 = vmul.f32 %v560_v63, %v545_v0 }
 0x23f   : > { %v565_v4 = vpop.permute.xlu1 %564 }
 0x240   : > { %vm600_vm3 = vcmp.gt.f32.partialorder %v596_v1, 0.0  ;;  %v604_v5 = vmul.f32 0.2, %v596_v1  ;;  %v607_v6 = vsel %vm599_vm2, %v595_v62, %v603_v2  ;;  %v570_v30 = vmul.f32 %v565_v4, %v546_v3 }
 0x241   : > { %v588_v7 = vpop.permute.xlu0 %587 }
 0x242   : > { %v608_v8 = vsel %vm600_vm3, %v596_v1, %v604_v5  ;;  %v597_v9 = vadd.f32 %v588_v7, %v569_v24 }
 0x243   : > { %v743_v10 = vpack.c.bf16 %v608_v8, %v607_v6  ;;  %v593_v11 = vpop.permute.xlu1 %592 }
 0x244   : > { %v598_v12 = vadd.f32 %v593_v11, %v570_v30  ;;  %vm601_vm4 = vcmp.gt.f32.partialorder %v597_v9, 0.0  ;;  %v605_v13 = vmul.f32 0.2, %v597_v9 }
 0x245   : > { %744 = vst [vmem:[%s1062_s4] sm:$0xff] %v743_v10  }
 0x246   : > { %vm602_vm5 = vcmp.gt.f32.partialorder %v598_v12, 0.0  ;;  %v606_v25 = vmul.f32 0.2, %v598_v12  ;;  %v609_v31 = vsel %vm601_vm4, %v597_v9, %v605_v13 }
 0x248   : > { %v610_v14 = vsel %vm602_vm5, %v598_v12, %v606_v25 }
 0x249   : > { %v748_v15 = vpack.c.bf16 %v610_v14, %v609_v31 }
 0x24b   : > { %750 = vst [vmem:[%s1062_s4 + $0x8] sm:$0xff] %v748_v15  }
 0x24c PF: > { %s14_s17 = sadd.s32 1, %s875_s17   ;;  %s1063_s15 = smov %s871_s16 }
 0x24d   : > { %p11_p7 = scmp.ge.s32.totalorder %s14_s17, 4   ;;  %s1064_s16 = smov %s1066_s18 }
 0x24f   :  { %13 = sbr.rel (!%p11_p7) target bundleno = 2 (0x2), region = 78 }

// kernel: discriminator_forward.7
= control target key start
LH: loop header
LB: loop body
LE: loop exit
PB: predicated region body
PF: predicated region fallthrough
CT: control target
= control target key end

     0   :  { %v2353_v1 = vmov 0   ;;  %s3630_s0 = inlined_call_operand.vmem [shape: bf16[64,512], index: 0, kind: input, shape index: {}]   ;;  %s3631_s1 = inlined_call_operand.vmem [shape: bf16[512,32], index: 1, kind: input, shape index: {}]   ;;  %s3632_s2 = inlined_call_operand.vmem [shape: f32[64,1], index: 2, kind: input, shape index: {}]   ;;  %s3633_s3 = inlined_call_operand.vmem [shape: f32[64,1], index: 3, kind: input, shape index: {}]   ;;  %s3634_s4 = inlined_call_operand.vmem [shape: f32[64,16], index: 4, kind: input, shape index: {}]   ;;  %s3635_s5 = inlined_call_operand.hbm [shape: f32[1,2], index: 5, kind: output, shape index: {}]  }
   0x1   :  { %v611_v0 = vld [vmem:[%s3632_s2 + $0x8] sm:$0xff]  ;;  %2208 = vset.pattern.permute.xlu1 %v2353_v1  ;;  %v2253_v2 = vld [vmem:[%s3631_s1 + $0x40] sm:$0xff]   ;;  %2207 = vset.pattern.permute.xlu0 %v2353_v1  ;;  %v612_v6 = vld [vmem:[%s3632_s2 + $0x10] sm:$0xff] }
   0x2   :  { %625 = vperm.xlu1 %2208, %v611_v0   ;;  %v2254_v3 = vld [vmem:[%s3631_s1 + $0xc0] sm:$0xff]   ;;  %2095 = vmatprep.subr.bf16.mxu0 %v2253_v2  ;;  %v2257_v7 = vld [vmem:[%s3631_s1 + $0x48] sm:$0xff]   ;;  %v613_v11 = vld [vmem:[%s3632_s2 + $0x18] sm:$0xff] }
   0x3   :  { %v2255_v4 = vld [vmem:[%s3631_s1] sm:$0xff]   ;;  %2135 = vmatprep.subr.bf16.mxu1 %v2254_v3  ;;  %v2258_v8 = vld [vmem:[%s3631_s1 + $0xc8] sm:$0xff]   ;;  %v2261_v12 = vld [vmem:[%s3631_s1 + $0x50] sm:$0xff]  }
   0x4   :  { %v2256_v5 = vld [vmem:[%s3631_s1 + $0x80] sm:$0xff]   ;;  %2096 = vmatpush3.bf16.msra.mxu0 %v2255_v4  ;;  %v2259_v9 = vld [vmem:[%s3631_s1 + $0x8] sm:$0xff]   ;;  %v2262_v13 = vld [vmem:[%s3631_s1 + $0xd0] sm:$0xff]  }
   0x5   :  { %2136 = vmatpush3.bf16.msra.mxu1 %v2256_v5  ;;  %2097 = vmatprep.subr.bf16.mxu0 %v2257_v7  ;;  %v2260_v10 = vld [vmem:[%s3631_s1 + $0x88] sm:$0xff]   ;;  %v2263_v14 = vld [vmem:[%s3631_s1 + $0x10] sm:$0xff]   ;;  %v614_v16 = vld [vmem:[%s3632_s2 + $0x20] sm:$0xff] }
   0x6   :  { %630 = vperm.xlu1 %2208, %v612_v6   ;;  %2137 = vmatprep.subr.bf16.mxu1 %v2258_v8  ;;  %v2264_v15 = vld [vmem:[%s3631_s1 + $0x90] sm:$0xff]   ;;  %v2265_v17 = vld [vmem:[%s3631_s1 + $0x58] sm:$0xff]   ;;  %v615_v21 = vld [vmem:[%s3632_s2 + $0x28] sm:$0xff] }
   0x7   :  { %v2266_v18 = vld [vmem:[%s3631_s1 + $0xd8] sm:$0xff]   ;;  %v2269_v22 = vld [vmem:[%s3631_s1 + $0x60] sm:$0xff]   ;;  %v616_v26 = vld [vmem:[%s3632_s2 + $0x30] sm:$0xff] }
   0x8   :  { %2098 = vmatpush3.bf16.msra.mxu0 %v2259_v9  ;;  %v2267_v19 = vld [vmem:[%s3631_s1 + $0x18] sm:$0xff]   ;;  %v2270_v23 = vld [vmem:[%s3631_s1 + $0xe0] sm:$0xff]   ;;  %v2273_v27 = vld [vmem:[%s3631_s1 + $0x68] sm:$0xff]  }
   0x9   :  { %2138 = vmatpush3.bf16.msra.mxu1 %v2260_v10  ;;  %2099 = vmatprep.subr.bf16.mxu0 %v2261_v12  ;;  %v2268_v20 = vld [vmem:[%s3631_s1 + $0x98] sm:$0xff]   ;;  %v2271_v24 = vld [vmem:[%s3631_s1 + $0x20] sm:$0xff]   ;;  %v2274_v28 = vld [vmem:[%s3631_s1 + $0xe8] sm:$0xff]  }
   0xa   :  { %635 = vperm.xlu1 %2208, %v613_v11   ;;  %2139 = vmatprep.subr.bf16.mxu1 %v2262_v13  ;;  %v2272_v25 = vld [vmem:[%s3631_s1 + $0xa0] sm:$0xff]   ;;  %v2275_v29 = vld [vmem:[%s3631_s1 + $0x28] sm:$0xff]   ;;  %v617_v31 = vld [vmem:[%s3632_s2 + $0x38] sm:$0xff] }
   0xb   :  { %v2276_v30 = vld [vmem:[%s3631_s1 + $0xa8] sm:$0xff]   ;;  %v2277_v32 = vld [vmem:[%s3631_s1 + $0x70] sm:$0xff]   ;;  %v666_v36 = vld [vmem:[%s3633_s3] sm:$0xff] }
   0xc   :  { %2100 = vmatpush3.bf16.msra.mxu0 %v2263_v14  ;;  %v2278_v33 = vld [vmem:[%s3631_s1 + $0xf0] sm:$0xff]   ;;  %v2281_v37 = vld [vmem:[%s3631_s1 + $0x78] sm:$0xff]   ;;  %v670_v46 = vld [vmem:[%s3633_s3 + $0x20] sm:$0xff] }
   0xd   :  { %2140 = vmatpush3.bf16.msra.mxu1 %v2264_v15  ;;  %2101 = vmatprep.subr.bf16.mxu0 %v2265_v17  ;;  %v2279_v34 = vld [vmem:[%s3631_s1 + $0x30] sm:$0xff]   ;;  %v2282_v38 = vld [vmem:[%s3631_s1 + $0xf8] sm:$0xff]   ;;  %v610_v47 = vld [vmem:[%s3632_s2] sm:$0xff] }
   0xe   :  { %640 = vperm.xlu1 %2208, %v614_v16   ;;  %2141 = vmatprep.subr.bf16.mxu1 %v2266_v18  ;;  %v2280_v35 = vld [vmem:[%s3631_s1 + $0xb0] sm:$0xff]   ;;  %v2283_v39 = vld [vmem:[%s3631_s1 + $0x38] sm:$0xff]   ;;  %v667_v49 = vld [vmem:[%s3633_s3 + $0x8] sm:$0xff] }
   0xf   :  { %v2284_v40 = vld [vmem:[%s3631_s1 + $0xb8] sm:$0xff]   ;;  %v668_v41 = vld [vmem:[%s3633_s3 + $0x10] sm:$0xff]  ;;  %620 = vperm.xlu0 %2207, %v610_v47   ;;  %v2574_v53 = vld [vmem:[%s3634_s4] sm:$0xff] }
  0x10   :  { %2102 = vmatpush3.bf16.msra.mxu0 %v2267_v19  ;;  %v2285_v42 = vld [vmem:[%s3630_s0] ss:$16 sps:$4 sm:$0xff]   ;;  %v2287_v43 = vld [vmem:[%s3630_s0 + $0x4] ss:$16 sps:$4 sm:$0xff]   ;;  %v2288_v44 = vld [vmem:[%s3630_s0 + $0x8] ss:$16 sps:$4 sm:$0xff]  }
  0x11   :  { %2142 = vmatpush3.bf16.msra.mxu1 %v2268_v20  ;;  %2103 = vmatprep.subr.bf16.mxu0 %v2269_v22  ;;  %v2290_v45 = vld [vmem:[%s3630_s0 + $0xc] ss:$16 sps:$4 sm:$0xff]   ;;  %v672_v48 = vld [vmem:[%s3633_s3 + $0x30] sm:$0xff]  ;;  %v2296_v54 = vld [vmem:[%s3630_s0 + $0x28] ss:$16 sps:$4 sm:$0xff]  }
  0x12   :  { %645 = vperm.xlu1 %2208, %v615_v21   ;;  %2143 = vmatprep.subr.bf16.mxu1 %v2270_v23  ;;  %v2291_v50 = vld [vmem:[%s3630_s0 + $0x24] ss:$16 sps:$4 sm:$0xff]   ;;  %v2293_v51 = vld [vmem:[%s3630_s0 + $0x2c] ss:$16 sps:$4 sm:$0xff]   ;;  %v2295_v52 = vld [vmem:[%s3630_s0 + $0x20] ss:$16 sps:$4 sm:$0xff]  }
  0x13   :  { %406 = vmatprep.mubr.bf16.mxu0 %v2287_v43  ;;  %471 = vmatprep.mubr.bf16.mxu1 %v2290_v45  ;;  %v669_v55 = vld [vmem:[%s3633_s3 + $0x18] sm:$0xff]  ;;  %v2297_v56 = vld [vmem:[%s3630_s0 + $0x44] ss:$16 sps:$4 sm:$0xff]   ;;  %v671_v59 = vld [vmem:[%s3633_s3 + $0x28] sm:$0xff] }
  0x14   :  { %2104 = vmatpush3.bf16.msra.mxu0 %v2271_v24  ;;  %681 = vperm.xlu0 %2207, %v667_v49   ;;  %v2299_v57 = vld [vmem:[%s3630_s0 + $0x4c] ss:$16 sps:$4 sm:$0xff]   ;;  %v2592_v58 = vld [vmem:[%s3634_s4 + $0x10] sm:$0xff] }
  0x15   :  { %2144 = vmatpush3.bf16.msra.mxu1 %v2272_v25  ;;  %2105 = vmatprep.subr.bf16.mxu0 %v2273_v27 }
  0x16   :  { %650 = vperm.xlu1 %2208, %v616_v26   ;;  %2145 = vmatprep.subr.bf16.mxu1 %v2274_v28 }
  0x18   :  { %2106 = vmatpush3.bf16.msra.mxu0 %v2275_v29  ;;  %691 = vperm.xlu0 %2207, %v669_v55  }
  0x19   :  { %2146 = vmatpush3.bf16.msra.mxu1 %v2276_v30  ;;  %2107 = vmatprep.subr.bf16.mxu0 %v2277_v32 }
  0x1a   :  { %655 = vperm.xlu1 %2208, %v617_v31   ;;  %2147 = vmatprep.subr.bf16.mxu1 %v2278_v33 }
  0x1c   :  { %2108 = vmatpush3.bf16.msra.mxu0 %v2279_v34 }
  0x1d   :  { %2148 = vmatpush3.bf16.msra.mxu1 %v2280_v35  ;;  %2109 = vmatprep.subr.bf16.mxu0 %v2281_v37 }
  0x1e   :  { %676 = vperm.xlu1 %2208, %v666_v36   ;;  %2149 = vmatprep.subr.bf16.mxu1 %v2282_v38 }
  0x20   :  { %2110 = vmatpush3.bf16.msra.mxu0 %v2283_v39 }
  0x21   :  { %2150 = vmatpush3.bf16.msra.mxu1 %v2284_v40 }
  0x22   :  { %686 = vperm.xlu1 %2208, %v668_v41  }
  0x23   :  { %407 = vmatmul.mubr.bf16.vlgmr.msra.gmra.mrb[0].mxu0 %v2285_v42 }
  0x24   :  { %472 = vmatmul.mubr.bf16.vlgmr.msra.gmra.mrb[0].mxu1 %v2288_v44  ;;  %414 = vmatprep.mubr.bf16.mxu0 %v2291_v50 }
  0x25   :  { %479 = vmatprep.mubr.bf16.mxu1 %v2293_v51 }
  0x26   :  { %696 = vperm.xlu1 %2208, %v670_v46  }
  0x2a   :  { %706 = vperm.xlu1 %2208, %v672_v48  }
  0x2b   :  { %415 = vmatmul.mubr.bf16.gmra.mrb[4].mxu0 %v2295_v52 }
  0x2c   :  { %480 = vmatmul.mubr.bf16.gmra.mrb[4].mxu1 %v2296_v54  ;;  %422 = vmatprep.mubr.bf16.mxu0 %v2297_v56 }
  0x2d   :  { %487 = vmatprep.mubr.bf16.mxu1 %v2299_v57 }
  0x2e   :  { %756 = vperm.xlu1 %2208, %v2574_v53  }
  0x2f   :  { %10 = vsyncpa [#allocation3], 0  ;;  %v2301_v60 = vld [vmem:[%s3630_s0 + $0x40] ss:$16 sps:$4 sm:$0xff]   ;;  %v2302_v61 = vld [vmem:[%s3630_s0 + $0x48] ss:$16 sps:$4 sm:$0xff]   ;;  %701 = vperm.xlu0 %2207, %v671_v59  }
  0x30   :  { %v2607_v62 = vld [vmem:[%s3634_s4 + $0x20] sm:$0xff]  ;;  %v673_v0 = vld [vmem:[%s3633_s3 + $0x38] sm:$0xff]  ;;  %v2622_v2 = vld [vmem:[%s3634_s4 + $0x30] sm:$0xff]  ;;  %v2354_v7 = vmov 1   ;;  %v2355_v10 = vmov 2   ;;  %v2356_v11 = vmov 3  }
  0x31   :  { %v2303_v63 = vld [vmem:[%s3630_s0 + $0x64] ss:$16 sps:$4 sm:$0xff]   ;;  %v2305_v1 = vld [vmem:[%s3630_s0 + $0x6c] ss:$16 sps:$4 sm:$0xff]   ;;  %v2307_v4 = vld [vmem:[%s3630_s0 + $0x60] ss:$16 sps:$4 sm:$0xff]  }
  0x32   :  { %766 = vperm.xlu1 %2208, %v2592_v58   ;;  %v2627_v3 = vld [vmem:[%s3634_s4 + $0x8] sm:$0xff]  ;;  %v2640_v6 = vld [vmem:[%s3634_s4 + $0x18] sm:$0xff]  ;;  %v2357_v12 = vmov 4   ;;  %v2358_v16 = vmov 5   ;;  %v2359_v20 = vmov 6   ;;  %v2360_v25 = vmov 7  }
  0x33   :  { %423 = vmatmul.mubr.bf16.gmra.mrb[8].mxu0 %v2301_v60  ;;  %711 = vperm.xlu0 %2207, %v673_v0   ;;  %v2308_v5 = vld [vmem:[%s3630_s0 + $0x68] ss:$16 sps:$4 sm:$0xff]   ;;  %v2361_v29 = vmov 8   ;;  %v2362_v33 = vmov 9   ;;  %v2363_v39 = vmov 10   ;;  %vm504_vm0 = vcmask 261120  }
  0x34   :  { %488 = vmatmul.mubr.bf16.gmra.mrb[8].mxu1 %v2302_v61  ;;  %430 = vmatprep.mubr.bf16.mxu0 %v2303_v63  ;;  %v2647_v8 = vld [vmem:[%s3634_s4 + $0x28] sm:$0xff]  ;;  %v2654_v9 = vld [vmem:[%s3634_s4 + $0x38] sm:$0xff]  ;;  %s2369_s4 = smov 124   ;;  %s2370_s1 = smov 126   ;;  %vm2002_vm8 = vcmask 15360   ;;  %vm2030_vm10 = vcmask 8192  }
  0x35   :  { %495 = vmatprep.mubr.bf16.mxu1 %v2305_v1  ;;  %s2371_s6 = smov 120   ;;  %s2372_s7 = smov 122  }
  0x36   :  { %776 = vperm.xlu1 %2208, %v2607_v62   ;;  %s2373_s8 = smov 116   ;;  %s2374_s9 = smov 118  }
  0x37   :  { %761 = vperm.xlu0 %2207, %v2627_v3   ;;  %s2375_s10 = smov 112   ;;  %s2376_s11 = smov 114  }
  0x38   :  { %s2377_s12 = smov 108   ;;  %s2378_s13 = smov 110  }
  0x39   :  { %s2379_s14 = smov 102   ;;  %s2380_s15 = smov 106  }
  0x3a   :  { %786 = vperm.xlu1 %2208, %v2622_v2   ;;  %s2381_s16 = smov 100   ;;  %s2382_s17 = smov 104  }
  0x3b   :  { %431 = vmatmul.mubr.bf16.gmra.mrb[12].mxu0 %v2307_v4  ;;  %771 = vperm.xlu0 %2207, %v2640_v6   ;;  %s2383_s18 = smov 98   ;;  %s2384_s2 = smov [#allocation2]  }
  0x3c   :  { %496 = vmatmul.mubr.bf16.gmra.mrb[12].mxu1 %v2308_v5  ;;  %v3636_v5 = vmov 11   ;;  %s2038_s19 = sshll.u32 %s2384_s2, 4  ;;  %s2039_s19 = int_to_ptr.vmem [resolvable:$true] %s2038_s19 }
  0x3d   :  { %s2329_s20 = scalar_lea.vmem %s2039_s19, 16  ;;  %s2333_s21 = scalar_lea.vmem %s2039_s19, 32 }
  0x3e   :  { %2209 = vset.pattern.permute.xlu1 %v2354_v7  ;;  %p2330_p0 = scmp.ne.s32.totalorder %s2039_s19, %s2329_s20  ;;  %p2334_p1 = scmp.lt.s32.totalorder %s2039_s19, %s2039_s19 }
  0x3f   :  { %803 = vperm.xlu1 %2209, %v2574_v53   ;;  %781 = vperm.xlu0 %2207, %v2647_v8   ;;  %p2335_p2 = scmp.lt.s32.totalorder %s2333_s21, %s2329_s20 }
  0x41   :  { %p2336_p3 = por %p2335_p2, %p2334_p1 }
  0x43   :  { %811 = vperm.xlu1 %2209, %v2592_v58   ;;  %791 = vperm.xlu0 %2207, %v2654_v9   ;;  %p2337_p4 = pnand %p2336_p3, %p2330_p0 }
  0x47   :  { %815 = vperm.xlu1 %2209, %v2640_v6   ;;  %2210 = vset.pattern.permute.xlu0 %v2354_v7 }
  0x48   :  { %807 = vperm.xlu0 %2210, %v2627_v3  }
  0x4b   :  { %823 = vperm.xlu1 %2209, %v2647_v8  }
  0x4c   :  { %819 = vperm.xlu0 %2210, %v2607_v62  }
  0x4f   :  { %831 = vperm.xlu1 %2209, %v2654_v9  }
  0x50   :  { %827 = vperm.xlu0 %2210, %v2622_v2  }
  0x53   :  { %2212 = vset.pattern.permute.xlu1 %v2355_v10 }
  0x54   :  { %887 = vperm.xlu1 %2212, %v2627_v3   ;;  %2211 = vset.pattern.permute.xlu0 %v2355_v10 }
  0x55   :  { %883 = vperm.xlu0 %2211, %v2574_v53  }
  0x58   :  { %891 = vperm.xlu1 %2212, %v2592_v58  }
  0x59   :  { %895 = vperm.xlu0 %2211, %v2640_v6  }
  0x5c   :  { %899 = vperm.xlu1 %2212, %v2607_v62  }
  0x5d   :  { %903 = vperm.xlu0 %2211, %v2647_v8  }
  0x60   :  { %907 = vperm.xlu1 %2212, %v2622_v2  }
  0x61   :  { %911 = vperm.xlu0 %2211, %v2654_v9  }
  0x64   :  { %2213 = vset.pattern.permute.xlu1 %v2356_v11 }
  0x65   :  { %963 = vperm.xlu1 %2213, %v2574_v53   ;;  %2214 = vset.pattern.permute.xlu0 %v2356_v11 }
  0x66   :  { %967 = vperm.xlu0 %2214, %v2627_v3  }
  0x69   :  { %971 = vperm.xlu1 %2213, %v2592_v58  }
  0x6a   :  { %979 = vperm.xlu0 %2214, %v2607_v62  }
  0x6d   :  { %975 = vperm.xlu1 %2213, %v2640_v6  }
  0x6e   :  { %987 = vperm.xlu0 %2214, %v2622_v2  }
  0x71   :  { %983 = vperm.xlu1 %2213, %v2647_v8  }
  0x72   :  { %2215 = vset.pattern.permute.xlu0 %v2357_v12 }
  0x73   :  { %1043 = vperm.xlu0 %2215, %v2574_v53  }
  0x75   :  { %991 = vperm.xlu1 %2213, %v2654_v9  }
  0x77   :  { %1055 = vperm.xlu0 %2215, %v2640_v6  }
  0x79   :  { %2216 = vset.pattern.permute.xlu1 %v2357_v12 }
  0x7a   :  { %1047 = vperm.xlu1 %2216, %v2627_v3  }
  0x7b   :  { %1063 = vperm.xlu0 %2215, %v2647_v8  }
  0x7e   :  { %1051 = vperm.xlu1 %2216, %v2592_v58  }
  0x7f   :  { %1071 = vperm.xlu0 %2215, %v2654_v9  }
  0x81   :  { %v2683_v13 = vpop.permute.xlu1 %625 }
  0x82   :  { %1059 = vperm.xlu1 %2216, %v2607_v62  }
  0x83   :  { %2218 = vset.pattern.permute.xlu0 %v2358_v16 }
  0x84   :  { %1127 = vperm.xlu0 %2218, %v2627_v3  }
  0x85   :  { %v2687_v14 = vpop.permute.xlu1 %630 }
  0x86   :  { %1067 = vperm.xlu1 %2216, %v2622_v2  }
  0x88   :  { %1139 = vperm.xlu0 %2218, %v2607_v62  }
  0x89   :  { %v2691_v15 = vpop.permute.xlu1 %635 }
  0x8a   :  { %3647 = vst [vmem:[#allocation5_spill] sm:$0xff] %v2691_v15  ;;  %2217 = vset.pattern.permute.xlu1 %v2358_v16 }
  0x8b   :  { %1123 = vperm.xlu1 %2217, %v2574_v53  }
  0x8c   :  { %1147 = vperm.xlu0 %2218, %v2622_v2  }
  0x8d   :  { %v2695_v17 = vpop.permute.xlu1 %640 }
  0x8e   :  { %3648 = vst [vmem:[#allocation6_spill] sm:$0xff] %v2695_v17  ;;  %v2751_v35 = vpop.permute.xlu0 %620 }
  0x8f   :  { %1131 = vperm.xlu1 %2217, %v2592_v58  }
  0x90   :  { %2219 = vset.pattern.permute.xlu0 %v2359_v20 }
  0x91   :  { %v2699_v18 = vpop.permute.xlu1 %645  ;;  %1203 = vperm.xlu0 %2219, %v2574_v53  }
  0x92   :  { %3649 = vst [vmem:[#allocation7_spill] sm:$0xff] %v2699_v18 }
  0x93   :  { %1135 = vperm.xlu1 %2217, %v2640_v6   ;;  %v2758_v37 = vpop.permute.xlu0 %681 }
  0x95   :  { %v2703_v19 = vpop.permute.xlu1 %650  ;;  %1215 = vperm.xlu0 %2219, %v2640_v6  }
  0x96   :  { %3650 = vst [vmem:[#allocation8_spill] sm:$0xff] %v2703_v19 }
  0x97   :  { %1143 = vperm.xlu1 %2217, %v2647_v8   ;;  %v2765_v40 = vpop.permute.xlu0 %691 }
  0x98   :  { %3660 = vst [vmem:[#allocation18_spill] sm:$0xff] %v2765_v40 }
  0x99   :  { %v2707_v21 = vpop.permute.xlu1 %655  ;;  %1223 = vperm.xlu0 %2219, %v2647_v8  }
  0x9a   :  { %3651 = vst [vmem:[#allocation9_spill] sm:$0xff] %v2707_v21 }
  0x9b   :  { %1151 = vperm.xlu1 %2217, %v2654_v9  }
  0x9d   :  { %v2711_v22 = vpop.permute.xlu1 %676  ;;  %1231 = vperm.xlu0 %2219, %v2654_v9  }
  0x9f   :  { %2220 = vset.pattern.permute.xlu1 %v2359_v20 }
  0xa0   :  { %1207 = vperm.xlu1 %2220, %v2627_v3  }
  0xa1   :  { %v2715_v23 = vpop.permute.xlu1 %686  ;;  %2222 = vset.pattern.permute.xlu0 %v2360_v25 }
  0xa2   :  { %1287 = vperm.xlu0 %2222, %v2627_v3  }
  0xa4   :  { %1211 = vperm.xlu1 %2220, %v2592_v58  }
  0xa5   :  { %v2719_v24 = vpop.permute.xlu1 %696 }
  0xa6   :  { %3652 = vst [vmem:[#allocation10_spill] sm:$0xff] %v2719_v24  ;;  %1299 = vperm.xlu0 %2222, %v2607_v62  }
  0xa8   :  { %1219 = vperm.xlu1 %2220, %v2607_v62  }
  0xa9   :  { %v2723_v26 = vpop.permute.xlu1 %706 }
  0xaa   :  { %3653 = vst [vmem:[#allocation11_spill] sm:$0xff] %v2723_v26  ;;  %1307 = vperm.xlu0 %2222, %v2622_v2  }
  0xac   :  { %1227 = vperm.xlu1 %2220, %v2622_v2  }
  0xad   :  { %v2727_v27 = vpop.permute.xlu1 %756 }
  0xae   :  { %3654 = vst [vmem:[#allocation12_spill] sm:$0xff] %v2727_v27  ;;  %2223 = vset.pattern.permute.xlu0 %v2361_v29  ;;  %v2771_v42 = vpop.permute.xlu0 %701 }
  0xaf   :  { %1363 = vperm.xlu0 %2223, %v2574_v53   ;;  %3662 = vst [vmem:[#allocation20_spill] sm:$0xff] %v2771_v42 }
  0xb0   :  { %2221 = vset.pattern.permute.xlu1 %v2360_v25 }
  0xb1   :  { %1283 = vperm.xlu1 %2221, %v2574_v53   ;;  %v2731_v28 = vpop.permute.xlu1 %766 }
  0xb2   :  { %3655 = vst [vmem:[#allocation13_spill] sm:$0xff] %v2731_v28  ;;  %v2777_v44 = vpop.permute.xlu0 %711 }
  0xb3   :  { %1375 = vperm.xlu0 %2223, %v2640_v6   ;;  %3663 = vst [vmem:[#allocation21_spill] sm:$0xff] %v2777_v44 }
  0xb5   :  { %1291 = vperm.xlu1 %2221, %v2592_v58   ;;  %v2735_v30 = vpop.permute.xlu1 %776 }
  0xb6   :  { %3656 = vst [vmem:[#allocation14_spill] sm:$0xff] %v2735_v30  ;;  %v2782_v46 = vpop.permute.xlu0 %761 }
  0xb7   :  { %1383 = vperm.xlu0 %2223, %v2647_v8   ;;  %3664 = vst [vmem:[#allocation22_spill] sm:$0xff] %v2782_v46 }
  0xb9   :  { %1295 = vperm.xlu1 %2221, %v2640_v6   ;;  %v2739_v31 = vpop.permute.xlu1 %786 }
  0xba   :  { %3657 = vst [vmem:[#allocation15_spill] sm:$0xff] %v2739_v31  ;;  %v2787_v48 = vpop.permute.xlu0 %771 }
  0xbb   :  { %1391 = vperm.xlu0 %2223, %v2654_v9   ;;  %3666 = vst [vmem:[#allocation24_spill] sm:$0xff] %v2787_v48 }
  0xbd   :  { %1303 = vperm.xlu1 %2221, %v2647_v8  }
  0xbe   :  { %v2743_v32 = vpop.permute.xlu1 %803  ;;  %v2793_v50 = vpop.permute.xlu0 %781 }
  0xbf   :  { %2226 = vset.pattern.permute.xlu0 %v2362_v33  ;;  %3668 = vst [vmem:[#allocation26_spill] sm:$0xff] %v2793_v50 }
  0xc0   :  { %1447 = vperm.xlu0 %2226, %v2627_v3  }
  0xc1   :  { %1311 = vperm.xlu1 %2221, %v2654_v9  }
  0xc2   :  { %v2747_v34 = vpop.permute.xlu1 %811  ;;  %v2798_v52 = vpop.permute.xlu0 %791 }
  0xc3   :  { %3669 = vst [vmem:[#allocation27_spill] sm:$0xff] %v2798_v52 }
  0xc4   :  { %1459 = vperm.xlu0 %2226, %v2607_v62  }
  0xc5   :  { %2224 = vset.pattern.permute.xlu1 %v2361_v29 }
  0xc6   :  { %1367 = vperm.xlu1 %2224, %v2627_v3   ;;  %v2754_v36 = vpop.permute.xlu1 %815 }
  0xc7   :  { %3658 = vst [vmem:[#allocation16_spill] sm:$0xff] %v2754_v36  ;;  %v2811_v20 = vpop.permute.xlu0 %807 }
  0xc8   :  { %1467 = vperm.xlu0 %2226, %v2622_v2  }
  0xca   :  { %1371 = vperm.xlu1 %2224, %v2592_v58   ;;  %v2761_v38 = vpop.permute.xlu1 %823 }
  0xcb   :  { %3659 = vst [vmem:[#allocation17_spill] sm:$0xff] %v2761_v38  ;;  %v2823_v31 = vpop.permute.xlu0 %819 }
  0xcc   :  { %2227 = vset.pattern.permute.xlu0 %v2363_v39  ;;  %3672 = vst [vmem:[#allocation30_spill] sm:$0xff] %v2823_v31 }
  0xcd   :  { %1523 = vperm.xlu0 %2227, %v2574_v53  }
  0xce   :  { %1379 = vperm.xlu1 %2224, %v2607_v62   ;;  %v2768_v41 = vpop.permute.xlu1 %831 }
  0xcf   :  { %3661 = vst [vmem:[#allocation19_spill] sm:$0xff] %v2768_v41 }
  0xd1   :  { %1535 = vperm.xlu0 %2227, %v2640_v6  }
  0xd2   :  { %1387 = vperm.xlu1 %2224, %v2622_v2  }
  0xd3   :  { %v2774_v43 = vpop.permute.xlu1 %887 }
  0xd6   :  { %2225 = vset.pattern.permute.xlu1 %v2362_v33 }
  0xd7   :  { %1443 = vperm.xlu1 %2225, %v2574_v53   ;;  %v2779_v45 = vpop.permute.xlu1 %891 }
  0xdb   :  { %1451 = vperm.xlu1 %2225, %v2592_v58   ;;  %v2785_v47 = vpop.permute.xlu1 %899 }
  0xdc   :  { %3665 = vst [vmem:[#allocation23_spill] sm:$0xff] %v2785_v47  ;;  %v3639_v47 = vmov 13  }
  0xdf   :  { %1455 = vperm.xlu1 %2225, %v2640_v6   ;;  %v2790_v49 = vpop.permute.xlu1 %907 }
  0xe0   :  { %3667 = vst [vmem:[#allocation25_spill] sm:$0xff] %v2790_v49 }
  0xe3   :  { %1463 = vperm.xlu1 %2225, %v2647_v8  }
  0xe4   :  { %v2795_v51 = vpop.permute.xlu1 %963 }
  0xe7   :  { %1471 = vperm.xlu1 %2225, %v2654_v9  }
  0xe8   :  { %v2801_v57 = vpop.permute.xlu1 %971 }
  0xeb   :  { %2228 = vset.pattern.permute.xlu1 %v2363_v39 }
  0xec   :  { %1527 = vperm.xlu1 %2228, %v2627_v3  }
  0xf0   :  { %1531 = vperm.xlu1 %2228, %v2592_v58  }
  0xf4   :  { %1539 = vperm.xlu1 %2228, %v2607_v62  }
  0xf6   :  { %v2111_v54 = vpop.f32.mrb[0].mxu0 }
  0xf7   :  { %v2151_v55 = vpop.f32.mrb[0].mxu1  ;;  %v2112_v56 = vpop.f32.mrb[1].mxu0 }
  0xf8   :  { %1547 = vperm.xlu1 %2228, %v2622_v2   ;;  %v2113_v59 = vadd.f32 %v2112_v56, %v2111_v54  ;;  %v2152_v60 = vpop.f32.mrb[1].mxu1  ;;  %v2114_v63 = vpop.f32.mrb[2].mxu0 }
  0xf9   :  { %v2153_v61 = vadd.f32 %v2152_v60, %v2151_v55  ;;  %v2154_v0 = vpop.f32.mrb[2].mxu1  ;;  %v2115_v1 = vpop.f32.mrb[3].mxu0 }
  0xfa   :  { %v2155_v4 = vpop.f32.mrb[3].mxu1  ;;  %v2116_v7 = vadd.f32 %v2115_v1, %v2114_v63  ;;  %v2815_v54 = vpop.permute.xlu1 %975 }
  0xfb   :  { %v2156_v10 = vadd.f32 %v2155_v4, %v2154_v0  ;;  %v2805_v11 = vadd.f32 %v2153_v61, %v2113_v59  ;;  %3670 = vst [vmem:[#allocation28_spill] sm:$0xff] %v2815_v54  ;;  %v3718_v54 = vmov 15  }
  0xfc   :  { %2229 = vset.pattern.permute.xlu1 %v3636_v5 }
  0xfd   :  { %1603 = vperm.xlu1 %2229, %v2574_v53   ;;  %v505_v12 = vsel %vm504_vm0, %v2805_v11, 0.0  ;;  %v2809_v16 = vadd.f32 %v2156_v10, %v2116_v7 }
  0xfe   :  { %506 = vadd.xlane.f32.xlu0 %v505_v12  ;;  %v2117_v25 = vpop.f32.mrb[4].mxu0  ;;  %v2821_v5 = vpop.permute.xlu1 %983 }
  0xff   :  { %v508_v29 = vsel %vm504_vm0, %v2809_v16, 0.0  ;;  %v2157_v33 = vpop.f32.mrb[4].mxu1  ;;  %v2118_v39 = vpop.f32.mrb[5].mxu0  ;;  %3671 = vst [vmem:[#allocation29_spill] sm:$0xff] %v2821_v5 }
 0x100   :  { %v2119_v55 = vadd.f32 %v2118_v39, %v2117_v25  ;;  %v2158_v56 = vpop.f32.mrb[5].mxu1  ;;  %v2120_v60 = vpop.f32.mrb[6].mxu0 }
 0x101   :  { %v2159_v59 = vadd.f32 %v2158_v56, %v2157_v33  ;;  %v2160_v61 = vpop.f32.mrb[6].mxu1  ;;  %v2121_v63 = vpop.f32.mrb[7].mxu0 }
 0x102   :  { %509 = vadd.xlane.f32.xlu0 %v508_v29  ;;  %v2161_v0 = vpop.f32.mrb[7].mxu1  ;;  %v2122_v4 = vadd.f32 %v2121_v63, %v2120_v60 }
 0x103   :  { %v2817_v1 = vadd.f32 %v2159_v59, %v2119_v55  ;;  %v2162_v7 = vadd.f32 %v2161_v0, %v2160_v61  ;;  %v2827_v61 = vpop.permute.xlu1 %991 }
 0x104   :  { %3673 = vst [vmem:[#allocation31_spill] sm:$0xff] %v2827_v61 }
 0x105   :  { %v2819_v10 = vadd.f32 %v2162_v7, %v2122_v4  ;;  %v2831_v4 = vpop.permute.xlu0 %827 }
 0x106   :  { %v2123_v12 = vpop.f32.mrb[8].mxu0  ;;  %3674 = vst [vmem:[#allocation32_spill] sm:$0xff] %v2831_v4 }
 0x107   :  { %v2163_v52 = vpop.f32.mrb[8].mxu1  ;;  %v2124_v25 = vpop.f32.mrb[9].mxu0 }
 0x108   :  { %v2125_v39 = vadd.f32 %v2124_v25, %v2123_v12  ;;  %v2164_v33 = vpop.f32.mrb[9].mxu1  ;;  %v2126_v56 = vpop.f32.mrb[10].mxu0 }
 0x109   :  { %v2165_v50 = vadd.f32 %v2164_v33, %v2163_v52  ;;  %v2166_v29 = vpop.f32.mrb[10].mxu1  ;;  %v2127_v30 = vpop.f32.mrb[11].mxu0 }
 0x10a   :  { %v2128_v48 = vadd.f32 %v2127_v30, %v2126_v56  ;;  %v2167_v55 = vpop.f32.mrb[11].mxu1  ;;  %v2833_v30 = vpop.permute.xlu1 %1047 }
 0x10b   :  { %v2825_v59 = vadd.f32 %v2165_v50, %v2125_v39  ;;  %v2168_v60 = vadd.f32 %v2167_v55, %v2166_v29 }
 0x10d   :  { %v2829_v63 = vadd.f32 %v2168_v60, %v2128_v48  ;;  %v2837_v48 = vpop.permute.xlu0 %883 }
 0x10e   :  { %v2129_v0 = vpop.f32.mrb[12].mxu0  ;;  %v2842_v60 = vpop.permute.xlu1 %1051 }
 0x10f   :  { %v2169_v7 = vpop.f32.mrb[12].mxu1  ;;  %v2130_v41 = vpop.f32.mrb[13].mxu0 }
 0x110   :  { %v2131_v12 = vadd.f32 %v2130_v41, %v2129_v0  ;;  %v2170_v25 = vpop.f32.mrb[13].mxu1  ;;  %v2132_v44 = vpop.f32.mrb[14].mxu0  ;;  %v511_v0 = vsel %vm504_vm0, %v2817_v1, 0.0 }
 0x111   :  { %v2171_v52 = vadd.f32 %v2170_v25, %v2169_v7  ;;  %v2172_v33 = vpop.f32.mrb[14].mxu1  ;;  %v2133_v21 = vpop.f32.mrb[15].mxu0 }
 0x112   :  { %v2134_v50 = vadd.f32 %v2133_v21, %v2132_v44  ;;  %v2173_v39 = vpop.f32.mrb[15].mxu1  ;;  %v2844_v41 = vpop.permute.xlu0 %895  ;;  %v3677_v44 = vmov 11  }
 0x113   :  { %v2835_v56 = vadd.f32 %v2171_v52, %v2131_v12  ;;  %v2174_v29 = vadd.f32 %v2173_v39, %v2172_v33  ;;  %3675 = vst [vmem:[#allocation33_spill] sm:$0xff] %v2844_v41  ;;  %v2849_v21 = vpop.permute.xlu1 %1059  ;;  %v514_v12 = vsel %vm504_vm0, %v2819_v10, 0.0 }
 0x114   :  { %3676 = vst [vmem:[#allocation34_spill] sm:$0xff] %v2849_v21 }
 0x115   :  { %v2839_v55 = vadd.f32 %v2174_v29, %v2134_v50 }
 0x116   :  { %v2852_v7 = vpop.permute.xlu0 %903 }
 0x117   :  { %3678 = vst [vmem:[#allocation35_spill] sm:$0xff] %v2852_v7  ;;  %v2856_v25 = vpop.permute.xlu1 %1067 }
 0x118   :  { %1543 = vperm.xlu0 %2227, %v2647_v8   ;;  %3679 = vst [vmem:[#allocation36_spill] sm:$0xff] %v2856_v25 }
 0x11a   :  { %v2858_v52 = vpop.permute.xlu0 %911 }
 0x11b   :  { %3680 = vst [vmem:[#allocation37_spill] sm:$0xff] %v2858_v52  ;;  %v2860_v33 = vpop.permute.xlu1 %1123 }
 0x11c   :  { %1551 = vperm.xlu0 %2227, %v2654_v9  }
 0x11e   :  { %v2862_v50 = vpop.permute.xlu0 %967 }
 0x11f   :  { %v2864_v39 = vpop.permute.xlu1 %1131 }
 0x120   :  { %2230 = vset.pattern.permute.xlu0 %v3677_v44 }
 0x121   :  { %512 = vadd.xlane.f32.xlu1 %v511_v0 }
 0x122   :  { %v2866_v29 = vpop.permute.xlu0 %979 }
 0x123   :  { %3681 = vst [vmem:[#allocation38_spill] sm:$0xff] %v2866_v29  ;;  %v2869_v0 = vpop.permute.xlu1 %1135 }
 0x124   :  { %3682 = vst [vmem:[#allocation39_spill] sm:$0xff] %v2869_v0 }
 0x125   :  { %515 = vadd.xlane.f32.xlu1 %v514_v12  ;;  %v517_v12 = vsel %vm504_vm0, %v2825_v59, 0.0 }
 0x126   :  { %v2871_v44 = vpop.permute.xlu0 %987 }
 0x127   :  { %3683 = vst [vmem:[#allocation40_spill] sm:$0xff] %v2871_v44  ;;  %v2875_v61 = vpop.permute.xlu1 %1143 }
 0x128   :  { %3684 = vst [vmem:[#allocation41_spill] sm:$0xff] %v2875_v61  ;;  %v520_v61 = vsel %vm504_vm0, %v2829_v63, 0.0 }
 0x12a   :  { %v2877_v52 = vpop.permute.xlu0 %1043 }
 0x12b   :  { %v2879_v25 = vpop.permute.xlu1 %1151 }
 0x12c   :  { %3685 = vst [vmem:[#allocation42_spill] sm:$0xff] %v2879_v25 }
 0x12e   :  { %v2881_v28 = vpop.permute.xlu0 %1055 }
 0x12f   :  { %3686 = vst [vmem:[#allocation43_spill] sm:$0xff] %v2881_v28  ;;  %v2883_v49 = vpop.permute.xlu1 %1207 }
 0x132   :  { %v2885_v4 = vpop.permute.xlu0 %1063 }
 0x133   :  { %3687 = vst [vmem:[#allocation44_spill] sm:$0xff] %v2885_v4  ;;  %v2887_v26 = vpop.permute.xlu1 %1211 }
 0x136   :  { %1611 = vperm.xlu1 %2229, %v2592_v58   ;;  %v2889_v19 = vpop.permute.xlu0 %1071 }
 0x137   :  { %3688 = vst [vmem:[#allocation45_spill] sm:$0xff] %v2889_v19 }
 0x13a   :  { %v2892_v44 = vpop.permute.xlu0 %1127 }
 0x13b   :  { %518 = vadd.xlane.f32.xlu0 %v517_v12  ;;  %v2894_v12 = vpop.permute.xlu1 %1219 }
 0x13c   :  { %3689 = vst [vmem:[#allocation46_spill] sm:$0xff] %v2894_v12 }
 0x13e   :  { %v2898_v25 = vpop.permute.xlu0 %1139 }
 0x13f   :  { %3690 = vst [vmem:[#allocation47_spill] sm:$0xff] %v2898_v25  ;;  %v2900_v5 = vpop.permute.xlu1 %1227 }
 0x140   :  { %3691 = vst [vmem:[#allocation48_spill] sm:$0xff] %v2900_v5 }
 0x142   :  { %v2902_v38 = vpop.permute.xlu0 %1147 }
 0x143   :  { %3692 = vst [vmem:[#allocation49_spill] sm:$0xff] %v2902_v38  ;;  %v2904_v4 = vpop.permute.xlu1 %1283 }
 0x146   :  { %v2906_v46 = vpop.permute.xlu0 %1203 }
 0x147   :  { %v2908_v19 = vpop.permute.xlu1 %1291 }
 0x14a   :  { %v2911_v7 = vpop.permute.xlu0 %1215 }
 0x14b   :  { %3693 = vst [vmem:[#allocation50_spill] sm:$0xff] %v2911_v7  ;;  %v2913_v42 = vpop.permute.xlu1 %1295 }
 0x14c   :  { %3694 = vst [vmem:[#allocation51_spill] sm:$0xff] %v2913_v42  ;;  %v3641_v42 = vmov 15  }
 0x14e   :  { %v2917_v18 = vpop.permute.xlu0 %1223 }
 0x14f   :  { %3695 = vst [vmem:[#allocation52_spill] sm:$0xff] %v2917_v18  ;;  %v2919_v5 = vpop.permute.xlu1 %1303 }
 0x150   :  { %3696 = vst [vmem:[#allocation53_spill] sm:$0xff] %v2919_v5  ;;  %v3637_v5 = vmov 14  }
 0x151   :  { %1607 = vperm.xlu0 %2230, %v2627_v3  }
 0x152   :  { %v2921_v38 = vpop.permute.xlu0 %1231 }
 0x153   :  { %3697 = vst [vmem:[#allocation54_spill] sm:$0xff] %v2921_v38  ;;  %v2923_v25 = vpop.permute.xlu1 %1311  ;;  %v526_v38 = vsel %vm504_vm0, %v2839_v55, 0.0 }
 0x154   :  { %3698 = vst [vmem:[#allocation55_spill] sm:$0xff] %v2923_v25 }
 0x156   :  { %v2925_v12 = vpop.permute.xlu0 %1287 }
 0x157   :  { %v2927_v29 = vpop.permute.xlu1 %1367 }
 0x15a   :  { %521 = vadd.xlane.f32.xlu1 %v520_v61  ;;  %v523_v61 = vsel %vm504_vm0, %v2835_v56, 0.0  ;;  %v2929_v21 = vpop.permute.xlu0 %1299 }
 0x15b   :  { %3699 = vst [vmem:[#allocation56_spill] sm:$0xff] %v2929_v21  ;;  %v2931_v27 = vpop.permute.xlu1 %1371 }
 0x15e   :  { %v2934_v31 = vpop.permute.xlu0 %1307 }
 0x15f   :  { %3700 = vst [vmem:[#allocation57_spill] sm:$0xff] %v2934_v31 }
 0x162   :  { %v2941_v25 = vpop.permute.xlu0 %1363 }
 0x166   :  { %v2947_v21 = vpop.permute.xlu0 %1375 }
 0x167   :  { %3703 = vst [vmem:[#allocation60_spill] sm:$0xff] %v2947_v21  ;;  %v3712_v21 = vmov 13  }
 0x16b   :  { %1615 = vperm.xlu1 %2229, %v2640_v6  }
 0x170   :  { %524 = vadd.xlane.f32.xlu0 %v523_v61  ;;  %v2937_v61 = vpop.permute.xlu1 %1379 }
 0x171   :  { %3701 = vst [vmem:[#allocation58_spill] sm:$0xff] %v2937_v61  ;;  %v2953_v61 = vpop.permute.xlu0 %1383 }
 0x172   :  { %3704 = vst [vmem:[#allocation61_spill] sm:$0xff] %v2953_v61  ;;  %v2367_v61 = vmov 12  }
 0x174   :  { %v2945_v18 = vpop.permute.xlu1 %1387 }
 0x175   :  { %3702 = vst [vmem:[#allocation59_spill] sm:$0xff] %v2945_v18 }
 0x178   :  { %v2950_v31 = vpop.permute.xlu1 %1443 }
 0x186   :  { %1619 = vperm.xlu0 %2230, %v2607_v62  }
 0x18a   :  { %1627 = vperm.xlu0 %2230, %v2622_v2  }
 0x18e   :  { %2235 = vset.pattern.permute.xlu0 %v3637_v5  ;;  %v2960_v5 = vpop.permute.xlu0 %1391 }
 0x18f   :  { %527 = vadd.xlane.f32.xlu1 %v526_v38  ;;  %1847 = vperm.xlu0 %2235, %v2627_v3   ;;  %v2957_v38 = vpop.permute.xlu1 %1451  ;;  %3706 = vst [vmem:[#allocation63_spill] sm:$0xff] %v2960_v5 }
 0x190   :  { %3705 = vst [vmem:[#allocation62_spill] sm:$0xff] %v2957_v38 }
 0x192   :  { %v2966_v24 = vpop.permute.xlu0 %1447 }
 0x193   :  { %1851 = vperm.xlu0 %2235, %v2592_v58   ;;  %v2964_v18 = vpop.permute.xlu1 %1455 }
 0x194   :  { %3707 = vst [vmem:[#allocation64_spill] sm:$0xff] %v2964_v18 }
 0x196   :  { %v2972_v17 = vpop.permute.xlu0 %1459 }
 0x197   :  { %1855 = vperm.xlu0 %2235, %v2640_v6   ;;  %3709 = vst [vmem:[#allocation66_spill] sm:$0xff] %v2972_v17 }
 0x19a   :  { %v2979_v18 = vpop.permute.xlu0 %1467 }
 0x19b   :  { %2241 = vset.pattern.permute.xlu0 %v3639_v47  ;;  %v2970_v47 = vpop.permute.xlu1 %1463  ;;  %3711 = vst [vmem:[#allocation68_spill] sm:$0xff] %v2979_v18 }
 0x19c   :  { %1763 = vperm.xlu0 %2241, %v2574_v53   ;;  %3708 = vst [vmem:[#allocation65_spill] sm:$0xff] %v2970_v47 }
 0x19e   :  { %v2987_v17 = vpop.permute.xlu0 %1523 }
 0x19f   :  { %v2977_v5 = vpop.permute.xlu1 %1471 }
 0x1a0   :  { %1623 = vperm.xlu1 %2229, %v2647_v8   ;;  %1771 = vperm.xlu0 %2241, %v2592_v58   ;;  %3710 = vst [vmem:[#allocation67_spill] sm:$0xff] %v2977_v5  ;;  %v3713_v5 = vmov 14  }
 0x1a3   :  { %v2985_v47 = vpop.permute.xlu1 %1527 }
 0x1a4   :  { %1631 = vperm.xlu1 %2229, %v2654_v9   ;;  %1783 = vperm.xlu0 %2241, %v2647_v8  }
 0x1a7   :  { %v2994_v18 = vpop.permute.xlu1 %1531 }
 0x1a8   :  { %2231 = vset.pattern.permute.xlu1 %v2367_v61  ;;  %2244 = vset.pattern.permute.xlu0 %v2367_v61  ;;  %3714 = vst [vmem:[#allocation69_spill] sm:$0xff] %v2994_v18 }
 0x1a9   :  { %1687 = vperm.xlu1 %2231, %v2627_v3   ;;  %1683 = vperm.xlu0 %2244, %v2574_v53  }
 0x1ad   :  { %1691 = vperm.xlu1 %2231, %v2592_v58   ;;  %1711 = vperm.xlu0 %2244, %v2654_v9  }
 0x1b1   :  { %2232 = vset.pattern.permute.xlu1 %v3712_v21  ;;  %2247 = vset.pattern.permute.xlu0 %v3641_v42  ;;  %v2996_v42 = vpop.permute.xlu0 %1535 }
 0x1b2   :  { %1767 = vperm.xlu1 %2232, %v2627_v3   ;;  %1927 = vperm.xlu0 %2247, %v2627_v3   ;;  %3715 = vst [vmem:[#allocation70_spill] sm:$0xff] %v2996_v42  ;;  %v3000_v3 = vpop.permute.xlu1 %1539 }
 0x1b3   :  { %3716 = vst [vmem:[#allocation71_spill] sm:$0xff] %v3000_v3 }
 0x1b5   :  { %v507_v7 = vpop.xlane.xlu0 %506 }
 0x1b6   :  { %2233 = vset.pattern.permute.xlu1 %v2367_v61  ;;  %1939 = vperm.xlu0 %2247, %v2607_v62   ;;  %v3004_v0 = vpop.permute.xlu1 %1547  ;;  %v530_v3 = vmul.f32 0.03125, %v507_v7 }
 0x1b7   :  { %1695 = vperm.xlu1 %2233, %v2640_v6   ;;  %3717 = vst [vmem:[#allocation72_spill] sm:$0xff] %v3004_v0 }
 0x1b8   :  { %v3018_v0 = vsub.f32 %v2805_v11, %v530_v3 }
 0x1b9   :  { %v510_v28 = vpop.xlane.xlu0 %509 }
 0x1ba   :  { %1943 = vperm.xlu0 %2247, %v2647_v8   ;;  %v3010_v41 = vpop.permute.xlu1 %1603  ;;  %v546_v7 = vmul.f32 %v3018_v0, %v3018_v0 }
 0x1bb   :  { %2234 = vset.pattern.permute.xlu1 %v3713_v5 }
 0x1bc   :  { %1843 = vperm.xlu1 %2234, %v2574_v53   ;;  %v554_v38 = vsel %vm504_vm0, %v546_v7, 0.0 }
 0x1bd   :  { %v3008_v42 = vpop.permute.xlu0 %1543 }
 0x1be   :  { %1947 = vperm.xlu0 %2247, %v2622_v2   ;;  %3719 = vst [vmem:[#allocation73_spill] sm:$0xff] %v3008_v42  ;;  %v513_v40 = vpop.xlane.xlu1 %512 }
 0x1bf   :  { %v532_v18 = vmul.f32 0.03125, %v513_v40 }
 0x1c0   :  { %2236 = vset.pattern.permute.xlu1 %v2367_v61 }
 0x1c1   :  { %1699 = vperm.xlu1 %2236, %v2607_v62   ;;  %v3013_v36 = vpop.permute.xlu0 %1551  ;;  %v3022_v42 = vsub.f32 %v2817_v1, %v532_v18 }
 0x1c2   :  { %3720 = vst [vmem:[#allocation74_spill] sm:$0xff] %v3013_v36 }
 0x1c3   :  { %v548_v40 = vmul.f32 %v3022_v42, %v3022_v42 }
 0x1c5   :  { %2237 = vset.pattern.permute.xlu1 %v3712_v21  ;;  %v560_v18 = vsel %vm504_vm0, %v548_v40, 0.0 }
 0x1c6   :  { %1775 = vperm.xlu1 %2237, %v2640_v6  }
 0x1ca   :  { %2238 = vset.pattern.permute.xlu1 %v3718_v54 }
 0x1cb   :  { %1923 = vperm.xlu1 %2238, %v2574_v53   ;;  %v519_v53 = vpop.xlane.xlu0 %518 }
 0x1cc   :  { %v534_v15 = vmul.f32 0.03125, %v519_v53 }
 0x1ce   :  { %v3028_v36 = vsub.f32 %v2825_v59, %v534_v15 }
 0x1cf   :  { %2239 = vset.pattern.permute.xlu1 %v2367_v61 }
 0x1d0   :  { %1703 = vperm.xlu1 %2239, %v2647_v8   ;;  %3721 = vst [vmem:[#allocation75_spill] sm:$0xff] %v3028_v36 }
 0x1d4   :  { %2240 = vset.pattern.permute.xlu1 %v3712_v21 }
 0x1d5   :  { %1779 = vperm.xlu1 %2240, %v2607_v62  }
 0x1d9   :  { %2242 = vset.pattern.permute.xlu1 %v3718_v54 }
 0x1da   :  { %1931 = vperm.xlu1 %2242, %v2592_v58   ;;  %v550_v58 = vmul.f32 %v3028_v36, %v3028_v36 }
 0x1dc   :  { %v566_v15 = vsel %vm504_vm0, %v550_v58, 0.0 }
 0x1dd   :  { %555 = vadd.xlane.f32.xlu0 %v554_v38  ;;  %v531_v38 = vmul.f32 0.03125, %v510_v28 }
 0x1de   :  { %2243 = vset.pattern.permute.xlu1 %v2367_v61 }
 0x1df   :  { %1707 = vperm.xlu1 %2243, %v2622_v2  }
 0x1e1   :  { %561 = vadd.xlane.f32.xlu0 %v560_v18 }
 0x1e3   :  { %2245 = vset.pattern.permute.xlu1 %v3713_v5 }
 0x1e4   :  { %1859 = vperm.xlu1 %2245, %v2607_v62   ;;  %v3048_v62 = vpop.permute.xlu0 %1607 }
 0x1e5   :  { %567 = vadd.xlane.f32.xlu0 %v566_v15 }
 0x1e8   :  { %2246 = vset.pattern.permute.xlu1 %v3718_v54 }
 0x1e9   :  { %1935 = vperm.xlu1 %2246, %v2640_v6  }
 0x1ed   :  { %2248 = vset.pattern.permute.xlu1 %v3712_v21 }
 0x1ee   :  { %1787 = vperm.xlu1 %2248, %v2622_v2  }
 0x1f2   :  { %2249 = vset.pattern.permute.xlu1 %v3713_v5 }
 0x1f3   :  { %1863 = vperm.xlu1 %2249, %v2647_v8  }
 0x1f7   :  { %2250 = vset.pattern.permute.xlu1 %v3712_v21 }
 0x1f8   :  { %1791 = vperm.xlu1 %2250, %v2654_v9  }
 0x1fc   :  { %2251 = vset.pattern.permute.xlu1 %v3713_v5  ;;  %v516_v5 = vpop.xlane.xlu1 %515 }
 0x1fd   :  { %1867 = vperm.xlu1 %2251, %v2622_v2   ;;  %v525_v11 = vpop.xlane.xlu0 %524  ;;  %v533_v3 = vmul.f32 0.03125, %v516_v5 }
 0x1fe   :  { %v536_v6 = vmul.f32 0.03125, %v525_v11 }
 0x200   :  { %v3054_v1 = vsub.f32 %v2835_v56, %v536_v6  ;;  %v3061_v21 = vpop.permute.xlu1 %1611  ;;  %v3066_v56 = vsub.f32 %v2809_v16, %v531_v38 }
 0x201   :  { %1871 = vperm.xlu1 %2251, %v2654_v9  }
 0x202   :  { %3722 = vst [vmem:[#allocation76_spill] sm:$0xff] %v3054_v1  ;;  %v552_v8 = vmul.f32 %v3054_v1, %v3054_v1  ;;  %v547_v40 = vmul.f32 %v3066_v56, %v3066_v56 }
 0x204   :  { %v572_v59 = vsel %vm504_vm0, %v552_v8, 0.0  ;;  %v522_v2 = vpop.xlane.xlu1 %521  ;;  %v557_v15 = vsel %vm504_vm0, %v547_v40, 0.0 }
 0x205   :  { %2252 = vset.pattern.permute.xlu1 %v3718_v54  ;;  %573 = vadd.xlane.f32.xlu0 %v572_v59  ;;  %v3063_v61 = vpop.permute.xlu0 %1619  ;;  %v3073_v54 = vsub.f32 %v2819_v10, %v533_v3 }
 0x206   :  { %1951 = vperm.xlu1 %2252, %v2654_v9   ;;  %3723 = vst [vmem:[#allocation77_spill] sm:$0xff] %v3063_v61  ;;  %v535_v9 = vmul.f32 0.03125, %v522_v2 }
 0x207   :  { %v549_v11 = vmul.f32 %v3073_v54, %v3073_v54 }
 0x208   :  { %v3068_v53 = vpop.permute.xlu1 %1615  ;;  %v3080_v28 = vsub.f32 %v2829_v63, %v535_v9 }
 0x209   :  { %3724 = vst [vmem:[#allocation78_spill] sm:$0xff] %v3068_v53  ;;  %v3070_v7 = vpop.permute.xlu0 %1627  ;;  %v563_v8 = vsel %vm504_vm0, %v549_v11, 0.0 }
 0x20a   :  { %3725 = vst [vmem:[#allocation79_spill] sm:$0xff] %v3070_v7  ;;  %3726 = vst [vmem:[#allocation80_spill] sm:$0xff] %v3080_v28  ;;  %v551_v59 = vmul.f32 %v3080_v28, %v3080_v28 }
 0x20c   :  { %v569_v63 = vsel %vm504_vm0, %v551_v59, 0.0 }
 0x20e   :  { %v3077_v58 = vpop.permute.xlu0 %1847 }
 0x212   :  { %v3085_v6 = vpop.permute.xlu0 %1851 }
 0x216   :  { %v3096_v2 = vpop.permute.xlu0 %1855 }
 0x217   :  { %3728 = vst [vmem:[#allocation82_spill] sm:$0xff] %v3096_v2 }
 0x21c   :  { %v528_v18 = vpop.xlane.xlu1 %527 }
 0x21d   :  { %v537_v16 = vmul.f32 0.03125, %v528_v18 }
 0x21f   :  { %v3088_v10 = vsub.f32 %v2839_v55, %v537_v16  ;;  %v3101_v55 = vpop.permute.xlu0 %1763 }
 0x220   :  { %v3098_v38 = vpop.permute.xlu1 %1623 }
 0x221   :  { %3727 = vst [vmem:[#allocation81_spill] sm:$0xff] %v3088_v10  ;;  %v553_v5 = vmul.f32 %v3088_v10, %v3088_v10  ;;  %3729 = vst [vmem:[#allocation83_spill] sm:$0xff] %v3098_v38 }
 0x223   :  { %v575_v3 = vsel %vm504_vm0, %v553_v5, 0.0  ;;  %v3105_v40 = vpop.permute.xlu0 %1771 }
 0x224   :  { %v3103_v9 = vpop.permute.xlu1 %1631 }
 0x225   :  { %3730 = vst [vmem:[#allocation84_spill] sm:$0xff] %v3103_v9 }
 0x227   :  { %v3109_v16 = vpop.permute.xlu0 %1783 }
 0x228   :  { %v3107_v18 = vpop.permute.xlu1 %1687  ;;  %3731 = vst [vmem:[#allocation85_spill] sm:$0xff] %v3109_v16 }
 0x22a   :  { %558 = vadd.xlane.f32.xlu1 %v557_v15 }
 0x22b   :  { %v3113_v11 = vpop.permute.xlu0 %1683 }
 0x22c   :  { %v3111_v15 = vpop.permute.xlu1 %1691 }
 0x22e   :  { %564 = vadd.xlane.f32.xlu1 %v563_v8 }
 0x22f   :  { %v3117_v59 = vpop.permute.xlu0 %1711 }
 0x230   :  { %3732 = vst [vmem:[#allocation86_spill] sm:$0xff] %v3117_v59 }
 0x231   :  { %v3115_v8 = vpop.permute.xlu1 %1767 }
 0x232   :  { %570 = vadd.xlane.f32.xlu1 %v569_v63 }
 0x233   :  { %v3121_v5 = vpop.permute.xlu0 %1927 }
 0x236   :  { %576 = vadd.xlane.f32.xlu1 %v575_v3  ;;  %v3119_v63 = vpop.permute.xlu1 %1695 }
 0x237   :  { %3733 = vst [vmem:[#allocation87_spill] sm:$0xff] %v3119_v63  ;;  %v3123_v9 = vpop.permute.xlu0 %1939 }
 0x238   :  { %3734 = vst [vmem:[#allocation88_spill] sm:$0xff] %v3123_v9 }
 0x23b   :  { %v1844_v3 = vpop.permute.xlu1 %1843  ;;  %v3127_v10 = vpop.permute.xlu0 %1943 }
 0x23c   :  { %3736 = vst [vmem:[#allocation90_spill] sm:$0xff] %v3127_v10 }
 0x23f   :  { %v3131_v38 = vpop.permute.xlu0 %1947 }
 0x240   :  { %v3125_v7 = vpop.permute.xlu1 %1699  ;;  %3738 = vst [vmem:[#allocation92_spill] sm:$0xff] %v3131_v38 }
 0x241   :  { %3735 = vst [vmem:[#allocation89_spill] sm:$0xff] %v3125_v7 }
 0x245   :  { %v3129_v16 = vpop.permute.xlu1 %1775 }
 0x246   :  { %3737 = vst [vmem:[#allocation91_spill] sm:$0xff] %v3129_v16 }
 0x24a   :  { %v3133_v1 = vpop.permute.xlu1 %1923 }
 0x24f   :  { %v3135_v2 = vpop.permute.xlu1 %1703 }
 0x254   :  { %v3137_v63 = vpop.permute.xlu1 %1779 }
 0x259   :  { %v3140_v7 = vpop.permute.xlu1 %1931 }
 0x25e   :  { %v3144_v36 = vpop.permute.xlu1 %1707 }
 0x26a   :  { %v556_v61 = vpop.xlane.xlu0 %555 }
 0x26b   :  { %v578_v28 = vmul.f32 0.03125, %v556_v61 }
 0x26d   :  { %v586_v59 = vadd.f32 1e-05, %v578_v28 }
 0x26f   :  { %2309 = vrsqrt.f32 %v586_v59 }
 0x279   :  { %v2310_v53 = vpop.eup %2309 }
 0x27a   :  { %v602_v9 = vmul.f32 %v2310_v53, %v3018_v0 }
 0x27c   :  { %v658_v10 = vmul.f32 %v2751_v35, %v602_v9  ;;  %v3154_v35 = vpop.permute.xlu1 %1859 }
 0x27e   :  { %v714_v16 = vadd.f32 %v2711_v22, %v658_v10 }
 0x280   :  { %vm722_vm1 = vcmp.gt.f32.partialorder %v714_v16, 0.0  ;;  %v730_v38 = vmul.f32 0.2, %v714_v16  ;;  %v3166_v53 = vpop.permute.xlu1 %1935 }
 0x282   :  { %v3146_v61 = vsel %vm722_vm1, %v714_v16, %v730_v38 }
 0x283   :  { %v914_v28 = vmul.f32 %v2837_v48, %v3146_v61  ;;  %v834_v59 = vmul.f32 %v2743_v32, %v3146_v61  ;;  %v1074_v22 = vmul.f32 %v2877_v52, %v3146_v61  ;;  %v994_v0 = vmul.f32 %v2795_v51, %v3146_v61 }
 0x284   :  { %v1234_v32 = vmul.f32 %v2906_v46, %v3146_v61  ;;  %v1154_v48 = vmul.f32 %v2860_v33, %v3146_v61  ;;  %v1394_v51 = vmul.f32 %v2941_v25, %v3146_v61  ;;  %v1314_v52 = vmul.f32 %v2904_v4, %v3146_v61  ;;  %v3176_v46 = vpop.permute.xlu1 %1787 }
 0x285   :  { %930 = vrot.lane.b32.xlu1 %v914_v28, %s2369_s4  ;;  %850 = vrot.lane.b32.xlu0 %v834_v59, %s2370_s1  ;;  %v1554_v33 = vmul.f32 %v2987_v17, %v3146_v61  ;;  %v1474_v10 = vmul.f32 %v2950_v31, %v3146_v61  ;;  %v1794_v4 = vmul.f32 %v3101_v55, %v3146_v61 }
 0x286   :  { %v1634_v25 = vmul.f32 %v3010_v41, %v3146_v61  ;;  %v1874_v17 = vmul.f32 %v1844_v3, %v3146_v61  ;;  %v1714_v31 = vmul.f32 %v3113_v11, %v3146_v61  ;;  %v1954_v55 = vmul.f32 %v3133_v1, %v3146_v61 }
 0x288   :  { %v3188_v38 = vpop.permute.xlu1 %1863 }
 0x289   :  { %1090 = vrot.lane.b32.xlu1 %v1074_v22, %s2371_s6  ;;  %1010 = vrot.lane.b32.xlu0 %v994_v0, %s2372_s7  ;;  %v562_v22 = vpop.xlane.xlu0 %561 }
 0x28a   :  { %v580_v0 = vmul.f32 0.03125, %v562_v22 }
 0x28c   :  { %v3197_v41 = vpop.permute.xlu1 %1791 }
 0x28d   :  { %1250 = vrot.lane.b32.xlu1 %v1234_v32, %s2373_s8  ;;  %1170 = vrot.lane.b32.xlu0 %v1154_v48, %s2374_s9 }
 0x290   :  { %v3202_v9 = vpop.permute.xlu1 %1867 }
 0x291   :  { %1410 = vrot.lane.b32.xlu1 %v1394_v51, %s2375_s10  ;;  %1330 = vrot.lane.b32.xlu0 %v1314_v52, %s2376_s11  ;;  %v588_v51 = vadd.f32 1e-05, %v580_v0 }
 0x294   :  { %v3204_v16 = vpop.permute.xlu1 %1871 }
 0x295   :  { %1570 = vrot.lane.b32.xlu1 %v1554_v33, %s2377_s12  ;;  %1490 = vrot.lane.b32.xlu0 %v1474_v10, %s2378_s13 }
 0x298   :  { %v3206_v3 = vpop.permute.xlu1 %1951 }
 0x299   :  { %1810 = vrot.lane.b32.xlu1 %v1794_v4, %s2379_s14  ;;  %1650 = vrot.lane.b32.xlu0 %v1634_v25, %s2380_s15 }
 0x29d   :  { %1890 = vrot.lane.b32.xlu1 %v1874_v17, %s2381_s16  ;;  %1730 = vrot.lane.b32.xlu0 %v1714_v31, %s2382_s17 }
 0x2a1   :  { %1970 = vrot.lane.b32.xlu0 %v1954_v55, %s2383_s18 }
 0x2b7   :  { %v559_v11 = vpop.xlane.xlu1 %558 }
 0x2b8   :  { %v579_v28 = vmul.f32 0.03125, %v559_v11 }
 0x2ba   :  { %v587_v59 = vadd.f32 1e-05, %v579_v28 }
 0x2bb   :  { %v565_v55 = vpop.xlane.xlu1 %564 }
 0x2bc   :  { %2311 = vrsqrt.f32 %v587_v59 }
 0x2bd   :  { %2313 = vrsqrt.f32 %v588_v51 }
 0x2c6   :  { %v2312_v32 = vpop.eup %2311 }
 0x2c7   :  { %v603_v48 = vmul.f32 %v2312_v32, %v3066_v56  ;;  %v2314_v56 = vpop.eup %2313  ;;  %v568_v32 = vpop.xlane.xlu0 %567 }
 0x2c8   :  { %v604_v17 = vmul.f32 %v2314_v56, %v3022_v42 }
 0x2c9   :  { %v659_v1 = vmul.f32 %v2683_v13, %v603_v48  ;;  %v3740_v48 = vld [vmem:[#allocation5_spill] sm:$0xff] }
 0x2ca   :  { %v660_v31 = vmul.f32 %v2687_v14, %v604_v17 }
 0x2cb   :  { %v715_v52 = vadd.f32 %v2758_v37, %v659_v1 }
 0x2cd   :  { %vm723_vm2 = vcmp.gt.f32.partialorder %v715_v52, 0.0  ;;  %v731_v33 = vmul.f32 0.2, %v715_v52 }
 0x2cf   :  { %v3211_v10 = vsel %vm723_vm2, %v715_v52, %v731_v33  ;;  %v3742_v52 = vld [vmem:[#allocation18_spill] sm:$0xff] }
 0x2d0   :  { %v835_v4 = vmul.f32 %v2811_v20, %v3211_v10  ;;  %v915_v25 = vmul.f32 %v2774_v43, %v3211_v10  ;;  %v995_v13 = vmul.f32 %v2862_v50, %v3211_v10  ;;  %v1075_v37 = vmul.f32 %v2833_v30, %v3211_v10 }
 0x2d1   :  { %v1155_v20 = vmul.f32 %v2892_v44, %v3211_v10  ;;  %v1235_v43 = vmul.f32 %v2883_v49, %v3211_v10  ;;  %v1315_v30 = vmul.f32 %v2925_v12, %v3211_v10  ;;  %v1395_v50 = vmul.f32 %v2927_v29, %v3211_v10 }
 0x2d2   :  { %852 = vrot.lane.b32.xlu1 %v835_v4, %s2370_s1  ;;  %932 = vrot.lane.b32.xlu0 %v915_v25, %s2369_s4  ;;  %v1475_v49 = vmul.f32 %v2966_v24, %v3211_v10  ;;  %v1555_v42 = vmul.f32 %v2985_v47, %v3211_v10  ;;  %v716_v44 = vadd.f32 %v2715_v23, %v660_v31  ;;  %v581_v29 = vmul.f32 0.03125, %v565_v55  ;;  %v574_v31 = vpop.xlane.xlu0 %573  ;;  %v3748_v55 = vld [vmem:[#allocation50_spill] sm:$0xff] }
 0x2d3   :  { %v1635_v14 = vmul.f32 %v3048_v62, %v3211_v10  ;;  %v1795_v12 = vmul.f32 %v3115_v8, %v3211_v10  ;;  %v1715_v23 = vmul.f32 %v3107_v18, %v3211_v10  ;;  %v1875_v47 = vmul.f32 %v3077_v58, %v3211_v10 }
 0x2d4   :  { %v732_v11 = vmul.f32 0.2, %v716_v44  ;;  %vm724_vm3 = vcmp.gt.f32.partialorder %v716_v44, 0.0  ;;  %v589_v24 = vadd.f32 1e-05, %v581_v29  ;;  %v1955_v62 = vmul.f32 %v3121_v5, %v3211_v10 }
 0x2d6   :  { %1012 = vrot.lane.b32.xlu1 %v995_v13, %s2372_s7  ;;  %1092 = vrot.lane.b32.xlu0 %v1075_v37, %s2371_s6  ;;  %v3256_v28 = vsel %vm724_vm3, %v716_v44, %v732_v11  ;;  %2315 = vrsqrt.f32 %v589_v24 }
 0x2d7   :  { %v836_v8 = vmul.f32 %v2747_v34, %v3256_v28  ;;  %v916_v58 = vmul.f32 %v2779_v45, %v3256_v28  ;;  %v996_v18 = vmul.f32 %v2801_v57, %v3256_v28  ;;  %v1076_v5 = vmul.f32 %v2842_v60, %v3256_v28 }
 0x2d8   :  { %v1156_v34 = vmul.f32 %v2864_v39, %v3256_v28  ;;  %v1236_v45 = vmul.f32 %v2887_v26, %v3256_v28  ;;  %v1316_v57 = vmul.f32 %v2908_v19, %v3256_v28  ;;  %v1396_v60 = vmul.f32 %v2931_v27, %v3256_v28  ;;  %v3739_v39 = vld [vmem:[#allocation62_spill] sm:$0xff]  ;;  %v3741_v26 = vld [vmem:[#allocation69_spill] sm:$0xff] }
 0x2d9   :  { %v1476_v0 = vmul.f32 %v3739_v39, %v3256_v28  ;;  %v582_v19 = vmul.f32 0.03125, %v568_v32  ;;  %v1636_v1 = vmul.f32 %v3061_v21, %v3256_v28  ;;  %v1876_v4 = vmul.f32 %v3085_v6, %v3256_v28  ;;  %v3743_v6 = vld [vmem:[#allocation16_spill] sm:$0xff] }
 0x2da   :  { %1172 = vrot.lane.b32.xlu1 %v1155_v20, %s2374_s9  ;;  %1252 = vrot.lane.b32.xlu0 %v1235_v43, %s2373_s8  ;;  %v1716_v25 = vmul.f32 %v3111_v15, %v3256_v28  ;;  %v1956_v21 = vmul.f32 %v3140_v7, %v3256_v28  ;;  %v1796_v37 = vmul.f32 %v3105_v40, %v3256_v28  ;;  %v3744_v20 = vld [vmem:[#allocation33_spill] sm:$0xff]  ;;  %v3745_v7 = vld [vmem:[#allocation28_spill] sm:$0xff]  ;;  %v3746_v40 = vld [vmem:[#allocation43_spill] sm:$0xff] }
 0x2db   :  { %v590_v27 = vadd.f32 1e-05, %v582_v19  ;;  %v3757_v19 = vld [vmem:[#allocation91_spill] sm:$0xff] }
 0x2dd   :  { %2317 = vrsqrt.f32 %v590_v27 }
 0x2de   :  { %1332 = vrot.lane.b32.xlu1 %v1315_v30, %s2376_s11  ;;  %1412 = vrot.lane.b32.xlu0 %v1395_v50, %s2375_s10 }
 0x2e0   :  { %v2316_v59 = vpop.eup %2315 }
 0x2e1   :  { %v605_v22 = vmul.f32 %v2316_v59, %v3073_v54  ;;  %v1556_v54 = vmul.f32 %v3741_v26, %v3256_v28 }
 0x2e2   :  { %1492 = vrot.lane.b32.xlu1 %v1475_v49, %s2378_s13  ;;  %1572 = vrot.lane.b32.xlu0 %v1555_v42, %s2377_s12  ;;  %v571_v49 = vpop.xlane.xlu1 %570  ;;  %v3747_v42 = vld [vmem:[#allocation39_spill] sm:$0xff] }
 0x2e3   :  { %v661_v51 = vmul.f32 %v3740_v48, %v605_v22  ;;  %v583_v24 = vmul.f32 0.03125, %v571_v49  ;;  %v3756_v48 = vld [vmem:[#allocation78_spill] sm:$0xff] }
 0x2e5   :  { %v717_v33 = vadd.f32 %v3742_v52, %v661_v51 }
 0x2e6   :  { %1652 = vrot.lane.b32.xlu1 %v1635_v14, %s2380_s15  ;;  %1812 = vrot.lane.b32.xlu0 %v1795_v12, %s2379_s14  ;;  %v3749_v14 = vld [vmem:[#allocation75_spill] sm:$0xff] }
 0x2e7   :  { %v733_v13 = vmul.f32 0.2, %v717_v33  ;;  %vm725_vm4 = vcmp.gt.f32.partialorder %v717_v33, 0.0  ;;  %v2318_v50 = vpop.eup %2317 }
 0x2e8   :  { %v606_v12 = vmul.f32 %v2318_v50, %v3749_v14  ;;  %v3763_v50 = vld [vmem:[#allocation34_spill] sm:$0xff] }
 0x2e9   :  { %v3309_v56 = vsel %vm725_vm4, %v717_v33, %v733_v13  ;;  %v3758_v33 = vld [vmem:[#allocation87_spill] sm:$0xff] }
 0x2ea   :  { %1732 = vrot.lane.b32.xlu1 %v1715_v23, %s2382_s17  ;;  %1892 = vrot.lane.b32.xlu0 %v1875_v47, %s2381_s16  ;;  %v837_v15 = vmul.f32 %v3743_v6, %v3309_v56  ;;  %v917_v43 = vmul.f32 %v3744_v20, %v3309_v56  ;;  %v997_v17 = vmul.f32 %v3745_v7, %v3309_v56  ;;  %v3332_v23 = vpop.xlane.xlu1 %576  ;;  %v3750_v47 = vld [vmem:[#allocation51_spill] sm:$0xff]  ;;  %v3761_v20 = vld [vmem:[#allocation30_spill] sm:$0xff]  ;;  %v3762_v7 = vld [vmem:[#allocation12_spill] sm:$0xff] }
 0x2eb   :  { %v1077_v30 = vmul.f32 %v3746_v40, %v3309_v56  ;;  %v1157_v44 = vmul.f32 %v3747_v42, %v3309_v56  ;;  %v1237_v29 = vmul.f32 %v3748_v55, %v3309_v56  ;;  %v1637_v51 = vmul.f32 %v3756_v48, %v3309_v56  ;;  %v3760_v6 = vld [vmem:[#allocation23_spill] sm:$0xff]  ;;  %v3764_v42 = vld [vmem:[#allocation38_spill] sm:$0xff]  ;;  %v3765_v55 = vld [vmem:[#allocation80_spill] sm:$0xff] }
 0x2ec   :  { %v1797_v26 = vmul.f32 %v3757_v19, %v3309_v56  ;;  %v1717_v27 = vmul.f32 %v3758_v33, %v3309_v56  ;;  %v3773_v19 = vld [vmem:[#allocation66_spill] sm:$0xff] }
 0x2ee   :  { %1972 = vrot.lane.b32.xlu1 %v1955_v62, %s2383_s18  ;;  %854 = vrot.lane.b32.xlu0 %v836_v8, %s2370_s1  ;;  %v1317_v62 = vmul.f32 %v3750_v47, %v3309_v56  ;;  %v3751_v8 = vld [vmem:[#allocation60_spill] sm:$0xff]  ;;  %v3766_v47 = vld [vmem:[#allocation46_spill] sm:$0xff] }
 0x2f2   :  { %934 = vrot.lane.b32.xlu1 %v916_v58, %s2369_s4  ;;  %1014 = vrot.lane.b32.xlu0 %v996_v18, %s2372_s7  ;;  %v1397_v58 = vmul.f32 %v3751_v8, %v3309_v56  ;;  %v3752_v18 = vld [vmem:[#allocation6_spill] sm:$0xff] }
 0x2f6   :  { %1094 = vrot.lane.b32.xlu1 %v1076_v5, %s2371_s6  ;;  %1174 = vrot.lane.b32.xlu0 %v1156_v34, %s2374_s9  ;;  %v662_v5 = vmul.f32 %v3752_v18, %v606_v12  ;;  %v591_v34 = vadd.f32 1e-05, %v583_v24  ;;  %v584_v24 = vmul.f32 0.03125, %v574_v31  ;;  %v3769_v31 = vld [vmem:[#allocation58_spill] sm:$0xff] }
 0x2f7   :  { %v851_v11 = vpop.permute.xlu0 %850  ;;  %v931_v59 = vpop.permute.xlu1 %930 }
 0x2f8   :  { %2319 = vrsqrt.f32 %v591_v34  ;;  %v592_v34 = vadd.f32 1e-05, %v584_v24  ;;  %v3779_v24 = vld [vmem:[#allocation44_spill] sm:$0xff] }
 0x2fa   :  { %1254 = vrot.lane.b32.xlu1 %v1236_v45, %s2373_s8  ;;  %1334 = vrot.lane.b32.xlu0 %v1316_v57, %s2376_s11  ;;  %v3753_v57 = vld [vmem:[#allocation64_spill] sm:$0xff]  ;;  %2321 = vrsqrt.f32 %v592_v34 }
 0x2fb   :  { %v1011_v45 = vpop.permute.xlu0 %1010  ;;  %v1477_v22 = vmul.f32 %v3753_v57, %v3309_v56 }
 0x2fe   :  { %1414 = vrot.lane.b32.xlu1 %v1396_v60, %s2375_s10  ;;  %1494 = vrot.lane.b32.xlu0 %v1476_v0, %s2378_s13  ;;  %v3754_v60 = vld [vmem:[#allocation70_spill] sm:$0xff] }
 0x2ff   :  { %v1557_v39 = vmul.f32 %v3754_v60, %v3309_v56  ;;  %v3755_v0 = vld [vmem:[#allocation10_spill] sm:$0xff]  ;;  %v1171_v52 = vpop.permute.xlu0 %1170  ;;  %v3770_v60 = vld [vmem:[#allocation56_spill] sm:$0xff] }
 0x300   :  { %v718_v32 = vadd.f32 %v3755_v0, %v662_v5  ;;  %v3771_v0 = vld [vmem:[#allocation20_spill] sm:$0xff] }
 0x302   :  { %1574 = vrot.lane.b32.xlu1 %v1556_v54, %s2377_s12  ;;  %1654 = vrot.lane.b32.xlu0 %v1636_v1, %s2380_s15  ;;  %v734_v54 = vmul.f32 0.2, %v718_v32  ;;  %vm726_vm5 = vcmp.gt.f32.partialorder %v718_v32, 0.0  ;;  %v1091_v1 = vpop.permute.xlu1 %1090  ;;  %v2320_v40 = vpop.eup %2319 }
 0x304   :  { %v3358_v13 = vsel %vm726_vm5, %v718_v32, %v734_v54 }
 0x305   :  { %v1078_v49 = vmul.f32 %v3763_v50, %v3358_v13  ;;  %v2322_v50 = vpop.eup %2321 }
 0x306   :  { %1894 = vrot.lane.b32.xlu1 %v1876_v4, %s2381_s16  ;;  %1734 = vrot.lane.b32.xlu0 %v1716_v25, %s2382_s17  ;;  %v3759_v4 = vld [vmem:[#allocation82_spill] sm:$0xff] }
 0x307   :  { %v1877_v25 = vmul.f32 %v3759_v4, %v3309_v56 }
 0x30a   :  { %1974 = vrot.lane.b32.xlu1 %v1956_v21, %s2383_s18  ;;  %1814 = vrot.lane.b32.xlu0 %v1796_v37, %s2379_s14  ;;  %v1251_v21 = vpop.permute.xlu1 %1250  ;;  %v1331_v37 = vpop.permute.xlu0 %1330 }
 0x30e   :  { %856 = vrot.lane.b32.xlu1 %v837_v15, %s2370_s1  ;;  %936 = vrot.lane.b32.xlu0 %v917_v43, %s2369_s4  ;;  %v918_v15 = vmul.f32 %v3760_v6, %v3358_v13  ;;  %v838_v43 = vmul.f32 %v3761_v20, %v3358_v13  ;;  %v1411_v14 = vpop.permute.xlu1 %1410  ;;  %v3375_v12 = vpop.permute.xlu0 %1490  ;;  %v3775_v6 = vld [vmem:[#allocation77_spill] sm:$0xff] }
 0x312   :  { %1016 = vrot.lane.b32.xlu1 %v997_v17, %s2372_s7  ;;  %1096 = vrot.lane.b32.xlu0 %v1077_v30, %s2371_s6  ;;  %v794_v17 = vmul.f32 %v3762_v7, %v3146_v61  ;;  %v3386_v57 = vpop.permute.xlu1 %1570 }
 0x314   :  { %v874_v30 = vadd.f32 %v851_v11, %v794_v17  ;;  %v1238_v11 = vmul.f32 %v3766_v47, %v3358_v13  ;;  %v3780_v47 = vld [vmem:[#allocation76_spill] sm:$0xff] }
 0x316   :  { %1176 = vrot.lane.b32.xlu1 %v1157_v44, %s2374_s9  ;;  %1256 = vrot.lane.b32.xlu0 %v1237_v29, %s2373_s8  ;;  %v998_v44 = vmul.f32 %v3764_v42, %v3358_v13  ;;  %v607_v29 = vmul.f32 %v2320_v40, %v3765_v55  ;;  %v954_v61 = vadd.f32 %v931_v59, %v874_v30  ;;  %v3401_v33 = vpop.permute.xlu1 %1810  ;;  %v3776_v40 = vld [vmem:[#allocation35_spill] sm:$0xff]  ;;  %v3777_v42 = vld [vmem:[#allocation22_spill] sm:$0xff] }
 0x317   :  { %v1398_v59 = vmul.f32 %v3769_v31, %v3358_v13  ;;  %v3782_v31 = vld [vmem:[#allocation52_spill] sm:$0xff] }
 0x318   :  { %v1034_v5 = vadd.f32 %v1011_v45, %v954_v61  ;;  %v3772_v45 = vld [vmem:[#allocation71_spill] sm:$0xff] }
 0x31a   :  { %1336 = vrot.lane.b32.xlu1 %v1317_v62, %s2376_s11  ;;  %1416 = vrot.lane.b32.xlu0 %v1397_v58, %s2375_s10  ;;  %v3767_v62 = vld [vmem:[#allocation47_spill] sm:$0xff]  ;;  %v1114_v48 = vadd.f32 %v1091_v1, %v1034_v5  ;;  %v3774_v1 = vld [vmem:[#allocation89_spill] sm:$0xff]  ;;  %v3415_v7 = vpop.permute.xlu1 %1890 }
 0x31b   :  { %v1158_v8 = vmul.f32 %v3767_v62, %v3358_v13  ;;  %v3768_v58 = vld [vmem:[#allocation7_spill] sm:$0xff]  ;;  %v3781_v5 = vld [vmem:[#allocation29_spill] sm:$0xff] }
 0x31c   :  { %v663_v18 = vmul.f32 %v3768_v58, %v607_v29  ;;  %v1194_v4 = vadd.f32 %v1171_v52, %v1114_v48  ;;  %v1798_v52 = vmul.f32 %v3137_v63, %v3358_v13  ;;  %v3778_v29 = vld [vmem:[#allocation17_spill] sm:$0xff]  ;;  %v585_v58 = vmul.f32 0.03125, %v3332_v23 }
 0x31e   :  { %1496 = vrot.lane.b32.xlu1 %v1477_v22, %s2378_s13  ;;  %1576 = vrot.lane.b32.xlu0 %v1557_v39, %s2377_s12  ;;  %v3388_v22 = vpop.permute.xlu0 %1650  ;;  %v1318_v39 = vmul.f32 %v3770_v60, %v3358_v13  ;;  %v719_v32 = vadd.f32 %v3771_v0, %v663_v18  ;;  %v3783_v60 = vld [vmem:[#allocation8_spill] sm:$0xff]  ;;  %v593_v48 = vadd.f32 1e-05, %v585_v58 }
 0x320   :  { %v735_v54 = vmul.f32 0.2, %v719_v32  ;;  %vm727_vm6 = vcmp.gt.f32.partialorder %v719_v32, 0.0  ;;  %2323 = vrsqrt.f32 %v593_v48 }
 0x322   :  { %1656 = vrot.lane.b32.xlu1 %v1637_v51, %s2380_s15  ;;  %1816 = vrot.lane.b32.xlu0 %v1797_v26, %s2379_s14  ;;  %v1558_v51 = vmul.f32 %v3772_v45, %v3358_v13  ;;  %v1478_v26 = vmul.f32 %v3773_v19, %v3358_v13  ;;  %v3411_v20 = vsel %vm727_vm6, %v719_v32, %v735_v54 }
 0x323   :  { %v919_v30 = vmul.f32 %v3776_v40, %v3411_v20  ;;  %v839_v61 = vmul.f32 %v3778_v29, %v3411_v20  ;;  %v1079_v63 = vmul.f32 %v3779_v24, %v3411_v20  ;;  %v999_v34 = vmul.f32 %v3781_v5, %v3411_v20  ;;  %v3789_v29 = vld [vmem:[#allocation65_spill] sm:$0xff] }
 0x324   :  { %v1719_v24 = vmul.f32 %v3135_v2, %v3411_v20 }
 0x326   :  { %1736 = vrot.lane.b32.xlu1 %v1717_v27, %s2382_s17  ;;  %1896 = vrot.lane.b32.xlu0 %v1877_v25, %s2381_s16  ;;  %v3403_v27 = vpop.permute.xlu0 %1730  ;;  %v1718_v25 = vmul.f32 %v3774_v1, %v3358_v13 }
 0x32a   :  { %938 = vrot.lane.b32.xlu1 %v918_v15, %s2369_s4  ;;  %858 = vrot.lane.b32.xlu0 %v838_v43, %s2370_s1  ;;  %v1638_v15 = vmul.f32 %v3775_v6, %v3358_v13  ;;  %v1274_v43 = vadd.f32 %v1251_v21, %v1194_v4  ;;  %v3417_v17 = vpop.permute.xlu0 %1970  ;;  %v3786_v4 = vld [vmem:[#allocation11_spill] sm:$0xff] }
 0x32e   :  { %1098 = vrot.lane.b32.xlu1 %v1078_v49, %s2371_s6  ;;  %1018 = vrot.lane.b32.xlu0 %v998_v44, %s2372_s7  ;;  %v1354_v49 = vadd.f32 %v1331_v37, %v1274_v43  ;;  %v795_v44 = vmul.f32 %v3777_v42, %v3211_v10 }
 0x332   :  { %1258 = vrot.lane.b32.xlu1 %v1238_v11, %s2373_s8  ;;  %1178 = vrot.lane.b32.xlu0 %v1158_v8, %s2374_s9  ;;  %v608_v11 = vmul.f32 %v2322_v50, %v3780_v47  ;;  %v1434_v8 = vadd.f32 %v1411_v14, %v1354_v49 }
 0x334   :  { %v1514_v14 = vadd.f32 %v3375_v12, %v1434_v8 }
 0x336   :  { %1418 = vrot.lane.b32.xlu1 %v1398_v59, %s2375_s10  ;;  %1338 = vrot.lane.b32.xlu0 %v1318_v39, %s2376_s11  ;;  %v1239_v59 = vmul.f32 %v3782_v31, %v3411_v20  ;;  %v664_v39 = vmul.f32 %v3783_v60, %v608_v11  ;;  %v1594_v6 = vadd.f32 %v3386_v57, %v1514_v14  ;;  %v3794_v14 = vld [vmem:[#allocation81_spill] sm:$0xff] }
 0x338   :  { %v720_v1 = vadd.f32 %v3786_v4, %v664_v39  ;;  %v3793_v39 = vld [vmem:[#allocation40_spill] sm:$0xff] }
 0x33a   :  { %1578 = vrot.lane.b32.xlu1 %v1558_v51, %s2377_s12  ;;  %1498 = vrot.lane.b32.xlu0 %v1478_v26, %s2378_s13  ;;  %v3784_v51 = vld [vmem:[#allocation41_spill] sm:$0xff]  ;;  %v736_v49 = vmul.f32 0.2, %v720_v1  ;;  %vm728_vm7 = vcmp.gt.f32.partialorder %v720_v1, 0.0 }
 0x33b   :  { %v1159_v19 = vmul.f32 %v3784_v51, %v3411_v20  ;;  %v3785_v26 = vld [vmem:[#allocation61_spill] sm:$0xff] }
 0x33c   :  { %v1399_v54 = vmul.f32 %v3785_v26, %v3411_v20 }
 0x33e   :  { %1738 = vrot.lane.b32.xlu1 %v1718_v25, %s2382_s17  ;;  %1658 = vrot.lane.b32.xlu0 %v1638_v15, %s2380_s15 }
 0x342   :  { %1818 = vrot.lane.b32.xlu1 %v1798_v52, %s2379_s14  ;;  %940 = vrot.lane.b32.xlu0 %v919_v30, %s2369_s4  ;;  %v3787_v52 = vld [vmem:[#allocation53_spill] sm:$0xff] }
 0x343   :  { %v1319_v40 = vmul.f32 %v3787_v52, %v3411_v20  ;;  %v3788_v30 = vld [vmem:[#allocation73_spill] sm:$0xff] }
 0x344   :  { %v853_v21 = vpop.permute.xlu1 %852  ;;  %v933_v55 = vpop.permute.xlu0 %932  ;;  %v1559_v50 = vmul.f32 %v3788_v30, %v3411_v20  ;;  %v3799_v30 = vld [vmem:[#allocation48_spill] sm:$0xff] }
 0x345   :  { %v875_v62 = vadd.f32 %v853_v21, %v795_v44  ;;  %v1674_v44 = vadd.f32 %v3388_v22, %v1594_v6  ;;  %v3798_v6 = vld [vmem:[#allocation9_spill] sm:$0xff] }
 0x346   :  { %860 = vrot.lane.b32.xlu1 %v839_v61, %s2370_s1  ;;  %1100 = vrot.lane.b32.xlu0 %v1079_v63, %s2371_s6  ;;  %v1479_v61 = vmul.f32 %v3789_v29, %v3411_v20  ;;  %v3462_v63 = vsel %vm728_vm7, %v720_v1, %v736_v49  ;;  %v3797_v1 = vld [vmem:[#allocation49_spill] sm:$0xff] }
 0x347   :  { %v955_v37 = vadd.f32 %v933_v55, %v875_v62  ;;  %v1754_v47 = vadd.f32 %v3403_v27, %v1674_v44  ;;  %v3800_v49 = vld [vmem:[#allocation57_spill] sm:$0xff] }
 0x348   :  { %v1013_v10 = vpop.permute.xlu1 %1012  ;;  %v1093_v18 = vpop.permute.xlu0 %1092  ;;  %v3801_v44 = vld [vmem:[#allocation21_spill] sm:$0xff] }
 0x349   :  { %v1035_v0 = vadd.f32 %v1013_v10, %v955_v37  ;;  %v3790_v37 = vld [vmem:[#allocation83_spill] sm:$0xff]  ;;  %v3791_v10 = vld [vmem:[#allocation32_spill] sm:$0xff]  ;;  %v1834_v2 = vadd.f32 %v3401_v33, %v1754_v47 }
 0x34a   :  { %1020 = vrot.lane.b32.xlu1 %v999_v34, %s2372_s7  ;;  %1260 = vrot.lane.b32.xlu0 %v1239_v59, %s2373_s8  ;;  %v1639_v58 = vmul.f32 %v3790_v37, %v3411_v20  ;;  %v2324_v34 = vpop.eup %2323  ;;  %v3792_v59 = vld [vmem:[#allocation25_spill] sm:$0xff] }
 0x34b   :  { %v1115_v32 = vadd.f32 %v1093_v18, %v1035_v0  ;;  %v840_v18 = vmul.f32 %v3791_v10, %v3462_v63  ;;  %v920_v60 = vmul.f32 %v3792_v59, %v3462_v63  ;;  %v1000_v0 = vmul.f32 %v3793_v39, %v3462_v63 }
 0x34c   :  { %v1173_v23 = vpop.permute.xlu1 %1172  ;;  %v1253_v45 = vpop.permute.xlu0 %1252  ;;  %v1914_v48 = vadd.f32 %v3415_v7, %v1834_v2 }
 0x34d   :  { %v1195_v25 = vadd.f32 %v1173_v23, %v1115_v32  ;;  %v609_v32 = vmul.f32 %v2324_v34, %v3794_v14 }
 0x34e   :  { %1180 = vrot.lane.b32.xlu1 %v1159_v19, %s2374_s9  ;;  %1420 = vrot.lane.b32.xlu0 %v1399_v54, %s2375_s10  ;;  %v3796_v54 = vld [vmem:[#allocation36_spill] sm:$0xff]  ;;  %v1994_v7 = vadd.f32 %v3417_v17, %v1914_v48 }
 0x34f   :  { %v1275_v12 = vadd.f32 %v1253_v45, %v1195_v25  ;;  %v3795_v45 = vld [vmem:[#allocation13_spill] sm:$0xff]  ;;  %v1080_v4 = vmul.f32 %v3796_v54, %v3462_v63  ;;  %v1160_v25 = vmul.f32 %v3797_v1, %v3462_v63 }
 0x350   :  { %v1333_v15 = vpop.permute.xlu1 %1332  ;;  %v1413_v43 = vpop.permute.xlu0 %1412  ;;  %v796_v51 = vmul.f32 %v3795_v45, %v3256_v28  ;;  %v2003_v17 = vsel %vm2002_vm8, %v1994_v7, 0.0  ;;  %v3809_v7 = vld [vmem:[#allocation42_spill] sm:$0xff] }
 0x351   :  { %v1355_v42 = vadd.f32 %v1333_v15, %v1275_v12  ;;  %v665_v12 = vmul.f32 %v3798_v6, %v609_v32  ;;  %v3806_v32 = vld [vmem:[#allocation19_spill] sm:$0xff] }
 0x352   :  { %1340 = vrot.lane.b32.xlu1 %v1319_v40, %s2376_s11  ;;  %1580 = vrot.lane.b32.xlu0 %v1559_v50, %s2377_s12  ;;  %v1240_v50 = vmul.f32 %v3799_v30, %v3462_v63 }
 0x353   :  { %v1435_v57 = vadd.f32 %v1413_v43, %v1355_v42  ;;  %v1320_v42 = vmul.f32 %v3800_v49, %v3462_v63 }
 0x354   :  { %v1493_v21 = vpop.permute.xlu1 %1492  ;;  %v1573_v55 = vpop.permute.xlu0 %1572 }
 0x355   :  { %v1515_v11 = vadd.f32 %v1493_v21, %v1435_v57  ;;  %v721_v57 = vadd.f32 %v3801_v44, %v665_v12 }
 0x356   :  { %1500 = vrot.lane.b32.xlu1 %v1479_v61, %s2378_s13  ;;  %1740 = vrot.lane.b32.xlu0 %v1719_v24, %s2382_s17 }
 0x357   :  { %v1595_v62 = vadd.f32 %v1573_v55, %v1515_v11  ;;  %v3802_v11 = vld [vmem:[#allocation59_spill] sm:$0xff]  ;;  %v737_v37 = vmul.f32 0.2, %v721_v57  ;;  %vm729_vm9 = vcmp.gt.f32.partialorder %v721_v57, 0.0 }
 0x358   :  { %v1653_v22 = vpop.permute.xlu1 %1652  ;;  %v1813_v8 = vpop.permute.xlu0 %1812 }
 0x359   :  { %v1675_v5 = vadd.f32 %v1653_v22, %v1595_v62  ;;  %v1400_v62 = vmul.f32 %v3802_v11, %v3462_v63  ;;  %v3803_v22 = vld [vmem:[#allocation68_spill] sm:$0xff]  ;;  %v3513_v59 = vsel %vm729_vm9, %v721_v57, %v737_v37 }
 0x35a   :  { %1660 = vrot.lane.b32.xlu1 %v1639_v58, %s2380_s15  ;;  %862 = vrot.lane.b32.xlu0 %v840_v18, %s2370_s1  ;;  %v841_v48 = vmul.f32 %v3806_v32, %v3513_v59 }
 0x35c   :  { %v1733_v27 = vpop.permute.xlu1 %1732  ;;  %v1893_v31 = vpop.permute.xlu0 %1892 }
 0x35d   :  { %v1755_v23 = vadd.f32 %v1733_v27, %v1675_v5  ;;  %v3804_v5 = vld [vmem:[#allocation72_spill] sm:$0xff]  ;;  %v3805_v27 = vld [vmem:[#allocation79_spill] sm:$0xff] }
 0x35e   :  { %942 = vrot.lane.b32.xlu1 %v920_v60, %s2369_s4  ;;  %1022 = vrot.lane.b32.xlu0 %v1000_v0, %s2372_s7  ;;  %v1560_v34 = vmul.f32 %v3804_v5, %v3462_v63  ;;  %v3816_v5 = vld [vmem:[#allocation84_spill] sm:$0xff] }
 0x35f   :  { %v1835_v33 = vadd.f32 %v1813_v8, %v1755_v23  ;;  %v1480_v8 = vmul.f32 %v3803_v22, %v3462_v63  ;;  %v1720_v23 = vmul.f32 %v3144_v36, %v3462_v63 }
 0x360   :  { %v1973_v19 = vpop.permute.xlu1 %1972  ;;  %v855_v26 = vpop.permute.xlu0 %854 }
 0x361   :  { %v1915_v15 = vadd.f32 %v1893_v31, %v1835_v33  ;;  %v876_v43 = vadd.f32 %v855_v26, %v796_v51  ;;  %v1640_v31 = vmul.f32 %v3805_v27, %v3462_v63  ;;  %v3807_v26 = vld [vmem:[#allocation31_spill] sm:$0xff]  ;;  %v3817_v27 = vld [vmem:[#allocation74_spill] sm:$0xff] }
 0x362   :  { %1102 = vrot.lane.b32.xlu1 %v1080_v4, %s2371_s6  ;;  %1182 = vrot.lane.b32.xlu0 %v1160_v25, %s2374_s9  ;;  %v1001_v54 = vmul.f32 %v3807_v26, %v3513_v59  ;;  %v3808_v4 = vld [vmem:[#allocation37_spill] sm:$0xff]  ;;  %v1957_v26 = vmul.f32 %v3166_v53, %v3309_v56 }
 0x363   :  { %v1995_v28 = vadd.f32 %v1973_v19, %v1915_v15  ;;  %v921_v1 = vmul.f32 %v3808_v4, %v3513_v59  ;;  %v1161_v15 = vmul.f32 %v3809_v7, %v3513_v59 }
 0x364   :  { %v935_v52 = vpop.permute.xlu1 %934  ;;  %v1015_v40 = vpop.permute.xlu0 %1014 }
 0x365   :  { %v2004_v21 = vsel %vm2002_vm8, %v1995_v28, 0.0  ;;  %v956_v55 = vadd.f32 %v935_v52, %v876_v43  ;;  %v3810_v43 = vld [vmem:[#allocation45_spill] sm:$0xff] }
 0x366   :  { %v3499_v29 = vadd.f32 %v2004_v21, %v2003_v17  ;;  %1262 = vrot.lane.b32.xlu1 %v1240_v50, %s2373_s8  ;;  %1342 = vrot.lane.b32.xlu0 %v1320_v42, %s2376_s11  ;;  %v1081_v28 = vmul.f32 %v3810_v43, %v3513_v59  ;;  %v3811_v50 = vld [vmem:[#allocation55_spill] sm:$0xff]  ;;  %v3812_v42 = vld [vmem:[#allocation54_spill] sm:$0xff]  ;;  %v3813_v21 = vld [vmem:[#allocation24_spill] sm:$0xff] }
 0x367   :  { %v1036_v61 = vadd.f32 %v1015_v40, %v956_v55  ;;  %v1321_v49 = vmul.f32 %v3811_v50, %v3513_v59  ;;  %v1241_v44 = vmul.f32 %v3812_v42, %v3513_v59  ;;  %v797_v55 = vmul.f32 %v3813_v21, %v3309_v56  ;;  %v3820_v43 = vld [vmem:[#allocation88_spill] sm:$0xff]  ;;  %v3821_v50 = vld [vmem:[#allocation90_spill] sm:$0xff] }
 0x368   :  { %v1095_v24 = vpop.permute.xlu1 %1094  ;;  %v1175_v47 = vpop.permute.xlu0 %1174 }
 0x369   :  { %v1116_v58 = vadd.f32 %v1095_v24, %v1036_v61 }
 0x36a   :  { %1422 = vrot.lane.b32.xlu1 %v1400_v62, %s2375_s10  ;;  %1502 = vrot.lane.b32.xlu0 %v1480_v8, %s2378_s13  ;;  %v3815_v62 = vld [vmem:[#allocation63_spill] sm:$0xff] }
 0x36b   :  { %v1196_v10 = vadd.f32 %v1175_v47, %v1116_v58  ;;  %v3814_v47 = vld [vmem:[#allocation67_spill] sm:$0xff]  ;;  %v1401_v22 = vmul.f32 %v3815_v62, %v3513_v59 }
 0x36c   :  { %v1255_v18 = vpop.permute.xlu1 %1254  ;;  %v1335_v2 = vpop.permute.xlu0 %1334  ;;  %v1481_v11 = vmul.f32 %v3814_v47, %v3513_v59 }
 0x36d   :  { %v1276_v60 = vadd.f32 %v1255_v18, %v1196_v10 }
 0x36e   :  { %1582 = vrot.lane.b32.xlu1 %v1560_v34, %s2377_s12  ;;  %1662 = vrot.lane.b32.xlu0 %v1640_v31, %s2380_s15  ;;  %v1641_v34 = vmul.f32 %v3816_v5, %v3513_v59  ;;  %v1561_v31 = vmul.f32 %v3817_v27, %v3513_v59 }
 0x36f   :  { %v1356_v39 = vadd.f32 %v1335_v2, %v1276_v60 }
 0x370   :  { %v1415_v0 = vpop.permute.xlu1 %1414  ;;  %v1495_v14 = vpop.permute.xlu0 %1494 }
 0x371   :  { %v1436_v33 = vadd.f32 %v1415_v0, %v1356_v39 }
 0x372   :  { %864 = vrot.lane.b32.xlu1 %v841_v48, %s2370_s1  ;;  %1742 = vrot.lane.b32.xlu0 %v1720_v23, %s2382_s17  ;;  %v3818_v48 = vld [vmem:[#allocation85_spill] sm:$0xff] }
 0x373   :  { %v1516_v45 = vadd.f32 %v1495_v14, %v1436_v33  ;;  %v1799_v23 = vmul.f32 %v3818_v48, %v3411_v20  ;;  %v1878_v33 = vmul.f32 %v3154_v35, %v3358_v13 }
 0x374   :  { %v1575_v51 = vpop.permute.xlu1 %1574  ;;  %v1655_v19 = vpop.permute.xlu0 %1654 }
 0x375   :  { %v1596_v25 = vadd.f32 %v1575_v51, %v1516_v45 }
 0x376   :  { %1024 = vrot.lane.b32.xlu1 %v1001_v54, %s2372_s7  ;;  %944 = vrot.lane.b32.xlu0 %v921_v1, %s2369_s4  ;;  %v3819_v54 = vld [vmem:[#allocation86_spill] sm:$0xff] }
 0x377   :  { %v1676_v36 = vadd.f32 %v1655_v19, %v1596_v25  ;;  %v1721_v4 = vmul.f32 %v3819_v54, %v3513_v59 }
 0x378   :  { %v1895_v6 = vpop.permute.xlu1 %1894  ;;  %v1735_v12 = vpop.permute.xlu0 %1734 }
 0x379   :  { %v1756_v52 = vadd.f32 %v1735_v12, %v1676_v36  ;;  %v1879_v12 = vmul.f32 %v3188_v38, %v3411_v20 }
 0x37a   :  { %1184 = vrot.lane.b32.xlu1 %v1161_v15, %s2374_s9  ;;  %1104 = vrot.lane.b32.xlu0 %v1081_v28, %s2371_s6  ;;  %v1958_v28 = vmul.f32 %v3820_v43, %v3358_v13 }
 0x37c   :  { %v1975_v40 = vpop.permute.xlu1 %1974  ;;  %v1815_v30 = vpop.permute.xlu0 %1814 }
 0x37d   :  { %v1836_v57 = vadd.f32 %v1815_v30, %v1756_v52  ;;  %v1801_v52 = vmul.f32 %v3197_v41, %v3513_v59  ;;  %v1880_v30 = vmul.f32 %v3202_v9, %v3462_v63  ;;  %v3822_v41 = vld [vmem:[#allocation14_spill] sm:$0xff] }
 0x37e   :  { %1344 = vrot.lane.b32.xlu1 %v1321_v49, %s2376_s11  ;;  %1264 = vrot.lane.b32.xlu0 %v1241_v44, %s2373_s8  ;;  %v1959_v49 = vmul.f32 %v3821_v50, %v3411_v20 }
 0x37f   :  { %v1916_v17 = vadd.f32 %v1895_v6, %v1836_v57  ;;  %v1800_v6 = vmul.f32 %v3176_v46, %v3462_v63  ;;  %v798_v57 = vmul.f32 %v3822_v41, %v3358_v13  ;;  %v1961_v13 = vmul.f32 %v3206_v3, %v3513_v59 }
 0x380   :  { %v857_v61 = vpop.permute.xlu1 %856  ;;  %v937_v24 = vpop.permute.xlu0 %936 }
 0x381   :  { %v1996_v8 = vadd.f32 %v1975_v40, %v1916_v17  ;;  %v877_v37 = vadd.f32 %v857_v61, %v797_v55  ;;  %v1881_v55 = vmul.f32 %v3204_v16, %v3513_v59  ;;  %v3823_v61 = vld [vmem:[#allocation92_spill] sm:$0xff] }
 0x382   :  { %1504 = vrot.lane.b32.xlu1 %v1481_v11, %s2378_s13  ;;  %1424 = vrot.lane.b32.xlu0 %v1401_v22, %s2375_s10  ;;  %v1960_v9 = vmul.f32 %v3823_v61, %v3462_v63 }
 0x383   :  { %v957_v58 = vadd.f32 %v937_v24, %v877_v37  ;;  %v2006_v10 = vsel %vm2002_vm8, %v1996_v8, 0.0 }
 0x384   :  { %v1017_v18 = vpop.permute.xlu1 %1016  ;;  %v1097_v2 = vpop.permute.xlu0 %1096  ;;  %v3555_v60 = vadd.f32 %v2006_v10, %v3499_v29 }
 0x385   :  { %v1037_v39 = vadd.f32 %v1017_v18, %v957_v58 }
 0x386   :  { %1664 = vrot.lane.b32.xlu1 %v1641_v34, %s2380_s15  ;;  %1584 = vrot.lane.b32.xlu0 %v1561_v31, %s2377_s12 }
 0x387   :  { %v1117_v0 = vadd.f32 %v1097_v2, %v1037_v39 }
 0x388   :  { %v1177_v14 = vpop.permute.xlu1 %1176  ;;  %v1257_v32 = vpop.permute.xlu0 %1256 }
 0x389   :  { %v1197_v45 = vadd.f32 %v1177_v14, %v1117_v0 }
 0x38a   :  { %1820 = vrot.lane.b32.xlu1 %v1799_v23, %s2379_s14  ;;  %1898 = vrot.lane.b32.xlu0 %v1878_v33, %s2381_s16 }
 0x38b   :  { %v1277_v29 = vadd.f32 %v1257_v32, %v1197_v45 }
 0x38c   :  { %v1337_v51 = vpop.permute.xlu1 %1336  ;;  %v1417_v19 = vpop.permute.xlu0 %1416 }
 0x38d   :  { %v1357_v1 = vadd.f32 %v1337_v51, %v1277_v29  ;;  %v3824_v51 = vld [vmem:[#allocation26_spill] sm:$0xff] }
 0x38e   :  { %1976 = vrot.lane.b32.xlu1 %v1957_v26, %s2383_s18  ;;  %1744 = vrot.lane.b32.xlu0 %v1721_v4, %s2382_s17 }
 0x38f   :  { %v1437_v35 = vadd.f32 %v1417_v19, %v1357_v1  ;;  %v799_v19 = vmul.f32 %v3824_v51, %v3411_v20 }
 0x390   :  { %v1497_v25 = vpop.permute.xlu1 %1496  ;;  %v1577_v36 = vpop.permute.xlu0 %1576 }
 0x391   :  { %v1517_v7 = vadd.f32 %v1497_v25, %v1437_v35 }
 0x392   :  { %1822 = vrot.lane.b32.xlu1 %v1800_v6, %s2379_s14  ;;  %1900 = vrot.lane.b32.xlu0 %v1879_v12, %s2381_s16 }
 0x393   :  { %v1597_v53 = vadd.f32 %v1577_v36, %v1517_v7 }
 0x394   :  { %v1657_v56 = vpop.permute.xlu1 %1656  ;;  %v1817_v15 = vpop.permute.xlu0 %1816 }
 0x395   :  { %v1677_v40 = vadd.f32 %v1657_v56, %v1597_v53 }
 0x396   :  { %1978 = vrot.lane.b32.xlu1 %v1958_v28, %s2383_s18  ;;  %1824 = vrot.lane.b32.xlu0 %v1801_v52, %s2379_s14 }
 0x398   :  { %v1737_v46 = vpop.permute.xlu1 %1736  ;;  %v1897_v38 = vpop.permute.xlu0 %1896 }
 0x399   :  { %v1757_v42 = vadd.f32 %v1737_v46, %v1677_v40 }
 0x39a   :  { %1902 = vrot.lane.b32.xlu1 %v1880_v30, %s2381_s16  ;;  %1980 = vrot.lane.b32.xlu0 %v1959_v49, %s2383_s18 }
 0x39b   :  { %v1837_v44 = vadd.f32 %v1817_v15, %v1757_v42 }
 0x39c   :  { %v939_v17 = vpop.permute.xlu1 %938  ;;  %v859_v21 = vpop.permute.xlu0 %858 }
 0x39d   :  { %v3595_v24 = vadd.f32 %v1897_v38, %v1837_v44  ;;  %v878_v47 = vadd.f32 %v859_v21, %v798_v57 }
 0x39e   :  { %1904 = vrot.lane.b32.xlu1 %v1881_v55, %s2381_s16  ;;  %1982 = vrot.lane.b32.xlu0 %v1960_v9, %s2383_s18 }
 0x39f   :  { %v958_v11 = vadd.f32 %v939_v17, %v878_v47  ;;  %v3825_v47 = vld [vmem:[#allocation15_spill] sm:$0xff] }
 0x3a0   :  { %v1099_v62 = vpop.permute.xlu1 %1098  ;;  %v1019_v22 = vpop.permute.xlu0 %1018 }
 0x3a1   :  { %v1038_v8 = vadd.f32 %v1019_v22, %v958_v11  ;;  %v800_v11 = vmul.f32 %v3825_v47, %v3462_v63 }
 0x3a2   :  { %1984 = vrot.lane.b32.xlu1 %v1961_v13, %s2383_s18 }
 0x3a3   :  { %v1118_v16 = vadd.f32 %v1099_v62, %v1038_v8 }
 0x3a4   :  { %v1259_v37 = vpop.permute.xlu1 %1258  ;;  %v1179_v58 = vpop.permute.xlu0 %1178 }
 0x3a5   :  { %v1198_v10 = vadd.f32 %v1179_v58, %v1118_v16  ;;  %v3826_v58 = vld [vmem:[#allocation27_spill] sm:$0xff] }
 0x3a7   :  { %v1278_v18 = vadd.f32 %v1259_v37, %v1198_v10  ;;  %v801_v10 = vmul.f32 %v3826_v58, %v3513_v59 }
 0x3a8   :  { %v1419_v2 = vpop.permute.xlu1 %1418  ;;  %v1339_v5 = vpop.permute.xlu0 %1338 }
 0x3a9   :  { %v1358_v34 = vadd.f32 %v1339_v5, %v1278_v18 }
 0x3ab   :  { %v1438_v27 = vadd.f32 %v1419_v2, %v1358_v34 }
 0x3ac   :  { %v1579_v31 = vpop.permute.xlu1 %1578  ;;  %v1499_v39 = vpop.permute.xlu0 %1498 }
 0x3ad   :  { %v1518_v0 = vadd.f32 %v1499_v39, %v1438_v27 }
 0x3af   :  { %v1598_v14 = vadd.f32 %v1579_v31, %v1518_v0 }
 0x3b0   :  { %v1739_v32 = vpop.permute.xlu1 %1738  ;;  %v1659_v48 = vpop.permute.xlu0 %1658 }
 0x3b1   :  { %v1678_v23 = vadd.f32 %v1659_v48, %v1598_v14 }
 0x3b3   :  { %v1758_v3 = vadd.f32 %v1739_v32, %v1678_v23 }
 0x3b4   :  { %v1819_v33 = vpop.permute.xlu1 %1818  ;;  %v941_v45 = vpop.permute.xlu0 %940 }
 0x3b5   :  { %v3602_v29 = vadd.f32 %v1819_v33, %v1758_v3 }
 0x3b8   :  { %v861_v26 = vpop.permute.xlu1 %860  ;;  %v1101_v54 = vpop.permute.xlu0 %1100 }
 0x3b9   :  { %v879_v4 = vadd.f32 %v861_v26, %v799_v19 }
 0x3bb   :  { %v959_v1 = vadd.f32 %v941_v45, %v879_v4 }
 0x3bc   :  { %v1021_v35 = vpop.permute.xlu1 %1020  ;;  %v1261_v25 = vpop.permute.xlu0 %1260 }
 0x3bd   :  { %v1039_v36 = vadd.f32 %v1021_v35, %v959_v1 }
 0x3bf   :  { %v1119_v6 = vadd.f32 %v1101_v54, %v1039_v36 }
 0x3c0   :  { %v1181_v12 = vpop.permute.xlu1 %1180  ;;  %v1421_v7 = vpop.permute.xlu0 %1420 }
 0x3c1   :  { %v1199_v53 = vadd.f32 %v1181_v12, %v1119_v6 }
 0x3c3   :  { %v1279_v56 = vadd.f32 %v1261_v25, %v1199_v53 }
 0x3c4   :  { %v1341_v15 = vpop.permute.xlu1 %1340  ;;  %v1581_v43 = vpop.permute.xlu0 %1580 }
 0x3c5   :  { %v1359_v28 = vadd.f32 %v1341_v15, %v1279_v56 }
 0x3c7   :  { %v1439_v52 = vadd.f32 %v1421_v7, %v1359_v28 }
 0x3c8   :  { %v1501_v40 = vpop.permute.xlu1 %1500  ;;  %v1741_v46 = vpop.permute.xlu0 %1740 }
 0x3c9   :  { %v1519_v38 = vadd.f32 %v1501_v40, %v1439_v52 }
 0x3cb   :  { %v1599_v20 = vadd.f32 %v1581_v43, %v1519_v38 }
 0x3cc   :  { %v1661_v30 = vpop.permute.xlu1 %1660  ;;  %v863_v50 = vpop.permute.xlu0 %862 }
 0x3cd   :  { %v1679_v49 = vadd.f32 %v1661_v30, %v1599_v20  ;;  %v880_v13 = vadd.f32 %v863_v50, %v800_v11 }
 0x3cf   :  { %v1759_v42 = vadd.f32 %v1741_v46, %v1679_v49 }
 0x3d0   :  { %v943_v44 = vpop.permute.xlu1 %942  ;;  %v1023_v41 = vpop.permute.xlu0 %1022 }
 0x3d1   :  { %v960_v8 = vadd.f32 %v943_v44, %v880_v13 }
 0x3d3   :  { %v1040_v18 = vadd.f32 %v1023_v41, %v960_v8 }
 0x3d4   :  { %v1103_v57 = vpop.permute.xlu1 %1102  ;;  %v1183_v17 = vpop.permute.xlu0 %1182 }
 0x3d5   :  { %v1120_v31 = vadd.f32 %v1103_v57, %v1040_v18 }
 0x3d7   :  { %v1200_v32 = vadd.f32 %v1183_v17, %v1120_v31 }
 0x3d8   :  { %v1263_v21 = vpop.permute.xlu1 %1262  ;;  %v1343_v55 = vpop.permute.xlu0 %1342 }
 0x3d9   :  { %v1280_v3 = vadd.f32 %v1263_v21, %v1200_v32 }
 0x3db   :  { %v1360_v19 = vadd.f32 %v1343_v55, %v1280_v3 }
 0x3dc   :  { %v1423_v61 = vpop.permute.xlu1 %1422  ;;  %v1503_v9 = vpop.permute.xlu0 %1502 }
 0x3dd   :  { %v1440_v4 = vadd.f32 %v1423_v61, %v1360_v19 }
 0x3df   :  { %v1520_v36 = vadd.f32 %v1503_v9, %v1440_v4 }
 0x3e0   :  { %v1583_v62 = vpop.permute.xlu1 %1582  ;;  %v1663_v22 = vpop.permute.xlu0 %1662 }
 0x3e1   :  { %v1600_v56 = vadd.f32 %v1583_v62, %v1520_v36 }
 0x3e3   :  { %v1680_v46 = vadd.f32 %v1663_v22, %v1600_v56 }
 0x3e4   :  { %v865_v16 = vpop.permute.xlu1 %864  ;;  %v1743_v37 = vpop.permute.xlu0 %1742 }
 0x3e5   :  { %v881_v2 = vadd.f32 %v865_v16, %v801_v10  ;;  %v1760_v41 = vadd.f32 %v1743_v37, %v1680_v46 }
 0x3e8   :  { %v1025_v5 = vpop.permute.xlu1 %1024  ;;  %v945_v34 = vpop.permute.xlu0 %944 }
 0x3e9   :  { %v961_v27 = vadd.f32 %v945_v34, %v881_v2 }
 0x3eb   :  { %v1041_v14 = vadd.f32 %v1025_v5, %v961_v27 }
 0x3ec   :  { %v1185_v39 = vpop.permute.xlu1 %1184  ;;  %v1105_v0 = vpop.permute.xlu0 %1104 }
 0x3ed   :  { %v1121_v23 = vadd.f32 %v1105_v0, %v1041_v14 }
 0x3ef   :  { %v1201_v51 = vadd.f32 %v1185_v39, %v1121_v23 }
 0x3f0   :  { %v1345_v63 = vpop.permute.xlu1 %1344  ;;  %v1265_v48 = vpop.permute.xlu0 %1264 }
 0x3f1   :  { %v1281_v54 = vadd.f32 %v1265_v48, %v1201_v51 }
 0x3f3   :  { %v1361_v25 = vadd.f32 %v1345_v63, %v1281_v54 }
 0x3f4   :  { %v1505_v33 = vpop.permute.xlu1 %1504  ;;  %v1425_v45 = vpop.permute.xlu0 %1424 }
 0x3f5   :  { %v1441_v7 = vadd.f32 %v1425_v45, %v1361_v25 }
 0x3f7   :  { %v1521_v40 = vadd.f32 %v1505_v33, %v1441_v7 }
 0x3f8   :  { %v1665_v26 = vpop.permute.xlu1 %1664  ;;  %v1585_v59 = vpop.permute.xlu0 %1584 }
 0x3f9   :  { %v1601_v50 = vadd.f32 %v1585_v59, %v1521_v40 }
 0x3fb   :  { %v1681_v61 = vadd.f32 %v1665_v26, %v1601_v50 }
 0x3fc   :  { %v1821_v1 = vpop.permute.xlu1 %1820  ;;  %v1899_v35 = vpop.permute.xlu0 %1898 }
 0x3fd   :  { %v1918_v38 = vadd.f32 %v1899_v35, %v3602_v29  ;;  %v1839_v49 = vadd.f32 %v1821_v1, %v1759_v42 }
 0x400   :  { %v1977_v6 = vpop.permute.xlu1 %1976  ;;  %v1745_v12 = vpop.permute.xlu0 %1744 }
 0x401   :  { %v1997_v53 = vadd.f32 %v1977_v6, %v3595_v24  ;;  %v1761_v47 = vadd.f32 %v1745_v12, %v1681_v61 }
 0x403   :  { %v2008_v15 = vsel %vm2002_vm8, %v1997_v53, 0.0 }
 0x404   :  { %v2009_v43 = vadd.f32 %v2008_v15, %v3555_v60  ;;  %v1823_v28 = vpop.permute.xlu1 %1822  ;;  %v1901_v52 = vpop.permute.xlu0 %1900 }
 0x405   :  { %v1919_v57 = vadd.f32 %v1901_v52, %v1839_v49  ;;  %v1840_v60 = vadd.f32 %v1823_v28, %v1760_v41 }
 0x408   :  { %v1979_v20 = vpop.permute.xlu1 %1978  ;;  %v1825_v30 = vpop.permute.xlu0 %1824 }
 0x409   :  { %v1998_v44 = vadd.f32 %v1979_v20, %v1918_v38  ;;  %v1841_v8 = vadd.f32 %v1825_v30, %v1761_v47 }
 0x40b   :  { %v2010_v24 = vsel %vm2002_vm8, %v1998_v44, 0.0 }
 0x40c   :  { %v2011_v17 = vadd.f32 %v2010_v24, %v2009_v43  ;;  %v1903_v21 = vpop.permute.xlu1 %1902  ;;  %v1981_v55 = vpop.permute.xlu0 %1980 }
 0x40d   :  { %v1999_v9 = vadd.f32 %v1981_v55, %v1919_v57  ;;  %v1920_v11 = vadd.f32 %v1903_v21, %v1840_v60 }
 0x40f   :  { %v2012_v62 = vsel %vm2002_vm8, %v1999_v9, 0.0 }
 0x410   :  { %v2013_v29 = vadd.f32 %v2012_v62, %v2011_v17  ;;  %v1905_v22 = vpop.permute.xlu1 %1904  ;;  %v1983_v13 = vpop.permute.xlu0 %1982 }
 0x411   :  { %v2000_v42 = vadd.f32 %v1983_v13, %v1920_v11  ;;  %v1921_v16 = vadd.f32 %v1905_v22, %v1841_v8 }
 0x413   :  { %v2014_v37 = vsel %vm2002_vm8, %v2000_v42, 0.0 }
 0x414   :  { %v2015_v58 = vadd.f32 %v2014_v37, %v2013_v29  ;;  %v1985_v10 = vpop.permute.xlu1 %1984 }
 0x415   :  { %v2001_v18 = vadd.f32 %v1985_v10, %v1921_v16 }
 0x417   :  { %v2016_v2 = vsel %vm2002_vm8, %v2001_v18, 0.0 }
 0x418   :  { %v2017_v5 = vadd.f32 %v2016_v2, %v2015_v58 }
 0x41a   :  { %v2018_v34 = vrot.slane %v2017_v5, 4 }
 0x41c   :  { %v2019_v27 = vadd.f32 %v2018_v34, %v2017_v5 }
 0x41e   :  { %v2020_v31 = vrot.slane %v2019_v27, 2 }
 0x420   :  { %v2021_v39 = vadd.f32 %v2020_v31, %v2019_v27 }
 0x422   :  { %v2022_v0 = vrot.slane %v2021_v39, 1 }
 0x424   :  { %v2023_v14 = vadd.f32 %v2022_v0, %v2021_v39 }
 0x426   :  { %v2094_v32 = vmul.f32 -1.442695, %v2023_v14 }
 0x428   :  { %2325 = vpow2.f32 %v2094_v32 }
 0x432   :  { %v2326_v63 = vpop.eup %2325 }
 0x433   :  { %v2027_v48 = vadd.f32 1.0, %v2326_v63 }
 0x435   :  { %2327 = vrcp.f32 %v2027_v48 }
 0x43f   :  { %v2328_v23 = vpop.eup %2327 }
 0x440   :  { %2031 = vst.msk [vmem:[#allocation2] sm:$0x1] %vm2030_vm10, %v2328_v23 }
 0x441   :  { %2340 = shalt.err (!%p2337_p4)
}
 0x442   :  { %s2341_s23 = scalar_lea.hbm %s3635_s5, 16 }
 0x443   :  { %p2342_p5 = scmp.ne.s32.totalorder %s3635_s5, %s2341_s23  ;;  %p2345_p6 = scmp.lt.u32.totalorder %s2341_s23, %s3635_s5 }
 0x445   :  { %p2347_p7 = pnand %p2345_p6, %p2342_p5 }
 0x447   :  { %2350 = shalt.err (!%p2347_p7)
}
 0x448   :  { %2041 = dma.vmem_to_hbm [thread:$0]  %s2039_s19, 16, %s3635_s5, [#allocation3]  }
 0x449   :  { %2351 = dma.done.wait [#allocation3], 16  }
 0x44a   :  { %2352 = vsyncadd [#allocation3], 4294967280 }
 0x44b   :  { %2045 = vsyncpa [#allocation3], 1 }

</bundles_post_ra>
